<compile_context>
chip_gen: v5e
topology: v5e:2x2
jax: 0.10.0
libtpu: 0.0.40
codegen_flags: <defaults>
</compile_context>

<pallas_src>
import functools

import numpy as np

import jax
import jax.numpy as jnp
from jax.experimental import pallas as pl
from jax.experimental.pallas import tpu as pltpu


# ----------------------------- small in-kernel helpers -----------------------------

def _gru_from_gi(gi, h, whh, bhh):
    """GRU cell step given precomputed input gates gi = x @ W_ih + b_ih (PyTorch r,z,n order)."""
    H = h.shape[-1]
    gh = jnp.dot(h, whh, preferred_element_type=jnp.float32) + bhh
    i_r, i_z, i_n = gi[:, :H], gi[:, H:2 * H], gi[:, 2 * H:]
    h_r, h_z, h_n = gh[:, :H], gh[:, H:2 * H], gh[:, 2 * H:]
    r = jax.nn.sigmoid(i_r + h_r)
    z = jax.nn.sigmoid(i_z + h_z)
    n = jnp.tanh(i_n + r * h_n)
    return (1.0 - z) * n + z * h


def _log_softmax(x):
    m = jnp.max(x, axis=-1, keepdims=True)
    lse = m + jnp.log(jnp.sum(jnp.exp(x - m), axis=-1, keepdims=True))
    return x - lse


def _softmax(x):
    m = jnp.max(x, axis=-1, keepdims=True)
    e = jnp.exp(x - m)
    return e * pl.reciprocal(jnp.sum(e, axis=-1, keepdims=True), approx=True)


def _attend(h, enc2d, mask, sel):
    """Luong dot attention without 3-D transposes.

    h:     (B, H)          query
    enc2d: (T_enc*B, H)    encoder outputs, row r = t*B + b
    mask:  (B, T_enc*B)    mask[b, r] = 1 iff r belongs to batch element b
    sel:   (T_enc*B, T_enc) sel[r, t] = 1 iff row r belongs to timestep t
    returns attn (B, T_enc), ctx (B, H)
    """
    f32 = jnp.float32
    # raw[b, r] = <h[b], enc[r]>   (contracting last dims of both; no explicit transpose)
    raw = jax.lax.dot_general(h, enc2d, (((1,), (1,)), ((), ())),
                              preferred_element_type=f32)           # (B, R)
    scores = jnp.dot(raw * mask, sel, preferred_element_type=f32)   # (B, T_enc)
    attn = _softmax(scores)                                         # (B, T_enc)
    attn_exp = jax.lax.dot_general(attn, sel, (((1,), (1,)), ((), ())),
                                   preferred_element_type=f32) * mask  # (B, R)
    ctx = jnp.dot(attn_exp, enc2d, preferred_element_type=f32)      # (B, H)
    return attn, ctx


# ----------------------------- fused seq2seq core (encoder + decoder) -----------------------------

def _seq2seq_core(enc_tok_ref, dec_tok_ref, mask_ref, sel_ref,
                  enc_emb_ref, enc_wih_ref, enc_whh_ref, enc_bih_ref, enc_bhh_ref,
                  dec_emb_ref, dec_wih_ref, dec_whh_ref, dec_bih_ref, dec_bhh_ref,
                  wcmb_ref, bcmb_ref, wout_ref, bout_ref,
                  enc_scr, *, B, T_enc, T_dec, H, V, use_tf,
                  logp_ref=None, attn_ref=None):
    f32 = jnp.float32
    R_enc, R_dec = T_enc * B, T_dec * B
    mask = mask_ref[...]                       # (B, R_enc)
    sel = sel_ref[...]                         # (R_enc, T_enc)

    # ---------------- encoder: 1-layer GRU over T_enc, fully unrolled ----------------
    onehot_enc = (enc_tok_ref[...] ==
                  jax.lax.broadcasted_iota(jnp.int32, (R_enc, V), 1)).astype(f32)
    enc_xproj = jnp.dot(enc_emb_ref[...], enc_wih_ref[...],
                        preferred_element_type=f32)                 # (V, 3H) = emb @ W_ih
    gi_enc = jnp.dot(onehot_enc, enc_xproj,
                     preferred_element_type=f32) + enc_bih_ref[...]  # (R_enc, 3H)
    enc_whh = enc_whh_ref[...]
    enc_bhh = enc_bhh_ref[...]

    h = jnp.zeros((B, H), f32)
    for t in range(T_enc):                     # static, fully unrolled recurrence
        h = _gru_from_gi(gi_enc[t * B:(t + 1) * B, :], h, enc_whh, enc_bhh)
        enc_scr[t * B:(t + 1) * B, :] = h
    enc2d = enc_scr[...]                       # (R_enc, H), row r = t*B + b

    # ---------------- attention decoder: GRU over T_dec, fully unrolled ----------------
    onehot_dec = (dec_tok_ref[...] ==
                  jax.lax.broadcasted_iota(jnp.int32, (R_dec, V), 1)).astype(f32)
    dec_xproj = jnp.dot(dec_emb_ref[...], dec_wih_ref[...],
                        preferred_element_type=f32)                 # (V, 3H)
    dec_bih = dec_bih_ref[...]
    gi_dec = jnp.dot(onehot_dec, dec_xproj,
                     preferred_element_type=f32) + dec_bih          # (R_dec, 3H)
    dec_whh = dec_whh_ref[...]
    dec_bhh = dec_bhh_ref[...]
    wc_ctx = wcmb_ref[0:H, :]                  # split W_cmb: no lane-axis concat needed
    wc_hid = wcmb_ref[H:2 * H, :]
    bcmb = bcmb_ref[...]
    wout = wout_ref[...]
    bout = bout_ref[...]
    colv = jax.lax.broadcasted_iota(jnp.int32, (B, V), 1)

    gi_feed = gi_dec[0:B, :]                   # SOS-driven input gates (greedy path, step 0)
    for t in range(T_dec):                     # static, fully unrolled recurrence
        gi = gi_dec[t * B:(t + 1) * B, :] if use_tf else gi_feed
        h = _gru_from_gi(gi, h, dec_whh, dec_bhh)
        attn, ctx = _attend(h, enc2d, mask, sel)
        combined = jnp.tanh(jnp.dot(ctx, wc_ctx, preferred_element_type=f32)
                            + jnp.dot(h, wc_hid, preferred_element_type=f32) + bcmb)
        logits = jnp.dot(combined, wout, preferred_element_type=f32) + bout  # (B, V)

        if logp_ref is not None:
            logp_ref[t] = _log_softmax(logits).astype(logp_ref.dtype)
        if attn_ref is not None:
            attn_ref[t] = attn.astype(attn_ref.dtype)

        if not use_tf:
            # greedy feedback: argmax -> one-hot -> next-step input gates (only in greedy trace)
            mx = jnp.max(logits, axis=-1, keepdims=True)
            pred = jnp.min(jnp.where(logits >= mx, colv, V), axis=-1, keepdims=True)  # (B, 1)
            gi_feed = (jnp.dot((colv == pred).astype(f32), dec_xproj,
                               preferred_element_type=f32) + dec_bih)
    return enc2d, h, mask, sel


# ----------------------------- kernels -----------------------------

def _pretrain_kernel(enc_tok_ref, dec_tok_ref, mask_ref, sel_ref,
                     enc_emb_ref, enc_wih_ref, enc_whh_ref, enc_bih_ref, enc_bhh_ref,
                     dec_emb_ref, dec_wih_ref, dec_whh_ref, dec_bih_ref, dec_bhh_ref,
                     wcmb_ref, bcmb_ref, wout_ref, bout_ref,
                     logp_ref, attn_ref, hfin_ref, enc_scr,
                     *, B, T_enc, T_dec, H, V, use_tf):
    _, h, _, _ = _seq2seq_core(
        enc_tok_ref, dec_tok_ref, mask_ref, sel_ref,
        enc_emb_ref, enc_wih_ref, enc_whh_ref, enc_bih_ref, enc_bhh_ref,
        dec_emb_ref, dec_wih_ref, dec_whh_ref, dec_bih_ref, dec_bhh_ref,
        wcmb_ref, bcmb_ref, wout_ref, bout_ref,
        enc_scr, B=B, T_enc=T_enc, T_dec=T_dec, H=H, V=V, use_tf=use_tf,
        logp_ref=logp_ref, attn_ref=attn_ref)
    hfin_ref[...] = h.astype(hfin_ref.dtype)   # written once, after the loop


def _multitask_kernel(enc_tok_ref, dec_tok_ref, mask_ref, sel_ref,
                      enc_emb_ref, enc_wih_ref, enc_whh_ref, enc_bih_ref, enc_bhh_ref,
                      dec_emb_ref, dec_wih_ref, dec_whh_ref, dec_bih_ref, dec_bhh_ref,
                      wcmb_ref, bcmb_ref, wout_ref, bout_ref,
                      wcls_ref, bcls_ref,
                      cls_logp_ref, cls_attn_ref, enc_scr,
                      *, B, T_enc, T_dec, H, V):
    # greedy decoder with NO per-step HBM outputs, classification fused on top of the resident
    # encoder outputs and final decoder hidden.
    enc2d, h, mask, sel = _seq2seq_core(
        enc_tok_ref, dec_tok_ref, mask_ref, sel_ref,
        enc_emb_ref, enc_wih_ref, enc_whh_ref, enc_bih_ref, enc_bhh_ref,
        dec_emb_ref, dec_wih_ref, dec_whh_ref, dec_bih_ref, dec_bhh_ref,
        wcmb_ref, bcmb_ref, wout_ref, bout_ref,
        enc_scr, B=B, T_enc=T_enc, T_dec=T_dec, H=H, V=V, use_tf=False,
        logp_ref=None, attn_ref=None)
    attn_c, ctx_c = _attend(h, enc2d, mask, sel)
    cls_logits = jnp.dot(ctx_c, wcls_ref[...],
                         preferred_element_type=jnp.float32) + bcls_ref[...]
    cls_logp_ref[...] = _log_softmax(cls_logits).astype(cls_logp_ref.dtype)
    cls_attn_ref[...] = attn_c.astype(cls_attn_ref.dtype)


# ----------------------------- host-side constant helpers -----------------------------

def _attention_consts(B, T_enc):
    """Constant batch/time selection matrices for flattened (T_enc*B, H) encoder outputs."""
    R = T_enc * B
    r = np.arange(R)
    sel = (r[:, None] // B == np.arange(T_enc)[None, :]).astype(np.float32)   # (R, T_enc)
    mask = (r[None, :] % B == np.arange(B)[:, None]).astype(np.float32)       # (B, R)
    return jnp.asarray(mask), jnp.asarray(sel)


# ----------------------------- Multi_Task wrapper -----------------------------

class MultiTaskPallas:
    def __init__(self, key, vocab=32, emb=16, hidden=32, num_class=4, max_len=8):
        self.V, self.E, self.H, self.C, self.max_len = vocab, emb, hidden, num_class, max_len
        ks = jax.random.split(key, 16)
        s = 0.1
        nrm = lambda k, shp: (s * jax.random.normal(k, shp)).astype(jnp.float32)
        # encoder params (Embedding(V,E) + GRU(E->H))
        self.enc_emb = nrm(ks[0], (vocab, emb))
        self.enc_wih = nrm(ks[1], (emb, 3 * hidden))
        self.enc_whh = nrm(ks[2], (hidden, 3 * hidden))
        self.enc_bih = nrm(ks[3], (1, 3 * hidden))
        self.enc_bhh = nrm(ks[4], (1, 3 * hidden))
        # decoder params (Embedding(V,E) + GRU(E->H) + attention combine + output proj)
        self.dec_emb = nrm(ks[5], (vocab, emb))
        self.dec_wih = nrm(ks[6], (emb, 3 * hidden))
        self.dec_whh = nrm(ks[7], (hidden, 3 * hidden))
        self.dec_bih = nrm(ks[8], (1, 3 * hidden))
        self.dec_bhh = nrm(ks[9], (1, 3 * hidden))
        self.dec_wcmb = nrm(ks[10], (2 * hidden, hidden))
        self.dec_bcmb = nrm(ks[11], (1, hidden))
        self.dec_wout = nrm(ks[12], (hidden, vocab))
        self.dec_bout = nrm(ks[13], (1, vocab))
        # classification params (Linear(H -> C))
        self.cls_w = nrm(ks[14], (hidden, num_class))
        self.cls_b = nrm(ks[15], (1, num_class))
        self.sos_id = 1

    # --- token prep (cheap int-only glue: layout for in-kernel one-hot embedding) ---
    def _token_inputs(self, input_variable, target):
        B, T_enc = input_variable.shape
        T_dec = self.max_len
        enc_tok = jnp.transpose(input_variable.astype(jnp.int32)).reshape(T_enc * B, 1)
        dec_tok_tb = jnp.full((T_dec, B), self.sos_id, jnp.int32)     # SOS at t=0
        if target is not None:
            tgt_t = jnp.transpose(target.astype(jnp.int32))           # (T_tgt, B)
            dec_tok_tb = dec_tok_tb.at[1:].set(tgt_t[:T_dec - 1])
        dec_tok = dec_tok_tb.reshape(T_dec * B, 1)
        return enc_tok, dec_tok

    def forward(self, input_variable, input_lengths, target=None,
                teacher_forcing_ratio=0.0, train_type=None):
        del input_lengths  # TODO(synk): packed-sequence length handling not reproduced
        B, T_enc = input_variable.shape
        T_dec, H, V, C = self.max_len, self.H, self.V, self.C
        enc_tok, dec_tok = self._token_inputs(input_variable, target)
        mask, sel = _attention_consts(B, T_enc)
        common_args = (enc_tok, dec_tok, mask, sel,
                       self.enc_emb, self.enc_wih, self.enc_whh, self.enc_bih, self.enc_bhh,
                       self.dec_emb, self.dec_wih, self.dec_whh, self.dec_bih, self.dec_bhh,
                       self.dec_wcmb, self.dec_bcmb, self.dec_wout, self.dec_bout)

        if train_type == 'pre_train':
            use_tf = bool(teacher_forcing_ratio >= 0.5)  # TODO(synk): deterministic threshold
            kernel = functools.partial(_pretrain_kernel, B=B, T_enc=T_enc, T_dec=T_dec,
                                       H=H, V=V, use_tf=use_tf)
            logp, attn, dec_hidden = pl.pallas_call(
                kernel,
                out_shape=(jax.ShapeDtypeStruct((T_dec, B, V), jnp.float32),
                           jax.ShapeDtypeStruct((T_dec, B, T_enc), jnp.float32),
                           jax.ShapeDtypeStruct((B, H), jnp.float32)),
                scratch_shapes=[pltpu.VMEM((T_enc * B, H), jnp.float32)],
            )(*common_args)
            ret_dict = {"attention_score": attn, "length": T_dec}
            return logp, dec_hidden, ret_dict
        else:
            kernel = functools.partial(_multitask_kernel, B=B, T_enc=T_enc, T_dec=T_dec,
                                       H=H, V=V)
            class_logp, class_attn = pl.pallas_call(
                kernel,
                out_shape=(jax.ShapeDtypeStruct((B, C), jnp.float32),
                           jax.ShapeDtypeStruct((B, T_enc), jnp.float32)),
                scratch_shapes=[pltpu.VMEM((T_enc * B, H), jnp.float32)],
            )(*common_args, self.cls_w, self.cls_b)
            return class_logp, class_attn


# ----------------------------- demo -----------------------------

if __name__ == "__main__":
    key = jax.random.PRNGKey(0)
    k_model, k_in, k_tgt = jax.random.split(key, 3)

    B, T_enc, T_dec, V, E, H, C = 2, 8, 8, 32, 16, 32, 4
    model = MultiTaskPallas(k_model, vocab=V, emb=E, hidden=H, num_class=C, max_len=T_dec)

    input_tokens = jax.random.randint(k_in, (B, T_enc), 0, V, dtype=jnp.int32)
    target_tokens = jax.random.randint(k_tgt, (B, T_dec), 0, V, dtype=jnp.int32)
    input_lengths = [T_enc, T_enc - 2]

    # pre_train path: fused encoder + teacher-forced attention decoder (log_softmax outputs)
    logp, dec_hidden, ret = model.forward(input_tokens, input_lengths, target=target_tokens,
                                          teacher_forcing_ratio=1.0, train_type='pre_train')
    jax.block_until_ready((logp, dec_hidden, ret["attention_score"]))
    assert logp.shape == (T_dec, B, V) and dec_hidden.shape == (B, H)
    assert ret["attention_score"].shape == (T_dec, B, T_enc)
    assert bool(jnp.all(jnp.isfinite(logp)))

    # multi-task path: fused encoder + greedy decoder + classification over encoder outputs
    class_logp, class_attn = model.forward(input_tokens, input_lengths, train_type=None)
    jax.block_until_ready((class_logp, class_attn))
    assert class_logp.shape == (B, C) and class_attn.shape == (B, T_enc)
    assert bool(jnp.all(jnp.isfinite(class_logp)))

    print("KERNEL_OK")
</pallas_src>

<mosaic_0001>
module attributes {stable_mosaic.version = 11 : i64} {
  func.func @_pretrain_kernel(%arg0: memref<16x1xi32, #tpu.memory_space<vmem>>, %arg1: memref<16x1xi32, #tpu.memory_space<vmem>>, %arg2: memref<2x16xf32, #tpu.memory_space<vmem>>, %arg3: memref<16x8xf32, #tpu.memory_space<vmem>>, %arg4: memref<32x16xf32, #tpu.memory_space<vmem>>, %arg5: memref<16x96xf32, #tpu.memory_space<vmem>>, %arg6: memref<32x96xf32, #tpu.memory_space<vmem>>, %arg7: memref<1x96xf32, #tpu.memory_space<vmem>>, %arg8: memref<1x96xf32, #tpu.memory_space<vmem>>, %arg9: memref<32x16xf32, #tpu.memory_space<vmem>>, %arg10: memref<16x96xf32, #tpu.memory_space<vmem>>, %arg11: memref<32x96xf32, #tpu.memory_space<vmem>>, %arg12: memref<1x96xf32, #tpu.memory_space<vmem>>, %arg13: memref<1x96xf32, #tpu.memory_space<vmem>>, %arg14: memref<64x32xf32, #tpu.memory_space<vmem>>, %arg15: memref<1x32xf32, #tpu.memory_space<vmem>>, %arg16: memref<32x32xf32, #tpu.memory_space<vmem>>, %arg17: memref<1x32xf32, #tpu.memory_space<vmem>>, %arg18: memref<8x2x32xf32, #tpu.memory_space<vmem>>, %arg19: memref<8x2x8xf32, #tpu.memory_space<vmem>>, %arg20: memref<2x32xf32, #tpu.memory_space<vmem>>, %arg21: memref<16x32xf32, #tpu.memory_space<vmem>>) attributes {dimension_semantics = [], scalar_prefetch = 0 : i64, scratch_operands = 1 : i64, tpu.core_type = #tpu.core_type<tc>} {
    %c0 = arith.constant 0 : index
    %c0_0 = arith.constant 0 : index
    %0 = vector.load %arg2[%c0, %c0_0] : memref<2x16xf32, #tpu.memory_space<vmem>>, vector<2x16xf32>
    %c0_1 = arith.constant 0 : index
    %c0_2 = arith.constant 0 : index
    %1 = vector.load %arg3[%c0_1, %c0_2] : memref<16x8xf32, #tpu.memory_space<vmem>>, vector<16x8xf32>
    %c0_3 = arith.constant 0 : index
    %c0_4 = arith.constant 0 : index
    %2 = vector.load %arg0[%c0_3, %c0_4] : memref<16x1xi32, #tpu.memory_space<vmem>>, vector<16x1xi32>
    %3 = tpu.iota {dimensions = array<i32: 1>} : vector<16x32xi32>
    %4 = vector.broadcast %2 : vector<16x1xi32> to vector<16x32xi32>
    %5 = arith.cmpi eq, %4, %3 : vector<16x32xi32>
    %6 = arith.extui %5 : vector<16x32xi1> to vector<16x32xi32>
    %7 = arith.sitofp %6 : vector<16x32xi32> to vector<16x32xf32>
    %c0_5 = arith.constant 0 : index
    %c0_6 = arith.constant 0 : index
    %8 = vector.load %arg4[%c0_5, %c0_6] : memref<32x16xf32, #tpu.memory_space<vmem>>, vector<32x16xf32>
    %c0_7 = arith.constant 0 : index
    %c0_8 = arith.constant 0 : index
    %9 = vector.load %arg5[%c0_7, %c0_8] : memref<16x96xf32, #tpu.memory_space<vmem>>, vector<16x96xf32>
    %cst = arith.constant dense<0.000000e+00> : vector<32x96xf32>
    %10 = tpu.matmul %8, %9, %cst {dimension_numbers = #tpu.dot_dimension_numbers<[1], [0], [0], [1], [0, 0, 1, 1], [], []>} : vector<32x16xf32>, vector<16x96xf32>, vector<32x96xf32> -> vector<32x96xf32>
    %cst_9 = arith.constant dense<0.000000e+00> : vector<16x96xf32>
    %11 = tpu.matmul %7, %10, %cst_9 {dimension_numbers = #tpu.dot_dimension_numbers<[1], [0], [0], [1], [0, 0, 1, 1], [], []>} : vector<16x32xf32>, vector<32x96xf32>, vector<16x96xf32> -> vector<16x96xf32>
    %c0_10 = arith.constant 0 : index
    %c0_11 = arith.constant 0 : index
    %12 = vector.load %arg7[%c0_10, %c0_11] : memref<1x96xf32, #tpu.memory_space<vmem>>, vector<1x96xf32>
    %13 = vector.broadcast %12 : vector<1x96xf32> to vector<16x96xf32>
    %14 = arith.addf %11, %13 : vector<16x96xf32>
    %c0_12 = arith.constant 0 : index
    %c0_13 = arith.constant 0 : index
    %15 = vector.load %arg6[%c0_12, %c0_13] : memref<32x96xf32, #tpu.memory_space<vmem>>, vector<32x96xf32>
    %c0_14 = arith.constant 0 : index
    %c0_15 = arith.constant 0 : index
    %16 = vector.load %arg8[%c0_14, %c0_15] : memref<1x96xf32, #tpu.memory_space<vmem>>, vector<1x96xf32>
    %cst_16 = arith.constant 0.000000e+00 : f32
    %17 = vector.broadcast %cst_16 : f32 to vector<2x32xf32>
    %18 = vector.extract_strided_slice %14 {offsets = [0, 0], sizes = [2, 96], strides = [1, 1]} : vector<16x96xf32> to vector<2x96xf32>
    %cst_17 = arith.constant dense<0.000000e+00> : vector<2x96xf32>
    %19 = tpu.matmul %17, %15, %cst_17 {dimension_numbers = #tpu.dot_dimension_numbers<[1], [0], [0], [1], [0, 0, 1, 1], [], []>} : vector<2x32xf32>, vector<32x96xf32>, vector<2x96xf32> -> vector<2x96xf32>
    %20 = vector.broadcast %16 : vector<1x96xf32> to vector<2x96xf32>
    %21 = arith.addf %19, %20 : vector<2x96xf32>
    %22 = vector.extract_strided_slice %18 {offsets = [0, 0], sizes = [2, 32], strides = [1, 1]} : vector<2x96xf32> to vector<2x32xf32>
    %23 = vector.extract_strided_slice %18 {offsets = [0, 32], sizes = [2, 32], strides = [1, 1]} : vector<2x96xf32> to vector<2x32xf32>
    %24 = vector.extract_strided_slice %18 {offsets = [0, 64], sizes = [2, 32], strides = [1, 1]} : vector<2x96xf32> to vector<2x32xf32>
    %25 = vector.extract_strided_slice %21 {offsets = [0, 0], sizes = [2, 32], strides = [1, 1]} : vector<2x96xf32> to vector<2x32xf32>
    %26 = vector.extract_strided_slice %21 {offsets = [0, 32], sizes = [2, 32], strides = [1, 1]} : vector<2x96xf32> to vector<2x32xf32>
    %27 = vector.extract_strided_slice %21 {offsets = [0, 64], sizes = [2, 32], strides = [1, 1]} : vector<2x96xf32> to vector<2x32xf32>
    %28 = arith.addf %22, %25 : vector<2x32xf32>
    %29 = arith.negf %28 : vector<2x32xf32>
    %30 = math.exp %29 : vector<2x32xf32>
    %cst_18 = arith.constant 1.000000e+00 : f32
    %31 = vector.broadcast %cst_18 : f32 to vector<2x32xf32>
    %32 = arith.addf %31, %30 : vector<2x32xf32>
    %33 = arith.divf %31, %32 : vector<2x32xf32>
    %34 = arith.addf %23, %26 : vector<2x32xf32>
    %35 = arith.negf %34 : vector<2x32xf32>
    %36 = math.exp %35 : vector<2x32xf32>
    %cst_19 = arith.constant 1.000000e+00 : f32
    %37 = vector.broadcast %cst_19 : f32 to vector<2x32xf32>
    %38 = arith.addf %37, %36 : vector<2x32xf32>
    %39 = arith.divf %37, %38 : vector<2x32xf32>
    %40 = arith.mulf %33, %27 : vector<2x32xf32>
    %41 = arith.addf %24, %40 : vector<2x32xf32>
    %42 = math.tanh %41 : vector<2x32xf32>
    %cst_20 = arith.constant 1.000000e+00 : f32
    %43 = vector.broadcast %cst_20 : f32 to vector<2x32xf32>
    %44 = arith.subf %43, %39 : vector<2x32xf32>
    %45 = arith.mulf %44, %42 : vector<2x32xf32>
    %46 = arith.mulf %39, %17 : vector<2x32xf32>
    %47 = arith.addf %45, %46 : vector<2x32xf32>
    %c0_21 = arith.constant 0 : index
    %c0_22 = arith.constant 0 : index
    %48 = vector.load %arg21[%c0_21, %c0_22] : memref<16x32xf32, #tpu.memory_space<vmem>>, vector<2x32xf32>
    tpu.vector_store %arg21[%c0_21, %c0_22], %47 {strides = array<i32>} : memref<16x32xf32, #tpu.memory_space<vmem>>, vector<2x32xf32>,
    %49 = vector.extract_strided_slice %14 {offsets = [2, 0], sizes = [2, 96], strides = [1, 1]} : vector<16x96xf32> to vector<2x96xf32>
    %cst_23 = arith.constant dense<0.000000e+00> : vector<2x96xf32>
    %50 = tpu.matmul %47, %15, %cst_23 {dimension_numbers = #tpu.dot_dimension_numbers<[1], [0], [0], [1], [0, 0, 1, 1], [], []>} : vector<2x32xf32>, vector<32x96xf32>, vector<2x96xf32> -> vector<2x96xf32>
    %51 = vector.broadcast %16 : vector<1x96xf32> to vector<2x96xf32>
    %52 = arith.addf %50, %51 : vector<2x96xf32>
    %53 = vector.extract_strided_slice %49 {offsets = [0, 0], sizes = [2, 32], strides = [1, 1]} : vector<2x96xf32> to vector<2x32xf32>
    %54 = vector.extract_strided_slice %49 {offsets = [0, 32], sizes = [2, 32], strides = [1, 1]} : vector<2x96xf32> to vector<2x32xf32>
    %55 = vector.extract_strided_slice %49 {offsets = [0, 64], sizes = [2, 32], strides = [1, 1]} : vector<2x96xf32> to vector<2x32xf32>
    %56 = vector.extract_strided_slice %52 {offsets = [0, 0], sizes = [2, 32], strides = [1, 1]} : vector<2x96xf32> to vector<2x32xf32>
    %57 = vector.extract_strided_slice %52 {offsets = [0, 32], sizes = [2, 32], strides = [1, 1]} : vector<2x96xf32> to vector<2x32xf32>
    %58 = vector.extract_strided_slice %52 {offsets = [0, 64], sizes = [2, 32], strides = [1, 1]} : vector<2x96xf32> to vector<2x32xf32>
    %59 = arith.addf %53, %56 : vector<2x32xf32>
    %60 = arith.negf %59 : vector<2x32xf32>
    %61 = math.exp %60 : vector<2x32xf32>
    %cst_24 = arith.constant 1.000000e+00 : f32
    %62 = vector.broadcast %cst_24 : f32 to vector<2x32xf32>
    %63 = arith.addf %62, %61 : vector<2x32xf32>
    %64 = arith.divf %62, %63 : vector<2x32xf32>
    %65 = arith.addf %54, %57 : vector<2x32xf32>
    %66 = arith.negf %65 : vector<2x32xf32>
    %67 = math.exp %66 : vector<2x32xf32>
    %cst_25 = arith.constant 1.000000e+00 : f32
    %68 = vector.broadcast %cst_25 : f32 to vector<2x32xf32>
    %69 = arith.addf %68, %67 : vector<2x32xf32>
    %70 = arith.divf %68, %69 : vector<2x32xf32>
    %71 = arith.mulf %64, %58 : vector<2x32xf32>
    %72 = arith.addf %55, %71 : vector<2x32xf32>
    %73 = math.tanh %72 : vector<2x32xf32>
    %cst_26 = arith.constant 1.000000e+00 : f32
    %74 = vector.broadcast %cst_26 : f32 to vector<2x32xf32>
    %75 = arith.subf %74, %70 : vector<2x32xf32>
    %76 = arith.mulf %75, %73 : vector<2x32xf32>
    %77 = arith.mulf %70, %47 : vector<2x32xf32>
    %78 = arith.addf %76, %77 : vector<2x32xf32>
    %c2 = arith.constant 2 : index
    %c0_27 = arith.constant 0 : index
    %79 = vector.load %arg21[%c2, %c0_27] : memref<16x32xf32, #tpu.memory_space<vmem>>, vector<2x32xf32>
    tpu.vector_store %arg21[%c2, %c0_27], %78 {strides = array<i32>} : memref<16x32xf32, #tpu.memory_space<vmem>>, vector<2x32xf32>,
    %80 = vector.extract_strided_slice %14 {offsets = [4, 0], sizes = [2, 96], strides = [1, 1]} : vector<16x96xf32> to vector<2x96xf32>
    %cst_28 = arith.constant dense<0.000000e+00> : vector<2x96xf32>
    %81 = tpu.matmul %78, %15, %cst_28 {dimension_numbers = #tpu.dot_dimension_numbers<[1], [0], [0], [1], [0, 0, 1, 1], [], []>} : vector<2x32xf32>, vector<32x96xf32>, vector<2x96xf32> -> vector<2x96xf32>
    %82 = vector.broadcast %16 : vector<1x96xf32> to vector<2x96xf32>
    %83 = arith.addf %81, %82 : vector<2x96xf32>
    %84 = vector.extract_strided_slice %80 {offsets = [0, 0], sizes = [2, 32], strides = [1, 1]} : vector<2x96xf32> to vector<2x32xf32>
    %85 = vector.extract_strided_slice %80 {offsets = [0, 32], sizes = [2, 32], strides = [1, 1]} : vector<2x96xf32> to vector<2x32xf32>
    %86 = vector.extract_strided_slice %80 {offsets = [0, 64], sizes = [2, 32], strides = [1, 1]} : vector<2x96xf32> to vector<2x32xf32>
    %87 = vector.extract_strided_slice %83 {offsets = [0, 0], sizes = [2, 32], strides = [1, 1]} : vector<2x96xf32> to vector<2x32xf32>
    %88 = vector.extract_strided_slice %83 {offsets = [0, 32], sizes = [2, 32], strides = [1, 1]} : vector<2x96xf32> to vector<2x32xf32>
    %89 = vector.extract_strided_slice %83 {offsets = [0, 64], sizes = [2, 32], strides = [1, 1]} : vector<2x96xf32> to vector<2x32xf32>
    %90 = arith.addf %84, %87 : vector<2x32xf32>
    %91 = arith.negf %90 : vector<2x32xf32>
    %92 = math.exp %91 : vector<2x32xf32>
    %cst_29 = arith.constant 1.000000e+00 : f32
    %93 = vector.broadcast %cst_29 : f32 to vector<2x32xf32>
    %94 = arith.addf %93, %92 : vector<2x32xf32>
    %95 = arith.divf %93, %94 : vector<2x32xf32>
    %96 = arith.addf %85, %88 : vector<2x32xf32>
    %97 = arith.negf %96 : vector<2x32xf32>
    %98 = math.exp %97 : vector<2x32xf32>
    %cst_30 = arith.constant 1.000000e+00 : f32
    %99 = vector.broadcast %cst_30 : f32 to vector<2x32xf32>
    %100 = arith.addf %99, %98 : vector<2x32xf32>
    %101 = arith.divf %99, %100 : vector<2x32xf32>
    %102 = arith.mulf %95, %89 : vector<2x32xf32>
    %103 = arith.addf %86, %102 : vector<2x32xf32>
    %104 = math.tanh %103 : vector<2x32xf32>
    %cst_31 = arith.constant 1.000000e+00 : f32
    %105 = vector.broadcast %cst_31 : f32 to vector<2x32xf32>
    %106 = arith.subf %105, %101 : vector<2x32xf32>
    %107 = arith.mulf %106, %104 : vector<2x32xf32>
    %108 = arith.mulf %101, %78 : vector<2x32xf32>
    %109 = arith.addf %107, %108 : vector<2x32xf32>
    %c4 = arith.constant 4 : index
    %c0_32 = arith.constant 0 : index
    %110 = vector.load %arg21[%c4, %c0_32] : memref<16x32xf32, #tpu.memory_space<vmem>>, vector<2x32xf32>
    tpu.vector_store %arg21[%c4, %c0_32], %109 {strides = array<i32>} : memref<16x32xf32, #tpu.memory_space<vmem>>, vector<2x32xf32>,
    %111 = vector.extract_strided_slice %14 {offsets = [6, 0], sizes = [2, 96], strides = [1, 1]} : vector<16x96xf32> to vector<2x96xf32>
    %cst_33 = arith.constant dense<0.000000e+00> : vector<2x96xf32>
    %112 = tpu.matmul %109, %15, %cst_33 {dimension_numbers = #tpu.dot_dimension_numbers<[1], [0], [0], [1], [0, 0, 1, 1], [], []>} : vector<2x32xf32>, vector<32x96xf32>, vector<2x96xf32> -> vector<2x96xf32>
    %113 = vector.broadcast %16 : vector<1x96xf32> to vector<2x96xf32>
    %114 = arith.addf %112, %113 : vector<2x96xf32>
    %115 = vector.extract_strided_slice %111 {offsets = [0, 0], sizes = [2, 32], strides = [1, 1]} : vector<2x96xf32> to vector<2x32xf32>
    %116 = vector.extract_strided_slice %111 {offsets = [0, 32], sizes = [2, 32], strides = [1, 1]} : vector<2x96xf32> to vector<2x32xf32>
    %117 = vector.extract_strided_slice %111 {offsets = [0, 64], sizes = [2, 32], strides = [1, 1]} : vector<2x96xf32> to vector<2x32xf32>
    %118 = vector.extract_strided_slice %114 {offsets = [0, 0], sizes = [2, 32], strides = [1, 1]} : vector<2x96xf32> to vector<2x32xf32>
    %119 = vector.extract_strided_slice %114 {offsets = [0, 32], sizes = [2, 32], strides = [1, 1]} : vector<2x96xf32> to vector<2x32xf32>
    %120 = vector.extract_strided_slice %114 {offsets = [0, 64], sizes = [2, 32], strides = [1, 1]} : vector<2x96xf32> to vector<2x32xf32>
    %121 = arith.addf %115, %118 : vector<2x32xf32>
    %122 = arith.negf %121 : vector<2x32xf32>
    %123 = math.exp %122 : vector<2x32xf32>
    %cst_34 = arith.constant 1.000000e+00 : f32
    %124 = vector.broadcast %cst_34 : f32 to vector<2x32xf32>
    %125 = arith.addf %124, %123 : vector<2x32xf32>
    %126 = arith.divf %124, %125 : vector<2x32xf32>
    %127 = arith.addf %116, %119 : vector<2x32xf32>
    %128 = arith.negf %127 : vector<2x32xf32>
    %129 = math.exp %128 : vector<2x32xf32>
    %cst_35 = arith.constant 1.000000e+00 : f32
    %130 = vector.broadcast %cst_35 : f32 to vector<2x32xf32>
    %131 = arith.addf %130, %129 : vector<2x32xf32>
    %132 = arith.divf %130, %131 : vector<2x32xf32>
    %133 = arith.mulf %126, %120 : vector<2x32xf32>
    %134 = arith.addf %117, %133 : vector<2x32xf32>
    %135 = math.tanh %134 : vector<2x32xf32>
    %cst_36 = arith.constant 1.000000e+00 : f32
    %136 = vector.broadcast %cst_36 : f32 to vector<2x32xf32>
    %137 = arith.subf %136, %132 : vector<2x32xf32>
    %138 = arith.mulf %137, %135 : vector<2x32xf32>
    %139 = arith.mulf %132, %109 : vector<2x32xf32>
    %140 = arith.addf %138, %139 : vector<2x32xf32>
    %c6 = arith.constant 6 : index
    %c0_37 = arith.constant 0 : index
    %141 = vector.load %arg21[%c6, %c0_37] : memref<16x32xf32, #tpu.memory_space<vmem>>, vector<2x32xf32>
    tpu.vector_store %arg21[%c6, %c0_37], %140 {strides = array<i32>} : memref<16x32xf32, #tpu.memory_space<vmem>>, vector<2x32xf32>,
    %142 = vector.extract_strided_slice %14 {offsets = [8, 0], sizes = [2, 96], strides = [1, 1]} : vector<16x96xf32> to vector<2x96xf32>
    %cst_38 = arith.constant dense<0.000000e+00> : vector<2x96xf32>
    %143 = tpu.matmul %140, %15, %cst_38 {dimension_numbers = #tpu.dot_dimension_numbers<[1], [0], [0], [1], [0, 0, 1, 1], [], []>} : vector<2x32xf32>, vector<32x96xf32>, vector<2x96xf32> -> vector<2x96xf32>
    %144 = vector.broadcast %16 : vector<1x96xf32> to vector<2x96xf32>
    %145 = arith.addf %143, %144 : vector<2x96xf32>
    %146 = vector.extract_strided_slice %142 {offsets = [0, 0], sizes = [2, 32], strides = [1, 1]} : vector<2x96xf32> to vector<2x32xf32>
    %147 = vector.extract_strided_slice %142 {offsets = [0, 32], sizes = [2, 32], strides = [1, 1]} : vector<2x96xf32> to vector<2x32xf32>
    %148 = vector.extract_strided_slice %142 {offsets = [0, 64], sizes = [2, 32], strides = [1, 1]} : vector<2x96xf32> to vector<2x32xf32>
    %149 = vector.extract_strided_slice %145 {offsets = [0, 0], sizes = [2, 32], strides = [1, 1]} : vector<2x96xf32> to vector<2x32xf32>
    %150 = vector.extract_strided_slice %145 {offsets = [0, 32], sizes = [2, 32], strides = [1, 1]} : vector<2x96xf32> to vector<2x32xf32>
    %151 = vector.extract_strided_slice %145 {offsets = [0, 64], sizes = [2, 32], strides = [1, 1]} : vector<2x96xf32> to vector<2x32xf32>
    %152 = arith.addf %146, %149 : vector<2x32xf32>
    %153 = arith.negf %152 : vector<2x32xf32>
    %154 = math.exp %153 : vector<2x32xf32>
    %cst_39 = arith.constant 1.000000e+00 : f32
    %155 = vector.broadcast %cst_39 : f32 to vector<2x32xf32>
    %156 = arith.addf %155, %154 : vector<2x32xf32>
    %157 = arith.divf %155, %156 : vector<2x32xf32>
    %158 = arith.addf %147, %150 : vector<2x32xf32>
    %159 = arith.negf %158 : vector<2x32xf32>
    %160 = math.exp %159 : vector<2x32xf32>
    %cst_40 = arith.constant 1.000000e+00 : f32
    %161 = vector.broadcast %cst_40 : f32 to vector<2x32xf32>
    %162 = arith.addf %161, %160 : vector<2x32xf32>
    %163 = arith.divf %161, %162 : vector<2x32xf32>
    %164 = arith.mulf %157, %151 : vector<2x32xf32>
    %165 = arith.addf %148, %164 : vector<2x32xf32>
    %166 = math.tanh %165 : vector<2x32xf32>
    %cst_41 = arith.constant 1.000000e+00 : f32
    %167 = vector.broadcast %cst_41 : f32 to vector<2x32xf32>
    %168 = arith.subf %167, %163 : vector<2x32xf32>
    %169 = arith.mulf %168, %166 : vector<2x32xf32>
    %170 = arith.mulf %163, %140 : vector<2x32xf32>
    %171 = arith.addf %169, %170 : vector<2x32xf32>
    %c8 = arith.constant 8 : index
    %c0_42 = arith.constant 0 : index
    %172 = vector.load %arg21[%c8, %c0_42] : memref<16x32xf32, #tpu.memory_space<vmem>>, vector<2x32xf32>
    tpu.vector_store %arg21[%c8, %c0_42], %171 {strides = array<i32>} : memref<16x32xf32, #tpu.memory_space<vmem>>, vector<2x32xf32>,
    %173 = vector.extract_strided_slice %14 {offsets = [10, 0], sizes = [2, 96], strides = [1, 1]} : vector<16x96xf32> to vector<2x96xf32>
    %cst_43 = arith.constant dense<0.000000e+00> : vector<2x96xf32>
    %174 = tpu.matmul %171, %15, %cst_43 {dimension_numbers = #tpu.dot_dimension_numbers<[1], [0], [0], [1], [0, 0, 1, 1], [], []>} : vector<2x32xf32>, vector<32x96xf32>, vector<2x96xf32> -> vector<2x96xf32>
    %175 = vector.broadcast %16 : vector<1x96xf32> to vector<2x96xf32>
    %176 = arith.addf %174, %175 : vector<2x96xf32>
    %177 = vector.extract_strided_slice %173 {offsets = [0, 0], sizes = [2, 32], strides = [1, 1]} : vector<2x96xf32> to vector<2x32xf32>
    %178 = vector.extract_strided_slice %173 {offsets = [0, 32], sizes = [2, 32], strides = [1, 1]} : vector<2x96xf32> to vector<2x32xf32>
    %179 = vector.extract_strided_slice %173 {offsets = [0, 64], sizes = [2, 32], strides = [1, 1]} : vector<2x96xf32> to vector<2x32xf32>
    %180 = vector.extract_strided_slice %176 {offsets = [0, 0], sizes = [2, 32], strides = [1, 1]} : vector<2x96xf32> to vector<2x32xf32>
    %181 = vector.extract_strided_slice %176 {offsets = [0, 32], sizes = [2, 32], strides = [1, 1]} : vector<2x96xf32> to vector<2x32xf32>
    %182 = vector.extract_strided_slice %176 {offsets = [0, 64], sizes = [2, 32], strides = [1, 1]} : vector<2x96xf32> to vector<2x32xf32>
    %183 = arith.addf %177, %180 : vector<2x32xf32>
    %184 = arith.negf %183 : vector<2x32xf32>
    %185 = math.exp %184 : vector<2x32xf32>
    %cst_44 = arith.constant 1.000000e+00 : f32
    %186 = vector.broadcast %cst_44 : f32 to vector<2x32xf32>
    %187 = arith.addf %186, %185 : vector<2x32xf32>
    %188 = arith.divf %186, %187 : vector<2x32xf32>
    %189 = arith.addf %178, %181 : vector<2x32xf32>
    %190 = arith.negf %189 : vector<2x32xf32>
    %191 = math.exp %190 : vector<2x32xf32>
    %cst_45 = arith.constant 1.000000e+00 : f32
    %192 = vector.broadcast %cst_45 : f32 to vector<2x32xf32>
    %193 = arith.addf %192, %191 : vector<2x32xf32>
    %194 = arith.divf %192, %193 : vector<2x32xf32>
    %195 = arith.mulf %188, %182 : vector<2x32xf32>
    %196 = arith.addf %179, %195 : vector<2x32xf32>
    %197 = math.tanh %196 : vector<2x32xf32>
    %cst_46 = arith.constant 1.000000e+00 : f32
    %198 = vector.broadcast %cst_46 : f32 to vector<2x32xf32>
    %199 = arith.subf %198, %194 : vector<2x32xf32>
    %200 = arith.mulf %199, %197 : vector<2x32xf32>
    %201 = arith.mulf %194, %171 : vector<2x32xf32>
    %202 = arith.addf %200, %201 : vector<2x32xf32>
    %c10 = arith.constant 10 : index
    %c0_47 = arith.constant 0 : index
    %203 = vector.load %arg21[%c10, %c0_47] : memref<16x32xf32, #tpu.memory_space<vmem>>, vector<2x32xf32>
    tpu.vector_store %arg21[%c10, %c0_47], %202 {strides = array<i32>} : memref<16x32xf32, #tpu.memory_space<vmem>>, vector<2x32xf32>,
    %204 = vector.extract_strided_slice %14 {offsets = [12, 0], sizes = [2, 96], strides = [1, 1]} : vector<16x96xf32> to vector<2x96xf32>
    %cst_48 = arith.constant dense<0.000000e+00> : vector<2x96xf32>
    %205 = tpu.matmul %202, %15, %cst_48 {dimension_numbers = #tpu.dot_dimension_numbers<[1], [0], [0], [1], [0, 0, 1, 1], [], []>} : vector<2x32xf32>, vector<32x96xf32>, vector<2x96xf32> -> vector<2x96xf32>
    %206 = vector.broadcast %16 : vector<1x96xf32> to vector<2x96xf32>
    %207 = arith.addf %205, %206 : vector<2x96xf32>
    %208 = vector.extract_strided_slice %204 {offsets = [0, 0], sizes = [2, 32], strides = [1, 1]} : vector<2x96xf32> to vector<2x32xf32>
    %209 = vector.extract_strided_slice %204 {offsets = [0, 32], sizes = [2, 32], strides = [1, 1]} : vector<2x96xf32> to vector<2x32xf32>
    %210 = vector.extract_strided_slice %204 {offsets = [0, 64], sizes = [2, 32], strides = [1, 1]} : vector<2x96xf32> to vector<2x32xf32>
    %211 = vector.extract_strided_slice %207 {offsets = [0, 0], sizes = [2, 32], strides = [1, 1]} : vector<2x96xf32> to vector<2x32xf32>
    %212 = vector.extract_strided_slice %207 {offsets = [0, 32], sizes = [2, 32], strides = [1, 1]} : vector<2x96xf32> to vector<2x32xf32>
    %213 = vector.extract_strided_slice %207 {offsets = [0, 64], sizes = [2, 32], strides = [1, 1]} : vector<2x96xf32> to vector<2x32xf32>
    %214 = arith.addf %208, %211 : vector<2x32xf32>
    %215 = arith.negf %214 : vector<2x32xf32>
    %216 = math.exp %215 : vector<2x32xf32>
    %cst_49 = arith.constant 1.000000e+00 : f32
    %217 = vector.broadcast %cst_49 : f32 to vector<2x32xf32>
    %218 = arith.addf %217, %216 : vector<2x32xf32>
    %219 = arith.divf %217, %218 : vector<2x32xf32>
    %220 = arith.addf %209, %212 : vector<2x32xf32>
    %221 = arith.negf %220 : vector<2x32xf32>
    %222 = math.exp %221 : vector<2x32xf32>
    %cst_50 = arith.constant 1.000000e+00 : f32
    %223 = vector.broadcast %cst_50 : f32 to vector<2x32xf32>
    %224 = arith.addf %223, %222 : vector<2x32xf32>
    %225 = arith.divf %223, %224 : vector<2x32xf32>
    %226 = arith.mulf %219, %213 : vector<2x32xf32>
    %227 = arith.addf %210, %226 : vector<2x32xf32>
    %228 = math.tanh %227 : vector<2x32xf32>
    %cst_51 = arith.constant 1.000000e+00 : f32
    %229 = vector.broadcast %cst_51 : f32 to vector<2x32xf32>
    %230 = arith.subf %229, %225 : vector<2x32xf32>
    %231 = arith.mulf %230, %228 : vector<2x32xf32>
    %232 = arith.mulf %225, %202 : vector<2x32xf32>
    %233 = arith.addf %231, %232 : vector<2x32xf32>
    %c12 = arith.constant 12 : index
    %c0_52 = arith.constant 0 : index
    %234 = vector.load %arg21[%c12, %c0_52] : memref<16x32xf32, #tpu.memory_space<vmem>>, vector<2x32xf32>
    tpu.vector_store %arg21[%c12, %c0_52], %233 {strides = array<i32>} : memref<16x32xf32, #tpu.memory_space<vmem>>, vector<2x32xf32>,
    %235 = vector.extract_strided_slice %14 {offsets = [14, 0], sizes = [2, 96], strides = [1, 1]} : vector<16x96xf32> to vector<2x96xf32>
    %cst_53 = arith.constant dense<0.000000e+00> : vector<2x96xf32>
    %236 = tpu.matmul %233, %15, %cst_53 {dimension_numbers = #tpu.dot_dimension_numbers<[1], [0], [0], [1], [0, 0, 1, 1], [], []>} : vector<2x32xf32>, vector<32x96xf32>, vector<2x96xf32> -> vector<2x96xf32>
    %237 = vector.broadcast %16 : vector<1x96xf32> to vector<2x96xf32>
    %238 = arith.addf %236, %237 : vector<2x96xf32>
    %239 = vector.extract_strided_slice %235 {offsets = [0, 0], sizes = [2, 32], strides = [1, 1]} : vector<2x96xf32> to vector<2x32xf32>
    %240 = vector.extract_strided_slice %235 {offsets = [0, 32], sizes = [2, 32], strides = [1, 1]} : vector<2x96xf32> to vector<2x32xf32>
    %241 = vector.extract_strided_slice %235 {offsets = [0, 64], sizes = [2, 32], strides = [1, 1]} : vector<2x96xf32> to vector<2x32xf32>
    %242 = vector.extract_strided_slice %238 {offsets = [0, 0], sizes = [2, 32], strides = [1, 1]} : vector<2x96xf32> to vector<2x32xf32>
    %243 = vector.extract_strided_slice %238 {offsets = [0, 32], sizes = [2, 32], strides = [1, 1]} : vector<2x96xf32> to vector<2x32xf32>
    %244 = vector.extract_strided_slice %238 {offsets = [0, 64], sizes = [2, 32], strides = [1, 1]} : vector<2x96xf32> to vector<2x32xf32>
    %245 = arith.addf %239, %242 : vector<2x32xf32>
    %246 = arith.negf %245 : vector<2x32xf32>
    %247 = math.exp %246 : vector<2x32xf32>
    %cst_54 = arith.constant 1.000000e+00 : f32
    %248 = vector.broadcast %cst_54 : f32 to vector<2x32xf32>
    %249 = arith.addf %248, %247 : vector<2x32xf32>
    %250 = arith.divf %248, %249 : vector<2x32xf32>
    %251 = arith.addf %240, %243 : vector<2x32xf32>
    %252 = arith.negf %251 : vector<2x32xf32>
    %253 = math.exp %252 : vector<2x32xf32>
    %cst_55 = arith.constant 1.000000e+00 : f32
    %254 = vector.broadcast %cst_55 : f32 to vector<2x32xf32>
    %255 = arith.addf %254, %253 : vector<2x32xf32>
    %256 = arith.divf %254, %255 : vector<2x32xf32>
    %257 = arith.mulf %250, %244 : vector<2x32xf32>
    %258 = arith.addf %241, %257 : vector<2x32xf32>
    %259 = math.tanh %258 : vector<2x32xf32>
    %cst_56 = arith.constant 1.000000e+00 : f32
    %260 = vector.broadcast %cst_56 : f32 to vector<2x32xf32>
    %261 = arith.subf %260, %256 : vector<2x32xf32>
    %262 = arith.mulf %261, %259 : vector<2x32xf32>
    %263 = arith.mulf %256, %233 : vector<2x32xf32>
    %264 = arith.addf %262, %263 : vector<2x32xf32>
    %c14 = arith.constant 14 : index
    %c0_57 = arith.constant 0 : index
    %265 = vector.load %arg21[%c14, %c0_57] : memref<16x32xf32, #tpu.memory_space<vmem>>, vector<2x32xf32>
    tpu.vector_store %arg21[%c14, %c0_57], %264 {strides = array<i32>} : memref<16x32xf32, #tpu.memory_space<vmem>>, vector<2x32xf32>,
    %c0_58 = arith.constant 0 : index
    %c0_59 = arith.constant 0 : index
    %266 = vector.load %arg21[%c0_58, %c0_59] : memref<16x32xf32, #tpu.memory_space<vmem>>, vector<16x32xf32>
    %c0_60 = arith.constant 0 : index
    %c0_61 = arith.constant 0 : index
    %267 = vector.load %arg1[%c0_60, %c0_61] : memref<16x1xi32, #tpu.memory_space<vmem>>, vector<16x1xi32>
    %268 = tpu.iota {dimensions = array<i32: 1>} : vector<16x32xi32>
    %269 = vector.broadcast %267 : vector<16x1xi32> to vector<16x32xi32>
    %270 = arith.cmpi eq, %269, %268 : vector<16x32xi32>
    %271 = arith.extui %270 : vector<16x32xi1> to vector<16x32xi32>
    %272 = arith.sitofp %271 : vector<16x32xi32> to vector<16x32xf32>
    %c0_62 = arith.constant 0 : index
    %c0_63 = arith.constant 0 : index
    %273 = vector.load %arg9[%c0_62, %c0_63] : memref<32x16xf32, #tpu.memory_space<vmem>>, vector<32x16xf32>
    %c0_64 = arith.constant 0 : index
    %c0_65 = arith.constant 0 : index
    %274 = vector.load %arg10[%c0_64, %c0_65] : memref<16x96xf32, #tpu.memory_space<vmem>>, vector<16x96xf32>
    %cst_66 = arith.constant dense<0.000000e+00> : vector<32x96xf32>
    %275 = tpu.matmul %273, %274, %cst_66 {dimension_numbers = #tpu.dot_dimension_numbers<[1], [0], [0], [1], [0, 0, 1, 1], [], []>} : vector<32x16xf32>, vector<16x96xf32>, vector<32x96xf32> -> vector<32x96xf32>
    %c0_67 = arith.constant 0 : index
    %c0_68 = arith.constant 0 : index
    %276 = vector.load %arg12[%c0_67, %c0_68] : memref<1x96xf32, #tpu.memory_space<vmem>>, vector<1x96xf32>
    %cst_69 = arith.constant dense<0.000000e+00> : vector<16x96xf32>
    %277 = tpu.matmul %272, %275, %cst_69 {dimension_numbers = #tpu.dot_dimension_numbers<[1], [0], [0], [1], [0, 0, 1, 1], [], []>} : vector<16x32xf32>, vector<32x96xf32>, vector<16x96xf32> -> vector<16x96xf32>
    %278 = vector.broadcast %276 : vector<1x96xf32> to vector<16x96xf32>
    %279 = arith.addf %277, %278 : vector<16x96xf32>
    %c0_70 = arith.constant 0 : index
    %c0_71 = arith.constant 0 : index
    %280 = vector.load %arg11[%c0_70, %c0_71] : memref<32x96xf32, #tpu.memory_space<vmem>>, vector<32x96xf32>
    %c0_72 = arith.constant 0 : index
    %c0_73 = arith.constant 0 : index
    %281 = vector.load %arg13[%c0_72, %c0_73] : memref<1x96xf32, #tpu.memory_space<vmem>>, vector<1x96xf32>
    %c0_74 = arith.constant 0 : index
    %c0_75 = arith.constant 0 : index
    %282 = vector.load %arg14[%c0_74, %c0_75] : memref<64x32xf32, #tpu.memory_space<vmem>>, vector<32x32xf32>
    %c32 = arith.constant 32 : index
    %c0_76 = arith.constant 0 : index
    %283 = vector.load %arg14[%c32, %c0_76] : memref<64x32xf32, #tpu.memory_space<vmem>>, vector<32x32xf32>
    %c0_77 = arith.constant 0 : index
    %c0_78 = arith.constant 0 : index
    %284 = vector.load %arg15[%c0_77, %c0_78] : memref<1x32xf32, #tpu.memory_space<vmem>>, vector<1x32xf32>
    %c0_79 = arith.constant 0 : index
    %c0_80 = arith.constant 0 : index
    %285 = vector.load %arg16[%c0_79, %c0_80] : memref<32x32xf32, #tpu.memory_space<vmem>>, vector<32x32xf32>
    %c0_81 = arith.constant 0 : index
    %c0_82 = arith.constant 0 : index
    %286 = vector.load %arg17[%c0_81, %c0_82] : memref<1x32xf32, #tpu.memory_space<vmem>>, vector<1x32xf32>
    %287 = vector.extract_strided_slice %279 {offsets = [0, 0], sizes = [2, 96], strides = [1, 1]} : vector<16x96xf32> to vector<2x96xf32>
    %cst_83 = arith.constant dense<0.000000e+00> : vector<2x96xf32>
    %288 = tpu.matmul %264, %280, %cst_83 {dimension_numbers = #tpu.dot_dimension_numbers<[1], [0], [0], [1], [0, 0, 1, 1], [], []>} : vector<2x32xf32>, vector<32x96xf32>, vector<2x96xf32> -> vector<2x96xf32>
    %289 = vector.broadcast %281 : vector<1x96xf32> to vector<2x96xf32>
    %290 = arith.addf %288, %289 : vector<2x96xf32>
    %291 = vector.extract_strided_slice %287 {offsets = [0, 0], sizes = [2, 32], strides = [1, 1]} : vector<2x96xf32> to vector<2x32xf32>
    %292 = vector.extract_strided_slice %287 {offsets = [0, 32], sizes = [2, 32], strides = [1, 1]} : vector<2x96xf32> to vector<2x32xf32>
    %293 = vector.extract_strided_slice %287 {offsets = [0, 64], sizes = [2, 32], strides = [1, 1]} : vector<2x96xf32> to vector<2x32xf32>
    %294 = vector.extract_strided_slice %290 {offsets = [0, 0], sizes = [2, 32], strides = [1, 1]} : vector<2x96xf32> to vector<2x32xf32>
    %295 = vector.extract_strided_slice %290 {offsets = [0, 32], sizes = [2, 32], strides = [1, 1]} : vector<2x96xf32> to vector<2x32xf32>
    %296 = vector.extract_strided_slice %290 {offsets = [0, 64], sizes = [2, 32], strides = [1, 1]} : vector<2x96xf32> to vector<2x32xf32>
    %297 = arith.addf %291, %294 : vector<2x32xf32>
    %298 = arith.negf %297 : vector<2x32xf32>
    %299 = math.exp %298 : vector<2x32xf32>
    %cst_84 = arith.constant 1.000000e+00 : f32
    %300 = vector.broadcast %cst_84 : f32 to vector<2x32xf32>
    %301 = arith.addf %300, %299 : vector<2x32xf32>
    %302 = arith.divf %300, %301 : vector<2x32xf32>
    %303 = arith.addf %292, %295 : vector<2x32xf32>
    %304 = arith.negf %303 : vector<2x32xf32>
    %305 = math.exp %304 : vector<2x32xf32>
    %cst_85 = arith.constant 1.000000e+00 : f32
    %306 = vector.broadcast %cst_85 : f32 to vector<2x32xf32>
    %307 = arith.addf %306, %305 : vector<2x32xf32>
    %308 = arith.divf %306, %307 : vector<2x32xf32>
    %309 = arith.mulf %302, %296 : vector<2x32xf32>
    %310 = arith.addf %293, %309 : vector<2x32xf32>
    %311 = math.tanh %310 : vector<2x32xf32>
    %cst_86 = arith.constant 1.000000e+00 : f32
    %312 = vector.broadcast %cst_86 : f32 to vector<2x32xf32>
    %313 = arith.subf %312, %308 : vector<2x32xf32>
    %314 = arith.mulf %313, %311 : vector<2x32xf32>
    %315 = arith.mulf %308, %264 : vector<2x32xf32>
    %316 = arith.addf %314, %315 : vector<2x32xf32>
    %cst_87 = arith.constant dense<0.000000e+00> : vector<2x16xf32>
    %317 = tpu.matmul %316, %266, %cst_87 {dimension_numbers = #tpu.dot_dimension_numbers<[1], [1], [0], [0], [0, 0, 1, 0], [], []>} : vector<2x32xf32>, vector<16x32xf32>, vector<2x16xf32> -> vector<2x16xf32>
    %318 = arith.mulf %317, %0 : vector<2x16xf32>
    %cst_88 = arith.constant dense<0.000000e+00> : vector<2x8xf32>
    %319 = tpu.matmul %318, %1, %cst_88 {dimension_numbers = #tpu.dot_dimension_numbers<[1], [0], [0], [1], [0, 0, 1, 1], [], []>} : vector<2x16xf32>, vector<16x8xf32>, vector<2x8xf32> -> vector<2x8xf32>
    %cst_89 = arith.constant dense<0xFF800000> : vector<2xf32>
    %320 = vector.multi_reduction <maximumf>, %319, %cst_89 [1] : vector<2x8xf32> to vector<2xf32>
    %321 = vector.shape_cast %320 : vector<2xf32> to vector<2x1xf32>
    %322 = vector.broadcast %321 : vector<2x1xf32> to vector<2x8xf32>
    %323 = arith.subf %319, %322 : vector<2x8xf32>
    %324 = math.exp %323 : vector<2x8xf32>
    %cst_90 = arith.constant dense<0.000000e+00> : vector<2xf32>
    %325 = vector.multi_reduction <add>, %324, %cst_90 [1] : vector<2x8xf32> to vector<2xf32>
    %326 = vector.shape_cast %325 : vector<2xf32> to vector<2x1xf32>
    %327 = tpu.reciprocal %326 {approx = true} : vector<2x1xf32> -> vector<2x1xf32>
    %328 = vector.broadcast %327 : vector<2x1xf32> to vector<2x8xf32>
    %329 = arith.mulf %324, %328 : vector<2x8xf32>
    %cst_91 = arith.constant dense<0.000000e+00> : vector<2x16xf32>
    %330 = tpu.matmul %329, %1, %cst_91 {dimension_numbers = #tpu.dot_dimension_numbers<[1], [1], [0], [0], [0, 0, 1, 0], [], []>} : vector<2x8xf32>, vector<16x8xf32>, vector<2x16xf32> -> vector<2x16xf32>
    %331 = arith.mulf %330, %0 : vector<2x16xf32>
    %cst_92 = arith.constant dense<0.000000e+00> : vector<2x32xf32>
    %332 = tpu.matmul %331, %266, %cst_92 {dimension_numbers = #tpu.dot_dimension_numbers<[1], [0], [0], [1], [0, 0, 1, 1], [], []>} : vector<2x16xf32>, vector<16x32xf32>, vector<2x32xf32> -> vector<2x32xf32>
    %cst_93 = arith.constant dense<0.000000e+00> : vector<2x32xf32>
    %333 = tpu.matmul %332, %282, %cst_93 {dimension_numbers = #tpu.dot_dimension_numbers<[1], [0], [0], [1], [0, 0, 1, 1], [], []>} : vector<2x32xf32>, vector<32x32xf32>, vector<2x32xf32> -> vector<2x32xf32>
    %cst_94 = arith.constant dense<0.000000e+00> : vector<2x32xf32>
    %334 = tpu.matmul %316, %283, %cst_94 {dimension_numbers = #tpu.dot_dimension_numbers<[1], [0], [0], [1], [0, 0, 1, 1], [], []>} : vector<2x32xf32>, vector<32x32xf32>, vector<2x32xf32> -> vector<2x32xf32>
    %335 = arith.addf %333, %334 : vector<2x32xf32>
    %336 = vector.broadcast %284 : vector<1x32xf32> to vector<2x32xf32>
    %337 = arith.addf %335, %336 : vector<2x32xf32>
    %338 = math.tanh %337 : vector<2x32xf32>
    %cst_95 = arith.constant dense<0.000000e+00> : vector<2x32xf32>
    %339 = tpu.matmul %338, %285, %cst_95 {dimension_numbers = #tpu.dot_dimension_numbers<[1], [0], [0], [1], [0, 0, 1, 1], [], []>} : vector<2x32xf32>, vector<32x32xf32>, vector<2x32xf32> -> vector<2x32xf32>
    %340 = vector.broadcast %286 : vector<1x32xf32> to vector<2x32xf32>
    %341 = arith.addf %339, %340 : vector<2x32xf32>
    %cst_96 = arith.constant dense<0xFF800000> : vector<2xf32>
    %342 = vector.multi_reduction <maximumf>, %341, %cst_96 [1] : vector<2x32xf32> to vector<2xf32>
    %343 = vector.shape_cast %342 : vector<2xf32> to vector<2x1xf32>
    %344 = vector.broadcast %343 : vector<2x1xf32> to vector<2x32xf32>
    %345 = arith.subf %341, %344 : vector<2x32xf32>
    %346 = math.exp %345 : vector<2x32xf32>
    %cst_97 = arith.constant dense<0.000000e+00> : vector<2xf32>
    %347 = vector.multi_reduction <add>, %346, %cst_97 [1] : vector<2x32xf32> to vector<2xf32>
    %348 = vector.shape_cast %347 : vector<2xf32> to vector<2x1xf32>
    %349 = math.log %348 : vector<2x1xf32>
    %350 = arith.addf %343, %349 : vector<2x1xf32>
    %351 = vector.broadcast %350 : vector<2x1xf32> to vector<2x32xf32>
    %352 = arith.subf %341, %351 : vector<2x32xf32>
    %c0_98 = arith.constant 0 : index
    %c0_99 = arith.constant 0 : index
    %c0_100 = arith.constant 0 : index
    %353 = vector.load %arg18[%c0_98, %c0_99, %c0_100] : memref<8x2x32xf32, #tpu.memory_space<vmem>>, vector<1x2x32xf32>
    %354 = vector.shape_cast %353 : vector<1x2x32xf32> to vector<2x32xf32>
    %355 = vector.shape_cast %352 : vector<2x32xf32> to vector<1x2x32xf32>
    tpu.vector_store %arg18[%c0_98, %c0_99, %c0_100], %355 {strides = array<i32>} : memref<8x2x32xf32, #tpu.memory_space<vmem>>, vector<1x2x32xf32>,
    %c0_101 = arith.constant 0 : index
    %c0_102 = arith.constant 0 : index
    %c0_103 = arith.constant 0 : index
    %356 = vector.load %arg19[%c0_101, %c0_102, %c0_103] : memref<8x2x8xf32, #tpu.memory_space<vmem>>, vector<1x2x8xf32>
    %357 = vector.shape_cast %356 : vector<1x2x8xf32> to vector<2x8xf32>
    %358 = vector.shape_cast %329 : vector<2x8xf32> to vector<1x2x8xf32>
    tpu.vector_store %arg19[%c0_101, %c0_102, %c0_103], %358 {strides = array<i32>} : memref<8x2x8xf32, #tpu.memory_space<vmem>>, vector<1x2x8xf32>,
    %359 = vector.extract_strided_slice %279 {offsets = [2, 0], sizes = [2, 96], strides = [1, 1]} : vector<16x96xf32> to vector<2x96xf32>
    %cst_104 = arith.constant dense<0.000000e+00> : vector<2x96xf32>
    %360 = tpu.matmul %316, %280, %cst_104 {dimension_numbers = #tpu.dot_dimension_numbers<[1], [0], [0], [1], [0, 0, 1, 1], [], []>} : vector<2x32xf32>, vector<32x96xf32>, vector<2x96xf32> -> vector<2x96xf32>
    %361 = vector.broadcast %281 : vector<1x96xf32> to vector<2x96xf32>
    %362 = arith.addf %360, %361 : vector<2x96xf32>
    %363 = vector.extract_strided_slice %359 {offsets = [0, 0], sizes = [2, 32], strides = [1, 1]} : vector<2x96xf32> to vector<2x32xf32>
    %364 = vector.extract_strided_slice %359 {offsets = [0, 32], sizes = [2, 32], strides = [1, 1]} : vector<2x96xf32> to vector<2x32xf32>
    %365 = vector.extract_strided_slice %359 {offsets = [0, 64], sizes = [2, 32], strides = [1, 1]} : vector<2x96xf32> to vector<2x32xf32>
    %366 = vector.extract_strided_slice %362 {offsets = [0, 0], sizes = [2, 32], strides = [1, 1]} : vector<2x96xf32> to vector<2x32xf32>
    %367 = vector.extract_strided_slice %362 {offsets = [0, 32], sizes = [2, 32], strides = [1, 1]} : vector<2x96xf32> to vector<2x32xf32>
    %368 = vector.extract_strided_slice %362 {offsets = [0, 64], sizes = [2, 32], strides = [1, 1]} : vector<2x96xf32> to vector<2x32xf32>
    %369 = arith.addf %363, %366 : vector<2x32xf32>
    %370 = arith.negf %369 : vector<2x32xf32>
    %371 = math.exp %370 : vector<2x32xf32>
    %cst_105 = arith.constant 1.000000e+00 : f32
    %372 = vector.broadcast %cst_105 : f32 to vector<2x32xf32>
    %373 = arith.addf %372, %371 : vector<2x32xf32>
    %374 = arith.divf %372, %373 : vector<2x32xf32>
    %375 = arith.addf %364, %367 : vector<2x32xf32>
    %376 = arith.negf %375 : vector<2x32xf32>
    %377 = math.exp %376 : vector<2x32xf32>
    %cst_106 = arith.constant 1.000000e+00 : f32
    %378 = vector.broadcast %cst_106 : f32 to vector<2x32xf32>
    %379 = arith.addf %378, %377 : vector<2x32xf32>
    %380 = arith.divf %378, %379 : vector<2x32xf32>
    %381 = arith.mulf %374, %368 : vector<2x32xf32>
    %382 = arith.addf %365, %381 : vector<2x32xf32>
    %383 = math.tanh %382 : vector<2x32xf32>
    %cst_107 = arith.constant 1.000000e+00 : f32
    %384 = vector.broadcast %cst_107 : f32 to vector<2x32xf32>
    %385 = arith.subf %384, %380 : vector<2x32xf32>
    %386 = arith.mulf %385, %383 : vector<2x32xf32>
    %387 = arith.mulf %380, %316 : vector<2x32xf32>
    %388 = arith.addf %386, %387 : vector<2x32xf32>
    %cst_108 = arith.constant dense<0.000000e+00> : vector<2x16xf32>
    %389 = tpu.matmul %388, %266, %cst_108 {dimension_numbers = #tpu.dot_dimension_numbers<[1], [1], [0], [0], [0, 0, 1, 0], [], []>} : vector<2x32xf32>, vector<16x32xf32>, vector<2x16xf32> -> vector<2x16xf32>
    %390 = arith.mulf %389, %0 : vector<2x16xf32>
    %cst_109 = arith.constant dense<0.000000e+00> : vector<2x8xf32>
    %391 = tpu.matmul %390, %1, %cst_109 {dimension_numbers = #tpu.dot_dimension_numbers<[1], [0], [0], [1], [0, 0, 1, 1], [], []>} : vector<2x16xf32>, vector<16x8xf32>, vector<2x8xf32> -> vector<2x8xf32>
    %cst_110 = arith.constant dense<0xFF800000> : vector<2xf32>
    %392 = vector.multi_reduction <maximumf>, %391, %cst_110 [1] : vector<2x8xf32> to vector<2xf32>
    %393 = vector.shape_cast %392 : vector<2xf32> to vector<2x1xf32>
    %394 = vector.broadcast %393 : vector<2x1xf32> to vector<2x8xf32>
    %395 = arith.subf %391, %394 : vector<2x8xf32>
    %396 = math.exp %395 : vector<2x8xf32>
    %cst_111 = arith.constant dense<0.000000e+00> : vector<2xf32>
    %397 = vector.multi_reduction <add>, %396, %cst_111 [1] : vector<2x8xf32> to vector<2xf32>
    %398 = vector.shape_cast %397 : vector<2xf32> to vector<2x1xf32>
    %399 = tpu.reciprocal %398 {approx = true} : vector<2x1xf32> -> vector<2x1xf32>
    %400 = vector.broadcast %399 : vector<2x1xf32> to vector<2x8xf32>
    %401 = arith.mulf %396, %400 : vector<2x8xf32>
    %cst_112 = arith.constant dense<0.000000e+00> : vector<2x16xf32>
    %402 = tpu.matmul %401, %1, %cst_112 {dimension_numbers = #tpu.dot_dimension_numbers<[1], [1], [0], [0], [0, 0, 1, 0], [], []>} : vector<2x8xf32>, vector<16x8xf32>, vector<2x16xf32> -> vector<2x16xf32>
    %403 = arith.mulf %402, %0 : vector<2x16xf32>
    %cst_113 = arith.constant dense<0.000000e+00> : vector<2x32xf32>
    %404 = tpu.matmul %403, %266, %cst_113 {dimension_numbers = #tpu.dot_dimension_numbers<[1], [0], [0], [1], [0, 0, 1, 1], [], []>} : vector<2x16xf32>, vector<16x32xf32>, vector<2x32xf32> -> vector<2x32xf32>
    %cst_114 = arith.constant dense<0.000000e+00> : vector<2x32xf32>
    %405 = tpu.matmul %404, %282, %cst_114 {dimension_numbers = #tpu.dot_dimension_numbers<[1], [0], [0], [1], [0, 0, 1, 1], [], []>} : vector<2x32xf32>, vector<32x32xf32>, vector<2x32xf32> -> vector<2x32xf32>
    %cst_115 = arith.constant dense<0.000000e+00> : vector<2x32xf32>
    %406 = tpu.matmul %388, %283, %cst_115 {dimension_numbers = #tpu.dot_dimension_numbers<[1], [0], [0], [1], [0, 0, 1, 1], [], []>} : vector<2x32xf32>, vector<32x32xf32>, vector<2x32xf32> -> vector<2x32xf32>
    %407 = arith.addf %405, %406 : vector<2x32xf32>
    %408 = vector.broadcast %284 : vector<1x32xf32> to vector<2x32xf32>
    %409 = arith.addf %407, %408 : vector<2x32xf32>
    %410 = math.tanh %409 : vector<2x32xf32>
    %cst_116 = arith.constant dense<0.000000e+00> : vector<2x32xf32>
    %411 = tpu.matmul %410, %285, %cst_116 {dimension_numbers = #tpu.dot_dimension_numbers<[1], [0], [0], [1], [0, 0, 1, 1], [], []>} : vector<2x32xf32>, vector<32x32xf32>, vector<2x32xf32> -> vector<2x32xf32>
    %412 = vector.broadcast %286 : vector<1x32xf32> to vector<2x32xf32>
    %413 = arith.addf %411, %412 : vector<2x32xf32>
    %cst_117 = arith.constant dense<0xFF800000> : vector<2xf32>
    %414 = vector.multi_reduction <maximumf>, %413, %cst_117 [1] : vector<2x32xf32> to vector<2xf32>
    %415 = vector.shape_cast %414 : vector<2xf32> to vector<2x1xf32>
    %416 = vector.broadcast %415 : vector<2x1xf32> to vector<2x32xf32>
    %417 = arith.subf %413, %416 : vector<2x32xf32>
    %418 = math.exp %417 : vector<2x32xf32>
    %cst_118 = arith.constant dense<0.000000e+00> : vector<2xf32>
    %419 = vector.multi_reduction <add>, %418, %cst_118 [1] : vector<2x32xf32> to vector<2xf32>
    %420 = vector.shape_cast %419 : vector<2xf32> to vector<2x1xf32>
    %421 = math.log %420 : vector<2x1xf32>
    %422 = arith.addf %415, %421 : vector<2x1xf32>
    %423 = vector.broadcast %422 : vector<2x1xf32> to vector<2x32xf32>
    %424 = arith.subf %413, %423 : vector<2x32xf32>
    %c1 = arith.constant 1 : index
    %c0_119 = arith.constant 0 : index
    %c0_120 = arith.constant 0 : index
    %425 = vector.load %arg18[%c1, %c0_119, %c0_120] : memref<8x2x32xf32, #tpu.memory_space<vmem>>, vector<1x2x32xf32>
    %426 = vector.shape_cast %425 : vector<1x2x32xf32> to vector<2x32xf32>
    %427 = vector.shape_cast %424 : vector<2x32xf32> to vector<1x2x32xf32>
    tpu.vector_store %arg18[%c1, %c0_119, %c0_120], %427 {strides = array<i32>} : memref<8x2x32xf32, #tpu.memory_space<vmem>>, vector<1x2x32xf32>,
    %c1_121 = arith.constant 1 : index
    %c0_122 = arith.constant 0 : index
    %c0_123 = arith.constant 0 : index
    %428 = vector.load %arg19[%c1_121, %c0_122, %c0_123] : memref<8x2x8xf32, #tpu.memory_space<vmem>>, vector<1x2x8xf32>
    %429 = vector.shape_cast %428 : vector<1x2x8xf32> to vector<2x8xf32>
    %430 = vector.shape_cast %401 : vector<2x8xf32> to vector<1x2x8xf32>
    tpu.vector_store %arg19[%c1_121, %c0_122, %c0_123], %430 {strides = array<i32>} : memref<8x2x8xf32, #tpu.memory_space<vmem>>, vector<1x2x8xf32>,
    %431 = vector.extract_strided_slice %279 {offsets = [4, 0], sizes = [2, 96], strides = [1, 1]} : vector<16x96xf32> to vector<2x96xf32>
    %cst_124 = arith.constant dense<0.000000e+00> : vector<2x96xf32>
    %432 = tpu.matmul %388, %280, %cst_124 {dimension_numbers = #tpu.dot_dimension_numbers<[1], [0], [0], [1], [0, 0, 1, 1], [], []>} : vector<2x32xf32>, vector<32x96xf32>, vector<2x96xf32> -> vector<2x96xf32>
    %433 = vector.broadcast %281 : vector<1x96xf32> to vector<2x96xf32>
    %434 = arith.addf %432, %433 : vector<2x96xf32>
    %435 = vector.extract_strided_slice %431 {offsets = [0, 0], sizes = [2, 32], strides = [1, 1]} : vector<2x96xf32> to vector<2x32xf32>
    %436 = vector.extract_strided_slice %431 {offsets = [0, 32], sizes = [2, 32], strides = [1, 1]} : vector<2x96xf32> to vector<2x32xf32>
    %437 = vector.extract_strided_slice %431 {offsets = [0, 64], sizes = [2, 32], strides = [1, 1]} : vector<2x96xf32> to vector<2x32xf32>
    %438 = vector.extract_strided_slice %434 {offsets = [0, 0], sizes = [2, 32], strides = [1, 1]} : vector<2x96xf32> to vector<2x32xf32>
    %439 = vector.extract_strided_slice %434 {offsets = [0, 32], sizes = [2, 32], strides = [1, 1]} : vector<2x96xf32> to vector<2x32xf32>
    %440 = vector.extract_strided_slice %434 {offsets = [0, 64], sizes = [2, 32], strides = [1, 1]} : vector<2x96xf32> to vector<2x32xf32>
    %441 = arith.addf %435, %438 : vector<2x32xf32>
    %442 = arith.negf %441 : vector<2x32xf32>
    %443 = math.exp %442 : vector<2x32xf32>
    %cst_125 = arith.constant 1.000000e+00 : f32
    %444 = vector.broadcast %cst_125 : f32 to vector<2x32xf32>
    %445 = arith.addf %444, %443 : vector<2x32xf32>
    %446 = arith.divf %444, %445 : vector<2x32xf32>
    %447 = arith.addf %436, %439 : vector<2x32xf32>
    %448 = arith.negf %447 : vector<2x32xf32>
    %449 = math.exp %448 : vector<2x32xf32>
    %cst_126 = arith.constant 1.000000e+00 : f32
    %450 = vector.broadcast %cst_126 : f32 to vector<2x32xf32>
    %451 = arith.addf %450, %449 : vector<2x32xf32>
    %452 = arith.divf %450, %451 : vector<2x32xf32>
    %453 = arith.mulf %446, %440 : vector<2x32xf32>
    %454 = arith.addf %437, %453 : vector<2x32xf32>
    %455 = math.tanh %454 : vector<2x32xf32>
    %cst_127 = arith.constant 1.000000e+00 : f32
    %456 = vector.broadcast %cst_127 : f32 to vector<2x32xf32>
    %457 = arith.subf %456, %452 : vector<2x32xf32>
    %458 = arith.mulf %457, %455 : vector<2x32xf32>
    %459 = arith.mulf %452, %388 : vector<2x32xf32>
    %460 = arith.addf %458, %459 : vector<2x32xf32>
    %cst_128 = arith.constant dense<0.000000e+00> : vector<2x16xf32>
    %461 = tpu.matmul %460, %266, %cst_128 {dimension_numbers = #tpu.dot_dimension_numbers<[1], [1], [0], [0], [0, 0, 1, 0], [], []>} : vector<2x32xf32>, vector<16x32xf32>, vector<2x16xf32> -> vector<2x16xf32>
    %462 = arith.mulf %461, %0 : vector<2x16xf32>
    %cst_129 = arith.constant dense<0.000000e+00> : vector<2x8xf32>
    %463 = tpu.matmul %462, %1, %cst_129 {dimension_numbers = #tpu.dot_dimension_numbers<[1], [0], [0], [1], [0, 0, 1, 1], [], []>} : vector<2x16xf32>, vector<16x8xf32>, vector<2x8xf32> -> vector<2x8xf32>
    %cst_130 = arith.constant dense<0xFF800000> : vector<2xf32>
    %464 = vector.multi_reduction <maximumf>, %463, %cst_130 [1] : vector<2x8xf32> to vector<2xf32>
    %465 = vector.shape_cast %464 : vector<2xf32> to vector<2x1xf32>
    %466 = vector.broadcast %465 : vector<2x1xf32> to vector<2x8xf32>
    %467 = arith.subf %463, %466 : vector<2x8xf32>
    %468 = math.exp %467 : vector<2x8xf32>
    %cst_131 = arith.constant dense<0.000000e+00> : vector<2xf32>
    %469 = vector.multi_reduction <add>, %468, %cst_131 [1] : vector<2x8xf32> to vector<2xf32>
    %470 = vector.shape_cast %469 : vector<2xf32> to vector<2x1xf32>
    %471 = tpu.reciprocal %470 {approx = true} : vector<2x1xf32> -> vector<2x1xf32>
    %472 = vector.broadcast %471 : vector<2x1xf32> to vector<2x8xf32>
    %473 = arith.mulf %468, %472 : vector<2x8xf32>
    %cst_132 = arith.constant dense<0.000000e+00> : vector<2x16xf32>
    %474 = tpu.matmul %473, %1, %cst_132 {dimension_numbers = #tpu.dot_dimension_numbers<[1], [1], [0], [0], [0, 0, 1, 0], [], []>} : vector<2x8xf32>, vector<16x8xf32>, vector<2x16xf32> -> vector<2x16xf32>
    %475 = arith.mulf %474, %0 : vector<2x16xf32>
    %cst_133 = arith.constant dense<0.000000e+00> : vector<2x32xf32>
    %476 = tpu.matmul %475, %266, %cst_133 {dimension_numbers = #tpu.dot_dimension_numbers<[1], [0], [0], [1], [0, 0, 1, 1], [], []>} : vector<2x16xf32>, vector<16x32xf32>, vector<2x32xf32> -> vector<2x32xf32>
    %cst_134 = arith.constant dense<0.000000e+00> : vector<2x32xf32>
    %477 = tpu.matmul %476, %282, %cst_134 {dimension_numbers = #tpu.dot_dimension_numbers<[1], [0], [0], [1], [0, 0, 1, 1], [], []>} : vector<2x32xf32>, vector<32x32xf32>, vector<2x32xf32> -> vector<2x32xf32>
    %cst_135 = arith.constant dense<0.000000e+00> : vector<2x32xf32>
    %478 = tpu.matmul %460, %283, %cst_135 {dimension_numbers = #tpu.dot_dimension_numbers<[1], [0], [0], [1], [0, 0, 1, 1], [], []>} : vector<2x32xf32>, vector<32x32xf32>, vector<2x32xf32> -> vector<2x32xf32>
    %479 = arith.addf %477, %478 : vector<2x32xf32>
    %480 = vector.broadcast %284 : vector<1x32xf32> to vector<2x32xf32>
    %481 = arith.addf %479, %480 : vector<2x32xf32>
    %482 = math.tanh %481 : vector<2x32xf32>
    %cst_136 = arith.constant dense<0.000000e+00> : vector<2x32xf32>
    %483 = tpu.matmul %482, %285, %cst_136 {dimension_numbers = #tpu.dot_dimension_numbers<[1], [0], [0], [1], [0, 0, 1, 1], [], []>} : vector<2x32xf32>, vector<32x32xf32>, vector<2x32xf32> -> vector<2x32xf32>
    %484 = vector.broadcast %286 : vector<1x32xf32> to vector<2x32xf32>
    %485 = arith.addf %483, %484 : vector<2x32xf32>
    %cst_137 = arith.constant dense<0xFF800000> : vector<2xf32>
    %486 = vector.multi_reduction <maximumf>, %485, %cst_137 [1] : vector<2x32xf32> to vector<2xf32>
    %487 = vector.shape_cast %486 : vector<2xf32> to vector<2x1xf32>
    %488 = vector.broadcast %487 : vector<2x1xf32> to vector<2x32xf32>
    %489 = arith.subf %485, %488 : vector<2x32xf32>
    %490 = math.exp %489 : vector<2x32xf32>
    %cst_138 = arith.constant dense<0.000000e+00> : vector<2xf32>
    %491 = vector.multi_reduction <add>, %490, %cst_138 [1] : vector<2x32xf32> to vector<2xf32>
    %492 = vector.shape_cast %491 : vector<2xf32> to vector<2x1xf32>
    %493 = math.log %492 : vector<2x1xf32>
    %494 = arith.addf %487, %493 : vector<2x1xf32>
    %495 = vector.broadcast %494 : vector<2x1xf32> to vector<2x32xf32>
    %496 = arith.subf %485, %495 : vector<2x32xf32>
    %c2_139 = arith.constant 2 : index
    %c0_140 = arith.constant 0 : index
    %c0_141 = arith.constant 0 : index
    %497 = vector.load %arg18[%c2_139, %c0_140, %c0_141] : memref<8x2x32xf32, #tpu.memory_space<vmem>>, vector<1x2x32xf32>
    %498 = vector.shape_cast %497 : vector<1x2x32xf32> to vector<2x32xf32>
    %499 = vector.shape_cast %496 : vector<2x32xf32> to vector<1x2x32xf32>
    tpu.vector_store %arg18[%c2_139, %c0_140, %c0_141], %499 {strides = array<i32>} : memref<8x2x32xf32, #tpu.memory_space<vmem>>, vector<1x2x32xf32>,
    %c2_142 = arith.constant 2 : index
    %c0_143 = arith.constant 0 : index
    %c0_144 = arith.constant 0 : index
    %500 = vector.load %arg19[%c2_142, %c0_143, %c0_144] : memref<8x2x8xf32, #tpu.memory_space<vmem>>, vector<1x2x8xf32>
    %501 = vector.shape_cast %500 : vector<1x2x8xf32> to vector<2x8xf32>
    %502 = vector.shape_cast %473 : vector<2x8xf32> to vector<1x2x8xf32>
    tpu.vector_store %arg19[%c2_142, %c0_143, %c0_144], %502 {strides = array<i32>} : memref<8x2x8xf32, #tpu.memory_space<vmem>>, vector<1x2x8xf32>,
    %503 = vector.extract_strided_slice %279 {offsets = [6, 0], sizes = [2, 96], strides = [1, 1]} : vector<16x96xf32> to vector<2x96xf32>
    %cst_145 = arith.constant dense<0.000000e+00> : vector<2x96xf32>
    %504 = tpu.matmul %460, %280, %cst_145 {dimension_numbers = #tpu.dot_dimension_numbers<[1], [0], [0], [1], [0, 0, 1, 1], [], []>} : vector<2x32xf32>, vector<32x96xf32>, vector<2x96xf32> -> vector<2x96xf32>
    %505 = vector.broadcast %281 : vector<1x96xf32> to vector<2x96xf32>
    %506 = arith.addf %504, %505 : vector<2x96xf32>
    %507 = vector.extract_strided_slice %503 {offsets = [0, 0], sizes = [2, 32], strides = [1, 1]} : vector<2x96xf32> to vector<2x32xf32>
    %508 = vector.extract_strided_slice %503 {offsets = [0, 32], sizes = [2, 32], strides = [1, 1]} : vector<2x96xf32> to vector<2x32xf32>
    %509 = vector.extract_strided_slice %503 {offsets = [0, 64], sizes = [2, 32], strides = [1, 1]} : vector<2x96xf32> to vector<2x32xf32>
    %510 = vector.extract_strided_slice %506 {offsets = [0, 0], sizes = [2, 32], strides = [1, 1]} : vector<2x96xf32> to vector<2x32xf32>
    %511 = vector.extract_strided_slice %506 {offsets = [0, 32], sizes = [2, 32], strides = [1, 1]} : vector<2x96xf32> to vector<2x32xf32>
    %512 = vector.extract_strided_slice %506 {offsets = [0, 64], sizes = [2, 32], strides = [1, 1]} : vector<2x96xf32> to vector<2x32xf32>
    %513 = arith.addf %507, %510 : vector<2x32xf32>
    %514 = arith.negf %513 : vector<2x32xf32>
    %515 = math.exp %514 : vector<2x32xf32>
    %cst_146 = arith.constant 1.000000e+00 : f32
    %516 = vector.broadcast %cst_146 : f32 to vector<2x32xf32>
    %517 = arith.addf %516, %515 : vector<2x32xf32>
    %518 = arith.divf %516, %517 : vector<2x32xf32>
    %519 = arith.addf %508, %511 : vector<2x32xf32>
    %520 = arith.negf %519 : vector<2x32xf32>
    %521 = math.exp %520 : vector<2x32xf32>
    %cst_147 = arith.constant 1.000000e+00 : f32
    %522 = vector.broadcast %cst_147 : f32 to vector<2x32xf32>
    %523 = arith.addf %522, %521 : vector<2x32xf32>
    %524 = arith.divf %522, %523 : vector<2x32xf32>
    %525 = arith.mulf %518, %512 : vector<2x32xf32>
    %526 = arith.addf %509, %525 : vector<2x32xf32>
    %527 = math.tanh %526 : vector<2x32xf32>
    %cst_148 = arith.constant 1.000000e+00 : f32
    %528 = vector.broadcast %cst_148 : f32 to vector<2x32xf32>
    %529 = arith.subf %528, %524 : vector<2x32xf32>
    %530 = arith.mulf %529, %527 : vector<2x32xf32>
    %531 = arith.mulf %524, %460 : vector<2x32xf32>
    %532 = arith.addf %530, %531 : vector<2x32xf32>
    %cst_149 = arith.constant dense<0.000000e+00> : vector<2x16xf32>
    %533 = tpu.matmul %532, %266, %cst_149 {dimension_numbers = #tpu.dot_dimension_numbers<[1], [1], [0], [0], [0, 0, 1, 0], [], []>} : vector<2x32xf32>, vector<16x32xf32>, vector<2x16xf32> -> vector<2x16xf32>
    %534 = arith.mulf %533, %0 : vector<2x16xf32>
    %cst_150 = arith.constant dense<0.000000e+00> : vector<2x8xf32>
    %535 = tpu.matmul %534, %1, %cst_150 {dimension_numbers = #tpu.dot_dimension_numbers<[1], [0], [0], [1], [0, 0, 1, 1], [], []>} : vector<2x16xf32>, vector<16x8xf32>, vector<2x8xf32> -> vector<2x8xf32>
    %cst_151 = arith.constant dense<0xFF800000> : vector<2xf32>
    %536 = vector.multi_reduction <maximumf>, %535, %cst_151 [1] : vector<2x8xf32> to vector<2xf32>
    %537 = vector.shape_cast %536 : vector<2xf32> to vector<2x1xf32>
    %538 = vector.broadcast %537 : vector<2x1xf32> to vector<2x8xf32>
    %539 = arith.subf %535, %538 : vector<2x8xf32>
    %540 = math.exp %539 : vector<2x8xf32>
    %cst_152 = arith.constant dense<0.000000e+00> : vector<2xf32>
    %541 = vector.multi_reduction <add>, %540, %cst_152 [1] : vector<2x8xf32> to vector<2xf32>
    %542 = vector.shape_cast %541 : vector<2xf32> to vector<2x1xf32>
    %543 = tpu.reciprocal %542 {approx = true} : vector<2x1xf32> -> vector<2x1xf32>
    %544 = vector.broadcast %543 : vector<2x1xf32> to vector<2x8xf32>
    %545 = arith.mulf %540, %544 : vector<2x8xf32>
    %cst_153 = arith.constant dense<0.000000e+00> : vector<2x16xf32>
    %546 = tpu.matmul %545, %1, %cst_153 {dimension_numbers = #tpu.dot_dimension_numbers<[1], [1], [0], [0], [0, 0, 1, 0], [], []>} : vector<2x8xf32>, vector<16x8xf32>, vector<2x16xf32> -> vector<2x16xf32>
    %547 = arith.mulf %546, %0 : vector<2x16xf32>
    %cst_154 = arith.constant dense<0.000000e+00> : vector<2x32xf32>
    %548 = tpu.matmul %547, %266, %cst_154 {dimension_numbers = #tpu.dot_dimension_numbers<[1], [0], [0], [1], [0, 0, 1, 1], [], []>} : vector<2x16xf32>, vector<16x32xf32>, vector<2x32xf32> -> vector<2x32xf32>
    %cst_155 = arith.constant dense<0.000000e+00> : vector<2x32xf32>
    %549 = tpu.matmul %548, %282, %cst_155 {dimension_numbers = #tpu.dot_dimension_numbers<[1], [0], [0], [1], [0, 0, 1, 1], [], []>} : vector<2x32xf32>, vector<32x32xf32>, vector<2x32xf32> -> vector<2x32xf32>
    %cst_156 = arith.constant dense<0.000000e+00> : vector<2x32xf32>
    %550 = tpu.matmul %532, %283, %cst_156 {dimension_numbers = #tpu.dot_dimension_numbers<[1], [0], [0], [1], [0, 0, 1, 1], [], []>} : vector<2x32xf32>, vector<32x32xf32>, vector<2x32xf32> -> vector<2x32xf32>
    %551 = arith.addf %549, %550 : vector<2x32xf32>
    %552 = vector.broadcast %284 : vector<1x32xf32> to vector<2x32xf32>
    %553 = arith.addf %551, %552 : vector<2x32xf32>
    %554 = math.tanh %553 : vector<2x32xf32>
    %cst_157 = arith.constant dense<0.000000e+00> : vector<2x32xf32>
    %555 = tpu.matmul %554, %285, %cst_157 {dimension_numbers = #tpu.dot_dimension_numbers<[1], [0], [0], [1], [0, 0, 1, 1], [], []>} : vector<2x32xf32>, vector<32x32xf32>, vector<2x32xf32> -> vector<2x32xf32>
    %556 = vector.broadcast %286 : vector<1x32xf32> to vector<2x32xf32>
    %557 = arith.addf %555, %556 : vector<2x32xf32>
    %cst_158 = arith.constant dense<0xFF800000> : vector<2xf32>
    %558 = vector.multi_reduction <maximumf>, %557, %cst_158 [1] : vector<2x32xf32> to vector<2xf32>
    %559 = vector.shape_cast %558 : vector<2xf32> to vector<2x1xf32>
    %560 = vector.broadcast %559 : vector<2x1xf32> to vector<2x32xf32>
    %561 = arith.subf %557, %560 : vector<2x32xf32>
    %562 = math.exp %561 : vector<2x32xf32>
    %cst_159 = arith.constant dense<0.000000e+00> : vector<2xf32>
    %563 = vector.multi_reduction <add>, %562, %cst_159 [1] : vector<2x32xf32> to vector<2xf32>
    %564 = vector.shape_cast %563 : vector<2xf32> to vector<2x1xf32>
    %565 = math.log %564 : vector<2x1xf32>
    %566 = arith.addf %559, %565 : vector<2x1xf32>
    %567 = vector.broadcast %566 : vector<2x1xf32> to vector<2x32xf32>
    %568 = arith.subf %557, %567 : vector<2x32xf32>
    %c3 = arith.constant 3 : index
    %c0_160 = arith.constant 0 : index
    %c0_161 = arith.constant 0 : index
    %569 = vector.load %arg18[%c3, %c0_160, %c0_161] : memref<8x2x32xf32, #tpu.memory_space<vmem>>, vector<1x2x32xf32>
    %570 = vector.shape_cast %569 : vector<1x2x32xf32> to vector<2x32xf32>
    %571 = vector.shape_cast %568 : vector<2x32xf32> to vector<1x2x32xf32>
    tpu.vector_store %arg18[%c3, %c0_160, %c0_161], %571 {strides = array<i32>} : memref<8x2x32xf32, #tpu.memory_space<vmem>>, vector<1x2x32xf32>,
    %c3_162 = arith.constant 3 : index
    %c0_163 = arith.constant 0 : index
    %c0_164 = arith.constant 0 : index
    %572 = vector.load %arg19[%c3_162, %c0_163, %c0_164] : memref<8x2x8xf32, #tpu.memory_space<vmem>>, vector<1x2x8xf32>
    %573 = vector.shape_cast %572 : vector<1x2x8xf32> to vector<2x8xf32>
    %574 = vector.shape_cast %545 : vector<2x8xf32> to vector<1x2x8xf32>
    tpu.vector_store %arg19[%c3_162, %c0_163, %c0_164], %574 {strides = array<i32>} : memref<8x2x8xf32, #tpu.memory_space<vmem>>, vector<1x2x8xf32>,
    %575 = vector.extract_strided_slice %279 {offsets = [8, 0], sizes = [2, 96], strides = [1, 1]} : vector<16x96xf32> to vector<2x96xf32>
    %cst_165 = arith.constant dense<0.000000e+00> : vector<2x96xf32>
    %576 = tpu.matmul %532, %280, %cst_165 {dimension_numbers = #tpu.dot_dimension_numbers<[1], [0], [0], [1], [0, 0, 1, 1], [], []>} : vector<2x32xf32>, vector<32x96xf32>, vector<2x96xf32> -> vector<2x96xf32>
    %577 = vector.broadcast %281 : vector<1x96xf32> to vector<2x96xf32>
    %578 = arith.addf %576, %577 : vector<2x96xf32>
    %579 = vector.extract_strided_slice %575 {offsets = [0, 0], sizes = [2, 32], strides = [1, 1]} : vector<2x96xf32> to vector<2x32xf32>
    %580 = vector.extract_strided_slice %575 {offsets = [0, 32], sizes = [2, 32], strides = [1, 1]} : vector<2x96xf32> to vector<2x32xf32>
    %581 = vector.extract_strided_slice %575 {offsets = [0, 64], sizes = [2, 32], strides = [1, 1]} : vector<2x96xf32> to vector<2x32xf32>
    %582 = vector.extract_strided_slice %578 {offsets = [0, 0], sizes = [2, 32], strides = [1, 1]} : vector<2x96xf32> to vector<2x32xf32>
    %583 = vector.extract_strided_slice %578 {offsets = [0, 32], sizes = [2, 32], strides = [1, 1]} : vector<2x96xf32> to vector<2x32xf32>
    %584 = vector.extract_strided_slice %578 {offsets = [0, 64], sizes = [2, 32], strides = [1, 1]} : vector<2x96xf32> to vector<2x32xf32>
    %585 = arith.addf %579, %582 : vector<2x32xf32>
    %586 = arith.negf %585 : vector<2x32xf32>
    %587 = math.exp %586 : vector<2x32xf32>
    %cst_166 = arith.constant 1.000000e+00 : f32
    %588 = vector.broadcast %cst_166 : f32 to vector<2x32xf32>
    %589 = arith.addf %588, %587 : vector<2x32xf32>
    %590 = arith.divf %588, %589 : vector<2x32xf32>
    %591 = arith.addf %580, %583 : vector<2x32xf32>
    %592 = arith.negf %591 : vector<2x32xf32>
    %593 = math.exp %592 : vector<2x32xf32>
    %cst_167 = arith.constant 1.000000e+00 : f32
    %594 = vector.broadcast %cst_167 : f32 to vector<2x32xf32>
    %595 = arith.addf %594, %593 : vector<2x32xf32>
    %596 = arith.divf %594, %595 : vector<2x32xf32>
    %597 = arith.mulf %590, %584 : vector<2x32xf32>
    %598 = arith.addf %581, %597 : vector<2x32xf32>
    %599 = math.tanh %598 : vector<2x32xf32>
    %cst_168 = arith.constant 1.000000e+00 : f32
    %600 = vector.broadcast %cst_168 : f32 to vector<2x32xf32>
    %601 = arith.subf %600, %596 : vector<2x32xf32>
    %602 = arith.mulf %601, %599 : vector<2x32xf32>
    %603 = arith.mulf %596, %532 : vector<2x32xf32>
    %604 = arith.addf %602, %603 : vector<2x32xf32>
    %cst_169 = arith.constant dense<0.000000e+00> : vector<2x16xf32>
    %605 = tpu.matmul %604, %266, %cst_169 {dimension_numbers = #tpu.dot_dimension_numbers<[1], [1], [0], [0], [0, 0, 1, 0], [], []>} : vector<2x32xf32>, vector<16x32xf32>, vector<2x16xf32> -> vector<2x16xf32>
    %606 = arith.mulf %605, %0 : vector<2x16xf32>
    %cst_170 = arith.constant dense<0.000000e+00> : vector<2x8xf32>
    %607 = tpu.matmul %606, %1, %cst_170 {dimension_numbers = #tpu.dot_dimension_numbers<[1], [0], [0], [1], [0, 0, 1, 1], [], []>} : vector<2x16xf32>, vector<16x8xf32>, vector<2x8xf32> -> vector<2x8xf32>
    %cst_171 = arith.constant dense<0xFF800000> : vector<2xf32>
    %608 = vector.multi_reduction <maximumf>, %607, %cst_171 [1] : vector<2x8xf32> to vector<2xf32>
    %609 = vector.shape_cast %608 : vector<2xf32> to vector<2x1xf32>
    %610 = vector.broadcast %609 : vector<2x1xf32> to vector<2x8xf32>
    %611 = arith.subf %607, %610 : vector<2x8xf32>
    %612 = math.exp %611 : vector<2x8xf32>
    %cst_172 = arith.constant dense<0.000000e+00> : vector<2xf32>
    %613 = vector.multi_reduction <add>, %612, %cst_172 [1] : vector<2x8xf32> to vector<2xf32>
    %614 = vector.shape_cast %613 : vector<2xf32> to vector<2x1xf32>
    %615 = tpu.reciprocal %614 {approx = true} : vector<2x1xf32> -> vector<2x1xf32>
    %616 = vector.broadcast %615 : vector<2x1xf32> to vector<2x8xf32>
    %617 = arith.mulf %612, %616 : vector<2x8xf32>
    %cst_173 = arith.constant dense<0.000000e+00> : vector<2x16xf32>
    %618 = tpu.matmul %617, %1, %cst_173 {dimension_numbers = #tpu.dot_dimension_numbers<[1], [1], [0], [0], [0, 0, 1, 0], [], []>} : vector<2x8xf32>, vector<16x8xf32>, vector<2x16xf32> -> vector<2x16xf32>
    %619 = arith.mulf %618, %0 : vector<2x16xf32>
    %cst_174 = arith.constant dense<0.000000e+00> : vector<2x32xf32>
    %620 = tpu.matmul %619, %266, %cst_174 {dimension_numbers = #tpu.dot_dimension_numbers<[1], [0], [0], [1], [0, 0, 1, 1], [], []>} : vector<2x16xf32>, vector<16x32xf32>, vector<2x32xf32> -> vector<2x32xf32>
    %cst_175 = arith.constant dense<0.000000e+00> : vector<2x32xf32>
    %621 = tpu.matmul %620, %282, %cst_175 {dimension_numbers = #tpu.dot_dimension_numbers<[1], [0], [0], [1], [0, 0, 1, 1], [], []>} : vector<2x32xf32>, vector<32x32xf32>, vector<2x32xf32> -> vector<2x32xf32>
    %cst_176 = arith.constant dense<0.000000e+00> : vector<2x32xf32>
    %622 = tpu.matmul %604, %283, %cst_176 {dimension_numbers = #tpu.dot_dimension_numbers<[1], [0], [0], [1], [0, 0, 1, 1], [], []>} : vector<2x32xf32>, vector<32x32xf32>, vector<2x32xf32> -> vector<2x32xf32>
    %623 = arith.addf %621, %622 : vector<2x32xf32>
    %624 = vector.broadcast %284 : vector<1x32xf32> to vector<2x32xf32>
    %625 = arith.addf %623, %624 : vector<2x32xf32>
    %626 = math.tanh %625 : vector<2x32xf32>
    %cst_177 = arith.constant dense<0.000000e+00> : vector<2x32xf32>
    %627 = tpu.matmul %626, %285, %cst_177 {dimension_numbers = #tpu.dot_dimension_numbers<[1], [0], [0], [1], [0, 0, 1, 1], [], []>} : vector<2x32xf32>, vector<32x32xf32>, vector<2x32xf32> -> vector<2x32xf32>
    %628 = vector.broadcast %286 : vector<1x32xf32> to vector<2x32xf32>
    %629 = arith.addf %627, %628 : vector<2x32xf32>
    %cst_178 = arith.constant dense<0xFF800000> : vector<2xf32>
    %630 = vector.multi_reduction <maximumf>, %629, %cst_178 [1] : vector<2x32xf32> to vector<2xf32>
    %631 = vector.shape_cast %630 : vector<2xf32> to vector<2x1xf32>
    %632 = vector.broadcast %631 : vector<2x1xf32> to vector<2x32xf32>
    %633 = arith.subf %629, %632 : vector<2x32xf32>
    %634 = math.exp %633 : vector<2x32xf32>
    %cst_179 = arith.constant dense<0.000000e+00> : vector<2xf32>
    %635 = vector.multi_reduction <add>, %634, %cst_179 [1] : vector<2x32xf32> to vector<2xf32>
    %636 = vector.shape_cast %635 : vector<2xf32> to vector<2x1xf32>
    %637 = math.log %636 : vector<2x1xf32>
    %638 = arith.addf %631, %637 : vector<2x1xf32>
    %639 = vector.broadcast %638 : vector<2x1xf32> to vector<2x32xf32>
    %640 = arith.subf %629, %639 : vector<2x32xf32>
    %c4_180 = arith.constant 4 : index
    %c0_181 = arith.constant 0 : index
    %c0_182 = arith.constant 0 : index
    %641 = vector.load %arg18[%c4_180, %c0_181, %c0_182] : memref<8x2x32xf32, #tpu.memory_space<vmem>>, vector<1x2x32xf32>
    %642 = vector.shape_cast %641 : vector<1x2x32xf32> to vector<2x32xf32>
    %643 = vector.shape_cast %640 : vector<2x32xf32> to vector<1x2x32xf32>
    tpu.vector_store %arg18[%c4_180, %c0_181, %c0_182], %643 {strides = array<i32>} : memref<8x2x32xf32, #tpu.memory_space<vmem>>, vector<1x2x32xf32>,
    %c4_183 = arith.constant 4 : index
    %c0_184 = arith.constant 0 : index
    %c0_185 = arith.constant 0 : index
    %644 = vector.load %arg19[%c4_183, %c0_184, %c0_185] : memref<8x2x8xf32, #tpu.memory_space<vmem>>, vector<1x2x8xf32>
    %645 = vector.shape_cast %644 : vector<1x2x8xf32> to vector<2x8xf32>
    %646 = vector.shape_cast %617 : vector<2x8xf32> to vector<1x2x8xf32>
    tpu.vector_store %arg19[%c4_183, %c0_184, %c0_185], %646 {strides = array<i32>} : memref<8x2x8xf32, #tpu.memory_space<vmem>>, vector<1x2x8xf32>,
    %647 = vector.extract_strided_slice %279 {offsets = [10, 0], sizes = [2, 96], strides = [1, 1]} : vector<16x96xf32> to vector<2x96xf32>
    %cst_186 = arith.constant dense<0.000000e+00> : vector<2x96xf32>
    %648 = tpu.matmul %604, %280, %cst_186 {dimension_numbers = #tpu.dot_dimension_numbers<[1], [0], [0], [1], [0, 0, 1, 1], [], []>} : vector<2x32xf32>, vector<32x96xf32>, vector<2x96xf32> -> vector<2x96xf32>
    %649 = vector.broadcast %281 : vector<1x96xf32> to vector<2x96xf32>
    %650 = arith.addf %648, %649 : vector<2x96xf32>
    %651 = vector.extract_strided_slice %647 {offsets = [0, 0], sizes = [2, 32], strides = [1, 1]} : vector<2x96xf32> to vector<2x32xf32>
    %652 = vector.extract_strided_slice %647 {offsets = [0, 32], sizes = [2, 32], strides = [1, 1]} : vector<2x96xf32> to vector<2x32xf32>
    %653 = vector.extract_strided_slice %647 {offsets = [0, 64], sizes = [2, 32], strides = [1, 1]} : vector<2x96xf32> to vector<2x32xf32>
    %654 = vector.extract_strided_slice %650 {offsets = [0, 0], sizes = [2, 32], strides = [1, 1]} : vector<2x96xf32> to vector<2x32xf32>
    %655 = vector.extract_strided_slice %650 {offsets = [0, 32], sizes = [2, 32], strides = [1, 1]} : vector<2x96xf32> to vector<2x32xf32>
    %656 = vector.extract_strided_slice %650 {offsets = [0, 64], sizes = [2, 32], strides = [1, 1]} : vector<2x96xf32> to vector<2x32xf32>
    %657 = arith.addf %651, %654 : vector<2x32xf32>
    %658 = arith.negf %657 : vector<2x32xf32>
    %659 = math.exp %658 : vector<2x32xf32>
    %cst_187 = arith.constant 1.000000e+00 : f32
    %660 = vector.broadcast %cst_187 : f32 to vector<2x32xf32>
    %661 = arith.addf %660, %659 : vector<2x32xf32>
    %662 = arith.divf %660, %661 : vector<2x32xf32>
    %663 = arith.addf %652, %655 : vector<2x32xf32>
    %664 = arith.negf %663 : vector<2x32xf32>
    %665 = math.exp %664 : vector<2x32xf32>
    %cst_188 = arith.constant 1.000000e+00 : f32
    %666 = vector.broadcast %cst_188 : f32 to vector<2x32xf32>
    %667 = arith.addf %666, %665 : vector<2x32xf32>
    %668 = arith.divf %666, %667 : vector<2x32xf32>
    %669 = arith.mulf %662, %656 : vector<2x32xf32>
    %670 = arith.addf %653, %669 : vector<2x32xf32>
    %671 = math.tanh %670 : vector<2x32xf32>
    %cst_189 = arith.constant 1.000000e+00 : f32
    %672 = vector.broadcast %cst_189 : f32 to vector<2x32xf32>
    %673 = arith.subf %672, %668 : vector<2x32xf32>
    %674 = arith.mulf %673, %671 : vector<2x32xf32>
    %675 = arith.mulf %668, %604 : vector<2x32xf32>
    %676 = arith.addf %674, %675 : vector<2x32xf32>
    %cst_190 = arith.constant dense<0.000000e+00> : vector<2x16xf32>
    %677 = tpu.matmul %676, %266, %cst_190 {dimension_numbers = #tpu.dot_dimension_numbers<[1], [1], [0], [0], [0, 0, 1, 0], [], []>} : vector<2x32xf32>, vector<16x32xf32>, vector<2x16xf32> -> vector<2x16xf32>
    %678 = arith.mulf %677, %0 : vector<2x16xf32>
    %cst_191 = arith.constant dense<0.000000e+00> : vector<2x8xf32>
    %679 = tpu.matmul %678, %1, %cst_191 {dimension_numbers = #tpu.dot_dimension_numbers<[1], [0], [0], [1], [0, 0, 1, 1], [], []>} : vector<2x16xf32>, vector<16x8xf32>, vector<2x8xf32> -> vector<2x8xf32>
    %cst_192 = arith.constant dense<0xFF800000> : vector<2xf32>
    %680 = vector.multi_reduction <maximumf>, %679, %cst_192 [1] : vector<2x8xf32> to vector<2xf32>
    %681 = vector.shape_cast %680 : vector<2xf32> to vector<2x1xf32>
    %682 = vector.broadcast %681 : vector<2x1xf32> to vector<2x8xf32>
    %683 = arith.subf %679, %682 : vector<2x8xf32>
    %684 = math.exp %683 : vector<2x8xf32>
    %cst_193 = arith.constant dense<0.000000e+00> : vector<2xf32>
    %685 = vector.multi_reduction <add>, %684, %cst_193 [1] : vector<2x8xf32> to vector<2xf32>
    %686 = vector.shape_cast %685 : vector<2xf32> to vector<2x1xf32>
    %687 = tpu.reciprocal %686 {approx = true} : vector<2x1xf32> -> vector<2x1xf32>
    %688 = vector.broadcast %687 : vector<2x1xf32> to vector<2x8xf32>
    %689 = arith.mulf %684, %688 : vector<2x8xf32>
    %cst_194 = arith.constant dense<0.000000e+00> : vector<2x16xf32>
    %690 = tpu.matmul %689, %1, %cst_194 {dimension_numbers = #tpu.dot_dimension_numbers<[1], [1], [0], [0], [0, 0, 1, 0], [], []>} : vector<2x8xf32>, vector<16x8xf32>, vector<2x16xf32> -> vector<2x16xf32>
    %691 = arith.mulf %690, %0 : vector<2x16xf32>
    %cst_195 = arith.constant dense<0.000000e+00> : vector<2x32xf32>
    %692 = tpu.matmul %691, %266, %cst_195 {dimension_numbers = #tpu.dot_dimension_numbers<[1], [0], [0], [1], [0, 0, 1, 1], [], []>} : vector<2x16xf32>, vector<16x32xf32>, vector<2x32xf32> -> vector<2x32xf32>
    %cst_196 = arith.constant dense<0.000000e+00> : vector<2x32xf32>
    %693 = tpu.matmul %692, %282, %cst_196 {dimension_numbers = #tpu.dot_dimension_numbers<[1], [0], [0], [1], [0, 0, 1, 1], [], []>} : vector<2x32xf32>, vector<32x32xf32>, vector<2x32xf32> -> vector<2x32xf32>
    %cst_197 = arith.constant dense<0.000000e+00> : vector<2x32xf32>
    %694 = tpu.matmul %676, %283, %cst_197 {dimension_numbers = #tpu.dot_dimension_numbers<[1], [0], [0], [1], [0, 0, 1, 1], [], []>} : vector<2x32xf32>, vector<32x32xf32>, vector<2x32xf32> -> vector<2x32xf32>
    %695 = arith.addf %693, %694 : vector<2x32xf32>
    %696 = vector.broadcast %284 : vector<1x32xf32> to vector<2x32xf32>
    %697 = arith.addf %695, %696 : vector<2x32xf32>
    %698 = math.tanh %697 : vector<2x32xf32>
    %cst_198 = arith.constant dense<0.000000e+00> : vector<2x32xf32>
    %699 = tpu.matmul %698, %285, %cst_198 {dimension_numbers = #tpu.dot_dimension_numbers<[1], [0], [0], [1], [0, 0, 1, 1], [], []>} : vector<2x32xf32>, vector<32x32xf32>, vector<2x32xf32> -> vector<2x32xf32>
    %700 = vector.broadcast %286 : vector<1x32xf32> to vector<2x32xf32>
    %701 = arith.addf %699, %700 : vector<2x32xf32>
    %cst_199 = arith.constant dense<0xFF800000> : vector<2xf32>
    %702 = vector.multi_reduction <maximumf>, %701, %cst_199 [1] : vector<2x32xf32> to vector<2xf32>
    %703 = vector.shape_cast %702 : vector<2xf32> to vector<2x1xf32>
    %704 = vector.broadcast %703 : vector<2x1xf32> to vector<2x32xf32>
    %705 = arith.subf %701, %704 : vector<2x32xf32>
    %706 = math.exp %705 : vector<2x32xf32>
    %cst_200 = arith.constant dense<0.000000e+00> : vector<2xf32>
    %707 = vector.multi_reduction <add>, %706, %cst_200 [1] : vector<2x32xf32> to vector<2xf32>
    %708 = vector.shape_cast %707 : vector<2xf32> to vector<2x1xf32>
    %709 = math.log %708 : vector<2x1xf32>
    %710 = arith.addf %703, %709 : vector<2x1xf32>
    %711 = vector.broadcast %710 : vector<2x1xf32> to vector<2x32xf32>
    %712 = arith.subf %701, %711 : vector<2x32xf32>
    %c5 = arith.constant 5 : index
    %c0_201 = arith.constant 0 : index
    %c0_202 = arith.constant 0 : index
    %713 = vector.load %arg18[%c5, %c0_201, %c0_202] : memref<8x2x32xf32, #tpu.memory_space<vmem>>, vector<1x2x32xf32>
    %714 = vector.shape_cast %713 : vector<1x2x32xf32> to vector<2x32xf32>
    %715 = vector.shape_cast %712 : vector<2x32xf32> to vector<1x2x32xf32>
    tpu.vector_store %arg18[%c5, %c0_201, %c0_202], %715 {strides = array<i32>} : memref<8x2x32xf32, #tpu.memory_space<vmem>>, vector<1x2x32xf32>,
    %c5_203 = arith.constant 5 : index
    %c0_204 = arith.constant 0 : index
    %c0_205 = arith.constant 0 : index
    %716 = vector.load %arg19[%c5_203, %c0_204, %c0_205] : memref<8x2x8xf32, #tpu.memory_space<vmem>>, vector<1x2x8xf32>
    %717 = vector.shape_cast %716 : vector<1x2x8xf32> to vector<2x8xf32>
    %718 = vector.shape_cast %689 : vector<2x8xf32> to vector<1x2x8xf32>
    tpu.vector_store %arg19[%c5_203, %c0_204, %c0_205], %718 {strides = array<i32>} : memref<8x2x8xf32, #tpu.memory_space<vmem>>, vector<1x2x8xf32>,
    %719 = vector.extract_strided_slice %279 {offsets = [12, 0], sizes = [2, 96], strides = [1, 1]} : vector<16x96xf32> to vector<2x96xf32>
    %cst_206 = arith.constant dense<0.000000e+00> : vector<2x96xf32>
    %720 = tpu.matmul %676, %280, %cst_206 {dimension_numbers = #tpu.dot_dimension_numbers<[1], [0], [0], [1], [0, 0, 1, 1], [], []>} : vector<2x32xf32>, vector<32x96xf32>, vector<2x96xf32> -> vector<2x96xf32>
    %721 = vector.broadcast %281 : vector<1x96xf32> to vector<2x96xf32>
    %722 = arith.addf %720, %721 : vector<2x96xf32>
    %723 = vector.extract_strided_slice %719 {offsets = [0, 0], sizes = [2, 32], strides = [1, 1]} : vector<2x96xf32> to vector<2x32xf32>
    %724 = vector.extract_strided_slice %719 {offsets = [0, 32], sizes = [2, 32], strides = [1, 1]} : vector<2x96xf32> to vector<2x32xf32>
    %725 = vector.extract_strided_slice %719 {offsets = [0, 64], sizes = [2, 32], strides = [1, 1]} : vector<2x96xf32> to vector<2x32xf32>
    %726 = vector.extract_strided_slice %722 {offsets = [0, 0], sizes = [2, 32], strides = [1, 1]} : vector<2x96xf32> to vector<2x32xf32>
    %727 = vector.extract_strided_slice %722 {offsets = [0, 32], sizes = [2, 32], strides = [1, 1]} : vector<2x96xf32> to vector<2x32xf32>
    %728 = vector.extract_strided_slice %722 {offsets = [0, 64], sizes = [2, 32], strides = [1, 1]} : vector<2x96xf32> to vector<2x32xf32>
    %729 = arith.addf %723, %726 : vector<2x32xf32>
    %730 = arith.negf %729 : vector<2x32xf32>
    %731 = math.exp %730 : vector<2x32xf32>
    %cst_207 = arith.constant 1.000000e+00 : f32
    %732 = vector.broadcast %cst_207 : f32 to vector<2x32xf32>
    %733 = arith.addf %732, %731 : vector<2x32xf32>
    %734 = arith.divf %732, %733 : vector<2x32xf32>
    %735 = arith.addf %724, %727 : vector<2x32xf32>
    %736 = arith.negf %735 : vector<2x32xf32>
    %737 = math.exp %736 : vector<2x32xf32>
    %cst_208 = arith.constant 1.000000e+00 : f32
    %738 = vector.broadcast %cst_208 : f32 to vector<2x32xf32>
    %739 = arith.addf %738, %737 : vector<2x32xf32>
    %740 = arith.divf %738, %739 : vector<2x32xf32>
    %741 = arith.mulf %734, %728 : vector<2x32xf32>
    %742 = arith.addf %725, %741 : vector<2x32xf32>
    %743 = math.tanh %742 : vector<2x32xf32>
    %cst_209 = arith.constant 1.000000e+00 : f32
    %744 = vector.broadcast %cst_209 : f32 to vector<2x32xf32>
    %745 = arith.subf %744, %740 : vector<2x32xf32>
    %746 = arith.mulf %745, %743 : vector<2x32xf32>
    %747 = arith.mulf %740, %676 : vector<2x32xf32>
    %748 = arith.addf %746, %747 : vector<2x32xf32>
    %cst_210 = arith.constant dense<0.000000e+00> : vector<2x16xf32>
    %749 = tpu.matmul %748, %266, %cst_210 {dimension_numbers = #tpu.dot_dimension_numbers<[1], [1], [0], [0], [0, 0, 1, 0], [], []>} : vector<2x32xf32>, vector<16x32xf32>, vector<2x16xf32> -> vector<2x16xf32>
    %750 = arith.mulf %749, %0 : vector<2x16xf32>
    %cst_211 = arith.constant dense<0.000000e+00> : vector<2x8xf32>
    %751 = tpu.matmul %750, %1, %cst_211 {dimension_numbers = #tpu.dot_dimension_numbers<[1], [0], [0], [1], [0, 0, 1, 1], [], []>} : vector<2x16xf32>, vector<16x8xf32>, vector<2x8xf32> -> vector<2x8xf32>
    %cst_212 = arith.constant dense<0xFF800000> : vector<2xf32>
    %752 = vector.multi_reduction <maximumf>, %751, %cst_212 [1] : vector<2x8xf32> to vector<2xf32>
    %753 = vector.shape_cast %752 : vector<2xf32> to vector<2x1xf32>
    %754 = vector.broadcast %753 : vector<2x1xf32> to vector<2x8xf32>
    %755 = arith.subf %751, %754 : vector<2x8xf32>
    %756 = math.exp %755 : vector<2x8xf32>
    %cst_213 = arith.constant dense<0.000000e+00> : vector<2xf32>
    %757 = vector.multi_reduction <add>, %756, %cst_213 [1] : vector<2x8xf32> to vector<2xf32>
    %758 = vector.shape_cast %757 : vector<2xf32> to vector<2x1xf32>
    %759 = tpu.reciprocal %758 {approx = true} : vector<2x1xf32> -> vector<2x1xf32>
    %760 = vector.broadcast %759 : vector<2x1xf32> to vector<2x8xf32>
    %761 = arith.mulf %756, %760 : vector<2x8xf32>
    %cst_214 = arith.constant dense<0.000000e+00> : vector<2x16xf32>
    %762 = tpu.matmul %761, %1, %cst_214 {dimension_numbers = #tpu.dot_dimension_numbers<[1], [1], [0], [0], [0, 0, 1, 0], [], []>} : vector<2x8xf32>, vector<16x8xf32>, vector<2x16xf32> -> vector<2x16xf32>
    %763 = arith.mulf %762, %0 : vector<2x16xf32>
    %cst_215 = arith.constant dense<0.000000e+00> : vector<2x32xf32>
    %764 = tpu.matmul %763, %266, %cst_215 {dimension_numbers = #tpu.dot_dimension_numbers<[1], [0], [0], [1], [0, 0, 1, 1], [], []>} : vector<2x16xf32>, vector<16x32xf32>, vector<2x32xf32> -> vector<2x32xf32>
    %cst_216 = arith.constant dense<0.000000e+00> : vector<2x32xf32>
    %765 = tpu.matmul %764, %282, %cst_216 {dimension_numbers = #tpu.dot_dimension_numbers<[1], [0], [0], [1], [0, 0, 1, 1], [], []>} : vector<2x32xf32>, vector<32x32xf32>, vector<2x32xf32> -> vector<2x32xf32>
    %cst_217 = arith.constant dense<0.000000e+00> : vector<2x32xf32>
    %766 = tpu.matmul %748, %283, %cst_217 {dimension_numbers = #tpu.dot_dimension_numbers<[1], [0], [0], [1], [0, 0, 1, 1], [], []>} : vector<2x32xf32>, vector<32x32xf32>, vector<2x32xf32> -> vector<2x32xf32>
    %767 = arith.addf %765, %766 : vector<2x32xf32>
    %768 = vector.broadcast %284 : vector<1x32xf32> to vector<2x32xf32>
    %769 = arith.addf %767, %768 : vector<2x32xf32>
    %770 = math.tanh %769 : vector<2x32xf32>
    %cst_218 = arith.constant dense<0.000000e+00> : vector<2x32xf32>
    %771 = tpu.matmul %770, %285, %cst_218 {dimension_numbers = #tpu.dot_dimension_numbers<[1], [0], [0], [1], [0, 0, 1, 1], [], []>} : vector<2x32xf32>, vector<32x32xf32>, vector<2x32xf32> -> vector<2x32xf32>
    %772 = vector.broadcast %286 : vector<1x32xf32> to vector<2x32xf32>
    %773 = arith.addf %771, %772 : vector<2x32xf32>
    %cst_219 = arith.constant dense<0xFF800000> : vector<2xf32>
    %774 = vector.multi_reduction <maximumf>, %773, %cst_219 [1] : vector<2x32xf32> to vector<2xf32>
    %775 = vector.shape_cast %774 : vector<2xf32> to vector<2x1xf32>
    %776 = vector.broadcast %775 : vector<2x1xf32> to vector<2x32xf32>
    %777 = arith.subf %773, %776 : vector<2x32xf32>
    %778 = math.exp %777 : vector<2x32xf32>
    %cst_220 = arith.constant dense<0.000000e+00> : vector<2xf32>
    %779 = vector.multi_reduction <add>, %778, %cst_220 [1] : vector<2x32xf32> to vector<2xf32>
    %780 = vector.shape_cast %779 : vector<2xf32> to vector<2x1xf32>
    %781 = math.log %780 : vector<2x1xf32>
    %782 = arith.addf %775, %781 : vector<2x1xf32>
    %783 = vector.broadcast %782 : vector<2x1xf32> to vector<2x32xf32>
    %784 = arith.subf %773, %783 : vector<2x32xf32>
    %c6_221 = arith.constant 6 : index
    %c0_222 = arith.constant 0 : index
    %c0_223 = arith.constant 0 : index
    %785 = vector.load %arg18[%c6_221, %c0_222, %c0_223] : memref<8x2x32xf32, #tpu.memory_space<vmem>>, vector<1x2x32xf32>
    %786 = vector.shape_cast %785 : vector<1x2x32xf32> to vector<2x32xf32>
    %787 = vector.shape_cast %784 : vector<2x32xf32> to vector<1x2x32xf32>
    tpu.vector_store %arg18[%c6_221, %c0_222, %c0_223], %787 {strides = array<i32>} : memref<8x2x32xf32, #tpu.memory_space<vmem>>, vector<1x2x32xf32>,
    %c6_224 = arith.constant 6 : index
    %c0_225 = arith.constant 0 : index
    %c0_226 = arith.constant 0 : index
    %788 = vector.load %arg19[%c6_224, %c0_225, %c0_226] : memref<8x2x8xf32, #tpu.memory_space<vmem>>, vector<1x2x8xf32>
    %789 = vector.shape_cast %788 : vector<1x2x8xf32> to vector<2x8xf32>
    %790 = vector.shape_cast %761 : vector<2x8xf32> to vector<1x2x8xf32>
    tpu.vector_store %arg19[%c6_224, %c0_225, %c0_226], %790 {strides = array<i32>} : memref<8x2x8xf32, #tpu.memory_space<vmem>>, vector<1x2x8xf32>,
    %791 = vector.extract_strided_slice %279 {offsets = [14, 0], sizes = [2, 96], strides = [1, 1]} : vector<16x96xf32> to vector<2x96xf32>
    %cst_227 = arith.constant dense<0.000000e+00> : vector<2x96xf32>
    %792 = tpu.matmul %748, %280, %cst_227 {dimension_numbers = #tpu.dot_dimension_numbers<[1], [0], [0], [1], [0, 0, 1, 1], [], []>} : vector<2x32xf32>, vector<32x96xf32>, vector<2x96xf32> -> vector<2x96xf32>
    %793 = vector.broadcast %281 : vector<1x96xf32> to vector<2x96xf32>
    %794 = arith.addf %792, %793 : vector<2x96xf32>
    %795 = vector.extract_strided_slice %791 {offsets = [0, 0], sizes = [2, 32], strides = [1, 1]} : vector<2x96xf32> to vector<2x32xf32>
    %796 = vector.extract_strided_slice %791 {offsets = [0, 32], sizes = [2, 32], strides = [1, 1]} : vector<2x96xf32> to vector<2x32xf32>
    %797 = vector.extract_strided_slice %791 {offsets = [0, 64], sizes = [2, 32], strides = [1, 1]} : vector<2x96xf32> to vector<2x32xf32>
    %798 = vector.extract_strided_slice %794 {offsets = [0, 0], sizes = [2, 32], strides = [1, 1]} : vector<2x96xf32> to vector<2x32xf32>
    %799 = vector.extract_strided_slice %794 {offsets = [0, 32], sizes = [2, 32], strides = [1, 1]} : vector<2x96xf32> to vector<2x32xf32>
    %800 = vector.extract_strided_slice %794 {offsets = [0, 64], sizes = [2, 32], strides = [1, 1]} : vector<2x96xf32> to vector<2x32xf32>
    %801 = arith.addf %795, %798 : vector<2x32xf32>
    %802 = arith.negf %801 : vector<2x32xf32>
    %803 = math.exp %802 : vector<2x32xf32>
    %cst_228 = arith.constant 1.000000e+00 : f32
    %804 = vector.broadcast %cst_228 : f32 to vector<2x32xf32>
    %805 = arith.addf %804, %803 : vector<2x32xf32>
    %806 = arith.divf %804, %805 : vector<2x32xf32>
    %807 = arith.addf %796, %799 : vector<2x32xf32>
    %808 = arith.negf %807 : vector<2x32xf32>
    %809 = math.exp %808 : vector<2x32xf32>
    %cst_229 = arith.constant 1.000000e+00 : f32
    %810 = vector.broadcast %cst_229 : f32 to vector<2x32xf32>
    %811 = arith.addf %810, %809 : vector<2x32xf32>
    %812 = arith.divf %810, %811 : vector<2x32xf32>
    %813 = arith.mulf %806, %800 : vector<2x32xf32>
    %814 = arith.addf %797, %813 : vector<2x32xf32>
    %815 = math.tanh %814 : vector<2x32xf32>
    %cst_230 = arith.constant 1.000000e+00 : f32
    %816 = vector.broadcast %cst_230 : f32 to vector<2x32xf32>
    %817 = arith.subf %816, %812 : vector<2x32xf32>
    %818 = arith.mulf %817, %815 : vector<2x32xf32>
    %819 = arith.mulf %812, %748 : vector<2x32xf32>
    %820 = arith.addf %818, %819 : vector<2x32xf32>
    %cst_231 = arith.constant dense<0.000000e+00> : vector<2x16xf32>
    %821 = tpu.matmul %820, %266, %cst_231 {dimension_numbers = #tpu.dot_dimension_numbers<[1], [1], [0], [0], [0, 0, 1, 0], [], []>} : vector<2x32xf32>, vector<16x32xf32>, vector<2x16xf32> -> vector<2x16xf32>
    %822 = arith.mulf %821, %0 : vector<2x16xf32>
    %cst_232 = arith.constant dense<0.000000e+00> : vector<2x8xf32>
    %823 = tpu.matmul %822, %1, %cst_232 {dimension_numbers = #tpu.dot_dimension_numbers<[1], [0], [0], [1], [0, 0, 1, 1], [], []>} : vector<2x16xf32>, vector<16x8xf32>, vector<2x8xf32> -> vector<2x8xf32>
    %cst_233 = arith.constant dense<0xFF800000> : vector<2xf32>
    %824 = vector.multi_reduction <maximumf>, %823, %cst_233 [1] : vector<2x8xf32> to vector<2xf32>
    %825 = vector.shape_cast %824 : vector<2xf32> to vector<2x1xf32>
    %826 = vector.broadcast %825 : vector<2x1xf32> to vector<2x8xf32>
    %827 = arith.subf %823, %826 : vector<2x8xf32>
    %828 = math.exp %827 : vector<2x8xf32>
    %cst_234 = arith.constant dense<0.000000e+00> : vector<2xf32>
    %829 = vector.multi_reduction <add>, %828, %cst_234 [1] : vector<2x8xf32> to vector<2xf32>
    %830 = vector.shape_cast %829 : vector<2xf32> to vector<2x1xf32>
    %831 = tpu.reciprocal %830 {approx = true} : vector<2x1xf32> -> vector<2x1xf32>
    %832 = vector.broadcast %831 : vector<2x1xf32> to vector<2x8xf32>
    %833 = arith.mulf %828, %832 : vector<2x8xf32>
    %cst_235 = arith.constant dense<0.000000e+00> : vector<2x16xf32>
    %834 = tpu.matmul %833, %1, %cst_235 {dimension_numbers = #tpu.dot_dimension_numbers<[1], [1], [0], [0], [0, 0, 1, 0], [], []>} : vector<2x8xf32>, vector<16x8xf32>, vector<2x16xf32> -> vector<2x16xf32>
    %835 = arith.mulf %834, %0 : vector<2x16xf32>
    %cst_236 = arith.constant dense<0.000000e+00> : vector<2x32xf32>
    %836 = tpu.matmul %835, %266, %cst_236 {dimension_numbers = #tpu.dot_dimension_numbers<[1], [0], [0], [1], [0, 0, 1, 1], [], []>} : vector<2x16xf32>, vector<16x32xf32>, vector<2x32xf32> -> vector<2x32xf32>
    %cst_237 = arith.constant dense<0.000000e+00> : vector<2x32xf32>
    %837 = tpu.matmul %836, %282, %cst_237 {dimension_numbers = #tpu.dot_dimension_numbers<[1], [0], [0], [1], [0, 0, 1, 1], [], []>} : vector<2x32xf32>, vector<32x32xf32>, vector<2x32xf32> -> vector<2x32xf32>
    %cst_238 = arith.constant dense<0.000000e+00> : vector<2x32xf32>
    %838 = tpu.matmul %820, %283, %cst_238 {dimension_numbers = #tpu.dot_dimension_numbers<[1], [0], [0], [1], [0, 0, 1, 1], [], []>} : vector<2x32xf32>, vector<32x32xf32>, vector<2x32xf32> -> vector<2x32xf32>
    %839 = arith.addf %837, %838 : vector<2x32xf32>
    %840 = vector.broadcast %284 : vector<1x32xf32> to vector<2x32xf32>
    %841 = arith.addf %839, %840 : vector<2x32xf32>
    %842 = math.tanh %841 : vector<2x32xf32>
    %cst_239 = arith.constant dense<0.000000e+00> : vector<2x32xf32>
    %843 = tpu.matmul %842, %285, %cst_239 {dimension_numbers = #tpu.dot_dimension_numbers<[1], [0], [0], [1], [0, 0, 1, 1], [], []>} : vector<2x32xf32>, vector<32x32xf32>, vector<2x32xf32> -> vector<2x32xf32>
    %844 = vector.broadcast %286 : vector<1x32xf32> to vector<2x32xf32>
    %845 = arith.addf %843, %844 : vector<2x32xf32>
    %cst_240 = arith.constant dense<0xFF800000> : vector<2xf32>
    %846 = vector.multi_reduction <maximumf>, %845, %cst_240 [1] : vector<2x32xf32> to vector<2xf32>
    %847 = vector.shape_cast %846 : vector<2xf32> to vector<2x1xf32>
    %848 = vector.broadcast %847 : vector<2x1xf32> to vector<2x32xf32>
    %849 = arith.subf %845, %848 : vector<2x32xf32>
    %850 = math.exp %849 : vector<2x32xf32>
    %cst_241 = arith.constant dense<0.000000e+00> : vector<2xf32>
    %851 = vector.multi_reduction <add>, %850, %cst_241 [1] : vector<2x32xf32> to vector<2xf32>
    %852 = vector.shape_cast %851 : vector<2xf32> to vector<2x1xf32>
    %853 = math.log %852 : vector<2x1xf32>
    %854 = arith.addf %847, %853 : vector<2x1xf32>
    %855 = vector.broadcast %854 : vector<2x1xf32> to vector<2x32xf32>
    %856 = arith.subf %845, %855 : vector<2x32xf32>
    %c7 = arith.constant 7 : index
    %c0_242 = arith.constant 0 : index
    %c0_243 = arith.constant 0 : index
    %857 = vector.load %arg18[%c7, %c0_242, %c0_243] : memref<8x2x32xf32, #tpu.memory_space<vmem>>, vector<1x2x32xf32>
    %858 = vector.shape_cast %857 : vector<1x2x32xf32> to vector<2x32xf32>
    %859 = vector.shape_cast %856 : vector<2x32xf32> to vector<1x2x32xf32>
    tpu.vector_store %arg18[%c7, %c0_242, %c0_243], %859 {strides = array<i32>} : memref<8x2x32xf32, #tpu.memory_space<vmem>>, vector<1x2x32xf32>,
    %c7_244 = arith.constant 7 : index
    %c0_245 = arith.constant 0 : index
    %c0_246 = arith.constant 0 : index
    %860 = vector.load %arg19[%c7_244, %c0_245, %c0_246] : memref<8x2x8xf32, #tpu.memory_space<vmem>>, vector<1x2x8xf32>
    %861 = vector.shape_cast %860 : vector<1x2x8xf32> to vector<2x8xf32>
    %862 = vector.shape_cast %833 : vector<2x8xf32> to vector<1x2x8xf32>
    tpu.vector_store %arg19[%c7_244, %c0_245, %c0_246], %862 {strides = array<i32>} : memref<8x2x8xf32, #tpu.memory_space<vmem>>, vector<1x2x8xf32>,
    %c0_247 = arith.constant 0 : index
    %c0_248 = arith.constant 0 : index
    %863 = vector.load %arg20[%c0_247, %c0_248] : memref<2x32xf32, #tpu.memory_space<vmem>>, vector<2x32xf32>
    tpu.vector_store %arg20[%c0_247, %c0_248], %820 {strides = array<i32>} : memref<2x32xf32, #tpu.memory_space<vmem>>, vector<2x32xf32>,
    return
  }
}

</mosaic_0001>

<bundles_post_ra>
// kernel: tpu_custom_call.1
= control target key start
LH: loop header
LB: loop body
LE: loop exit
PB: predicated region body
PF: predicated region fallthrough
CT: control target
= control target key end

     0   :  { %s4517_s0 = inlined_call_operand.vmem [shape: s32[16,1], index: 0, kind: input, shape index: {}]   ;;  %s4518_s1 = inlined_call_operand.vmem [shape: s32[16,1], index: 1, kind: input, shape index: {}]   ;;  %s4519_s2 = inlined_call_operand.vmem [shape: f32[2,16], index: 2, kind: input, shape index: {}]   ;;  %s4520_s3 = inlined_call_operand.vmem [shape: f32[16,8], index: 3, kind: input, shape index: {}]   ;;  %s4521_s4 = inlined_call_operand.vmem [shape: f32[32,16], index: 4, kind: input, shape index: {}]   ;;  %s4522_s5 = inlined_call_operand.vmem [shape: f32[16,96], index: 5, kind: input, shape index: {}]   ;;  %s4523_s6 = inlined_call_operand.vmem [shape: f32[32,96], index: 6, kind: input, shape index: {}]   ;;  %s4524_s7 = inlined_call_operand.vmem [shape: f32[1,96], index: 7, kind: input, shape index: {}]   ;;  %s4525_s8 = inlined_call_operand.vmem [shape: f32[1,96], index: 8, kind: input, shape index: {}]   ;;  %s4526_s9 = inlined_call_operand.vmem [shape: f32[32,16], index: 9, kind: input, shape index: {}]   ;;  %s4527_s10 = inlined_call_operand.vmem [shape: f32[16,96], index: 10, kind: input, shape index: {}]   ;;  %s4528_s11 = inlined_call_operand.vmem [shape: f32[32,96], index: 11, kind: input, shape index: {}]   ;;  %s4529_s12 = inlined_call_operand.vmem [shape: f32[1,96], index: 12, kind: input, shape index: {}]   ;;  %s4530_s13 = inlined_call_operand.vmem [shape: f32[1,96], index: 13, kind: input, shape index: {}]   ;;  %s4531_s14 = inlined_call_operand.vmem [shape: f32[64,32], index: 14, kind: input, shape index: {}]   ;;  %s4532_s15 = inlined_call_operand.vmem [shape: f32[1,32], index: 15, kind: input, shape index: {}]   ;;  %s4533_s16 = inlined_call_operand.vmem [shape: f32[32,32], index: 16, kind: input, shape index: {}]   ;;  %s4534_s17 = inlined_call_operand.vmem [shape: f32[1,32], index: 17, kind: input, shape index: {}]   ;;  %s4535_s18 = inlined_call_operand.hbm [shape: f32[8,2,32], index: 18, kind: output, shape index: {0}]   ;;  %s4536_s19 = inlined_call_operand.hbm [shape: f32[8,2,8], index: 19, kind: output, shape index: {1}]   ;;  %s4537_s20 = inlined_call_operand.hbm [shape: f32[2,32], index: 20, kind: output, shape index: {2}]  }
   0x1   :  { %4543 = sst [smem:[#allocation10_spill]] %s4517_s0 }
   0x2   :  { %4544 = sst [smem:[#allocation11_spill]] %s4518_s1 }
   0x3   :  { %4545 = sst [smem:[#allocation12_spill]] %s4519_s2 }
   0x4   :  { %4546 = sst [smem:[#allocation13_spill]] %s4520_s3 }
   0x5   :  { %4547 = sst [smem:[#allocation14_spill]] %s4521_s4 }
   0x6   :  { %26 = vsyncpa [#allocation4], 0  ;;  %v88_v0 = vld [vmem:[%s4522_s5 + $0x8] sm:$0xff]  ;;  %v87_v1 = vld [vmem:[%s4522_s5] sm:$0xff]  ;;  %s4548_s3 = sld [smem:[#allocation14_spill]]  ;;  %vm89_vm0 = vcmask 130048  }
   0x7   :  { %116 = vmatpush.msra.mxu0 %v88_v0  ;;  %v3410_v3 = vmov 0   ;;  %s4549_s28 = sld [smem:[#allocation10_spill]]  ;;  %v3539_v5 = vld [vmem:[%s4523_s6 + $0x18] sm:$0xff]  ;;  %v3544_v6 = vld [vmem:[%s4523_s6 + $0x10] sm:$0xff]  ;;  %v3549_v7 = vld [vmem:[%s4523_s6 + $0x8] sm:$0xff] }
   0x8   :  { %3126 = vset.pattern.permute.xlu0 %v3410_v3  ;;  %3127 = vset.pattern.permute.xlu1 %v3410_v3 }
   0x9   :  { %3128 = vset.pattern.permute.xlu2 %v3410_v3  ;;  %117 = vmatpush.msra.mxu0 %v87_v1 }
   0xa   :  { %188 = vmatpush.msra.mxu2 %v3539_v5  ;;  %255 = vmatpush.msra.mxu3 %v3539_v5 }
   0xc   :  { %v83_v2 = vld [vmem:[%s4548_s3] sm:$0xff] }
   0xd   :  { %v67_v4 = vld [vmem:[%s4549_s28] sm:$0xff]  ;;  %2984 = vmatmul.msk.f32.vlgmr.msra.gmra.mxu0 %vm89_vm0, %v83_v2 }
   0xe   :  { %72 = vperm.xlu0 %3126, %v67_v4  }
   0xf   :  { %27 = vsyncpa [#allocation6], 0  ;;  %189 = vmatpush.msra.mxu2 %v3544_v6  ;;  %v3558_v8 = vld [vmem:[%s4523_s6] sm:$0xff]  ;;  %256 = vmatpush.msra.mxu3 %v3544_v6  ;;  %v84_v9 = vld [vmem:[%s4548_s3 + $0x8] sm:$0xff]  ;;  %v3411_v10 = vmov 0.0   ;;  %s3412_s29 = smov 64   ;;  %v69_v19 = vlaneseq }
  0x10   :  { %v85_v11 = vld [vmem:[%s4548_s3 + $0x10] sm:$0xff]  ;;  %v86_v12 = vld [vmem:[%s4548_s3 + $0x18] sm:$0xff]  ;;  %v3593_v15 = vld [vmem:[%s4525_s8] ss:$0 sm:$0xff]  ;;  %vm135_vm2 = vcmask 261120   ;;  %vm239_vm7 = vcmask 254976  }
  0x11   :  { %190 = vmatpush.msra.mxu2 %v3549_v7  ;;  %257 = vmatpush.msra.mxu3 %v3549_v7  ;;  %v3597_v20 = vand.u32 127, %v69_v19  ;;  %v3613_v24 = vld [vmem:[%s4524_s7] ss:$0 sm:$0xff]  ;;  %s3413_s7 = smov 96   ;;  %s4550_s4 = sld [smem:[#allocation11_spill]] }
  0x12   :  { %s4552_s22 = sld [smem:[#allocation12_spill]]  ;;  %s2950_s6 = sshll.u32 %s4536_s19, 4  ;;  %s2951_s6 = int_to_ptr.hbm [resolvable:$true] %s2950_s6 }
  0x13   :  { %191 = vmatpush.msra.mxu2 %v3558_v8  ;;  %258 = vmatpush.msra.mxu3 %v3558_v8  ;;  %s3417_s19 = smov [#allocation7]   ;;  %s2964_s25 = sshll.u32 %s4537_s20, 4  ;;  %s2965_s25 = int_to_ptr.hbm [resolvable:$true] %s2964_s25 }
  0x14   :  { %192 = vmatmul.f32.vlgmr.msra.gmra.mxu2 %v3411_v10  ;;  %s2962_s2 = sshll.u32 %s3417_s19, 4  ;;  %s3418_s26 = smov [#allocation3]   ;;  %s2963_s2 = int_to_ptr.vmem [resolvable:$true] %s2962_s2 }
  0x15   :  { %2985 = vmatmul.msk.f32.gmra.mxu0 %vm89_vm0, %v84_v9  ;;  %329 = vmatpush.msrb.mxu2 %v3539_v5  ;;  %s2937_s3 = sshll.u32 %s4535_s18, 4  ;;  %s2938_s3 = int_to_ptr.hbm [resolvable:$true] %s2937_s3 }
  0x16   :  { %403 = vmatpush.msrb.mxu3 %v3539_v5 }
  0x17   :  { %330 = vmatpush.msrb.mxu2 %v3544_v6 }
  0x18   :  { %404 = vmatpush.msrb.mxu3 %v3544_v6 }
  0x19   :  { %331 = vmatpush.msrb.mxu2 %v3549_v7 }
  0x1a   :  { %405 = vmatpush.msrb.mxu3 %v3549_v7 }
  0x1b   :  { %332 = vmatpush.msrb.mxu2 %v3558_v8 }
  0x1c   :  { %406 = vmatpush.msrb.mxu3 %v3558_v8 }
  0x1d   :  { %544 = vmatpush.msra.mxu2 %v3539_v5  ;;  %2986 = vmatmul.msk.f32.gmra.mxu0 %vm89_vm0, %v85_v11 }
  0x1f   :  { %545 = vmatpush.msra.mxu2 %v3544_v6 }
  0x21   :  { %546 = vmatpush.msra.mxu2 %v3549_v7 }
  0x23   :  { %547 = vmatpush.msra.mxu2 %v3558_v8 }
  0x25   :  { %2987 = vmatmul.msk.f32.gmra.mxu0 %vm89_vm0, %v86_v12 }
  0x80   :  { %v73_v21 = vpop.permute.xlu0 %72 }
  0x81   :  { %vm77_vm1 = vcmp.eq.s32.totalorder %v73_v21, %v3597_v20 }
  0x82   :  { %v2982_v23 = vsel %vm77_vm1, 1.0, %v3411_v10 }
  0x8a   :  { %v119_v13 = vpop.f32.mrf.mxu0 }
  0x92   :  { %v122_v14 = vpop.f32.mrf.mxu0 }
  0x97   :  { %v193_v16 = vpop.f32.mrf.mxu2 }
  0x98   :  { %v194_v17 = vadd.f32 %v3593_v15, %v193_v16 }
  0x9a   :  { %v125_v18 = vpop.f32.mrf.mxu0  ;;  %217 = vrot.lane.b32.xlu0 %v194_v17, %s3412_s29 }
  0xa2   :  { %v128_v22 = vpop.f32.mrf.mxu0 }
  0xa3   :  { %154 = vmatpush.msra.mxu1 %v128_v22 }
  0xa5   :  { %155 = vmatpush.msra.mxu1 %v125_v18 }
  0xa7   :  { %156 = vmatpush.msra.mxu1 %v122_v14 }
  0xa9   :  { %157 = vmatpush.msra.mxu1 %v119_v13 }
  0xaa   :  { %2988 = vmatmul.msk.f32.vlgmr.msra.gmra.mxu1 %vm135_vm2, %v2982_v23 }
  0xab   :  { %477 = vmatpush.msrb.mxu1 %v3539_v5 }
  0xad   :  { %478 = vmatpush.msrb.mxu1 %v3544_v6 }
  0xaf   :  { %479 = vmatpush.msrb.mxu1 %v3549_v7 }
  0xb1   :  { %480 = vmatpush.msrb.mxu1 %v3558_v8 }
  0xb3   :  { %690 = vmatpush.msra.mxu1 %v3539_v5 }
  0xb5   :  { %691 = vmatpush.msra.mxu1 %v3544_v6 }
  0xb7   :  { %692 = vmatpush.msra.mxu1 %v3549_v7 }
  0xb9   :  { %693 = vmatpush.msra.mxu1 %v3558_v8 }
 0x10c   :  { %v218_v39 = vpop.permute.xlu0 %217 }
 0x127   :  { %v159_v25 = vpop.f32.mrf.mxu1 }
 0x128   :  { %v3616_v26 = vadd.f32 %v3613_v24, %v159_v25 }
 0x12a   :  { %v196_v27 = vadd.f32 %v194_v17, %v3616_v26 }
 0x12c   :  { %v2990_v28 = vmul.f32 -1.442695, %v196_v27 }
 0x12e   :  { %3135 = vpow2.f32 %v2990_v28 }
 0x134   :  { %v3136_v29 = vpop.eup %3135 }
 0x135   :  { %v200_v30 = vadd.f32 1.0, %v3136_v29 }
 0x137   :  { %3137 = vrcp.f32 %v200_v30  ;;  %v212_v34 = vand.u32 2147483648, %v200_v30  ;;  %v210_v36 = vand.u32 2147483647, %v200_v30  ;;  %vm206_vm4 = vweird.f32 %v200_v30 }
 0x139   :  { %v213_v38 = vor.u32 1.1754944e-38, %v212_v34  ;;  %vm211_vm6 = vcmp.eq.f32.partialorder %v210_v36, 8.507059e+37 }
 0x13d   :  { %v3138_v31 = vpop.eup %3137 }
 0x13e   :  { %v202_v32 = vmul.f32 %v3138_v31, %v200_v30  ;;  %vm207_vm3 = vweird.f32 %v3138_v31 }
 0x13f   :  { %vm208_vm5 = vmor %vm206_vm4, %vm207_vm3 }
 0x140   :  { %v203_v33 = vsub.f32 1.0, %v202_v32 }
 0x142   :  { %v204_v35 = vmul.f32 %v3138_v31, %v203_v33 }
 0x144   :  { %v205_v37 = vadd.f32 %v3138_v31, %v204_v35 }
 0x146   :  { %v209_v40 = vsel %vm208_vm5, %v3138_v31, %v205_v37 }
 0x147   :  { %v214_v41 = vsel %vm211_vm6, %v213_v38, %v209_v40 }
 0x148   :  { %v220_v42 = vmul.f32 %v218_v39, %v214_v41  ;;  %v227_v46 = vsub.f32 1.0, %v214_v41  ;;  %v233_v49 = vmul.f32 0.0, %v214_v41 }
 0x14a   :  { %222 = vrot.lane.b32.xlu1 %v220_v42, %s3412_s29 }
 0x1bc   :  { %v223_v43 = vpop.permute.xlu1 %222 }
 0x1bd   :  { %v225_v44 = vadd.f32 %v223_v43, %v3616_v26 }
 0x1bf   :  { %3139 = vtanh.f32 %v225_v44 }
 0x1c5   :  { %v3140_v45 = vpop.eup %3139 }
 0x1c6   :  { %229 = vrot.lane.b32.xlu1 %v3140_v45, %s3413_s7 }
 0x238   :  { %v230_v47 = vpop.permute.xlu1 %229 }
 0x239   :  { %v232_v48 = vmul.f32 %v230_v47, %v227_v46 }
 0x23b   :  { %v234_v50 = vadd.f32 %v233_v49, %v232_v48 }
 0x23d   :  { %236 = vrot.lane.b32.xlu2 %v234_v50, %s3413_s7  ;;  %v302_v3 = vrot.slane %v234_v50, 6 }
 0x297   :  { %v237_v51 = vpop.permute.xlu2 %236 }
 0x298   :  { %240 = vst.msk [vmem:[#allocation2] sm:$0x3] %vm239_vm7, %v237_v51  ;;  %2991 = vmatmul.msk.f32.vlgmr.msra.gmra.mxu3 %vm135_vm2, %v237_v51 }
 0x299   :  { %617 = vmatpush.msra.mxu3 %v3539_v5 }
 0x29b   :  { %618 = vmatpush.msra.mxu3 %v3544_v6 }
 0x29d   :  { %619 = vmatpush.msra.mxu3 %v3549_v7 }
 0x29f   :  { %620 = vmatpush.msra.mxu3 %v3558_v8 }
 0x31b   :  { %v260_v52 = vpop.f32.mrf.mxu3 }
 0x31c   :  { %v261_v53 = vadd.f32 %v3593_v15, %v260_v52 }
 0x31e   :  { %v264_v54 = vrot.slane %v261_v53, 6 }
 0x320   :  { %v266_v55 = vadd.f32 %v264_v54, %v3616_v26  ;;  %286 = vrot.lane.b32.xlu2 %v264_v54, %s3412_s29 }
 0x322   :  { %v2992_v56 = vmul.f32 -1.442695, %v266_v55 }
 0x324   :  { %3141 = vpow2.f32 %v2992_v56 }
 0x32a   :  { %v3142_v57 = vpop.eup %3141 }
 0x32b   :  { %v270_v58 = vadd.f32 1.0, %v3142_v57 }
 0x32d   :  { %3143 = vrcp.f32 %v270_v58  ;;  %v282_v62 = vand.u32 2147483648, %v270_v58  ;;  %v280_v0 = vand.u32 2147483647, %v270_v58  ;;  %vm276_vm9 = vweird.f32 %v270_v58 }
 0x32f   :  { %v283_v2 = vor.u32 1.1754944e-38, %v282_v62  ;;  %vm281_vm11 = vcmp.eq.f32.partialorder %v280_v0, 8.507059e+37 }
 0x333   :  { %v3144_v59 = vpop.eup %3143 }
 0x334   :  { %v272_v60 = vmul.f32 %v3144_v59, %v270_v58  ;;  %vm277_vm8 = vweird.f32 %v3144_v59 }
 0x335   :  { %vm278_vm10 = vmor %vm276_vm9, %vm277_vm8 }
 0x336   :  { %v273_v61 = vsub.f32 1.0, %v272_v60 }
 0x338   :  { %v274_v63 = vmul.f32 %v3144_v59, %v273_v61 }
 0x33a   :  { %v275_v1 = vadd.f32 %v3144_v59, %v274_v63 }
 0x33c   :  { %v279_v4 = vsel %vm278_vm10, %v3144_v59, %v275_v1 }
 0x33d   :  { %v284_v5 = vsel %vm281_vm11, %v283_v2, %v279_v4 }
 0x33e   :  { %v304_v6 = vmul.f32 %v302_v3, %v284_v5  ;;  %v296_v13 = vsub.f32 1.0, %v284_v5 }
 0x37a   :  { %v287_v7 = vpop.permute.xlu2 %286 }
 0x37b   :  { %v289_v8 = vmul.f32 %v287_v7, %v284_v5 }
 0x37d   :  { %291 = vrot.lane.b32.xlu0 %v289_v8, %s3412_s29  ;;  %v68_v8 = vld [vmem:[%s4549_s28 + $0x8] sm:$0xff] }
 0x3ef   :  { %v292_v9 = vpop.permute.xlu0 %291 }
 0x3f0   :  { %v294_v11 = vadd.f32 %v292_v9, %v3616_v26 }
 0x3f2   :  { %3145 = vtanh.f32 %v294_v11 }
 0x3f8   :  { %v3146_v12 = vpop.eup %3145 }
 0x3f9   :  { %298 = vrot.lane.b32.xlu1 %v3146_v12, %s3413_s7 }
 0x46b   :  { %v299_v14 = vpop.permute.xlu1 %298 }
 0x46c   :  { %v301_v16 = vmul.f32 %v299_v14, %v296_v13 }
 0x46e   :  { %v3635_v17 = vadd.f32 %v304_v6, %v301_v16 }
 0x470   :  { %v312_v18 = vrot.slane %v3635_v17, 2  ;;  %v376_v46 = vrot.slane %v3635_v17, 6 }
 0x472   :  { %313 = vrot.lane.b32.xlu2 %v312_v18, %s3413_s7 }
 0x4cc   :  { %v314_v19 = vpop.permute.xlu2 %313 }
 0x4cd   :  { %2993 = vmatmul.msk.f32.vlgmr.msrb.gmra.mxu2 %vm135_vm2, %v314_v19 }
 0x550   :  { %v334_v21 = vpop.f32.mrf.mxu2 }
 0x551   :  { %v335_v22 = vadd.f32 %v3593_v15, %v334_v21 }
 0x553   :  { %v338_v23 = vrot.slane %v335_v22, 4 }
 0x555   :  { %360 = vrot.lane.b32.xlu0 %v338_v23, %s3412_s29  ;;  %v340_v25 = vadd.f32 %v338_v23, %v3616_v26 }
 0x557   :  { %v2994_v27 = vmul.f32 -1.442695, %v340_v25 }
 0x559   :  { %3147 = vpow2.f32 %v2994_v27 }
 0x55f   :  { %v3148_v28 = vpop.eup %3147 }
 0x560   :  { %v344_v29 = vadd.f32 1.0, %v3148_v28 }
 0x562   :  { %3149 = vrcp.f32 %v344_v29  ;;  %v356_v35 = vand.u32 2147483648, %v344_v29  ;;  %vm350_vm13 = vweird.f32 %v344_v29  ;;  %v354_v36 = vand.u32 2147483647, %v344_v29 }
 0x564   :  { %v357_v38 = vor.u32 1.1754944e-38, %v356_v35  ;;  %vm355_vm15 = vcmp.eq.f32.partialorder %v354_v36, 8.507059e+37 }
 0x568   :  { %v3150_v30 = vpop.eup %3149 }
 0x569   :  { %v346_v31 = vmul.f32 %v3150_v30, %v344_v29  ;;  %vm351_vm12 = vweird.f32 %v3150_v30 }
 0x56a   :  { %vm352_vm14 = vmor %vm350_vm13, %vm351_vm12 }
 0x56b   :  { %v347_v32 = vsub.f32 1.0, %v346_v31 }
 0x56d   :  { %v348_v33 = vmul.f32 %v3150_v30, %v347_v32 }
 0x56f   :  { %v349_v34 = vadd.f32 %v3150_v30, %v348_v33 }
 0x571   :  { %v353_v37 = vsel %vm352_vm14, %v3150_v30, %v349_v34 }
 0x572   :  { %v358_v40 = vsel %vm355_vm15, %v357_v38, %v353_v37 }
 0x573   :  { %v370_v45 = vsub.f32 1.0, %v358_v40  ;;  %v378_v48 = vmul.f32 %v376_v46, %v358_v40 }
 0x5c7   :  { %v361_v39 = vpop.permute.xlu0 %360 }
 0x5c8   :  { %v363_v41 = vmul.f32 %v361_v39, %v358_v40 }
 0x5ca   :  { %365 = vrot.lane.b32.xlu1 %v363_v41, %s3412_s29 }
 0x63c   :  { %v366_v42 = vpop.permute.xlu1 %365 }
 0x63d   :  { %v368_v43 = vadd.f32 %v366_v42, %v3616_v26 }
 0x63f   :  { %3151 = vtanh.f32 %v368_v43 }
 0x645   :  { %v3152_v44 = vpop.eup %3151 }
 0x646   :  { %372 = vrot.lane.b32.xlu2 %v3152_v44, %s3413_s7 }
 0x6a0   :  { %v373_v47 = vpop.permute.xlu2 %372 }
 0x6a1   :  { %v375_v49 = vmul.f32 %v373_v47, %v370_v45 }
 0x6a3   :  { %v3647_v50 = vadd.f32 %v378_v48, %v375_v49 }
 0x6a5   :  { %v386_v51 = vrot.slane %v3647_v50, 4  ;;  %v450_v18 = vrot.slane %v3647_v50, 6 }
 0x6a7   :  { %387 = vrot.lane.b32.xlu0 %v386_v51, %s3413_s7 }
 0x719   :  { %v388_v52 = vpop.permute.xlu0 %387 }
 0x71a   :  { %2995 = vmatmul.msk.f32.vlgmr.msrb.gmra.mxu3 %vm135_vm2, %v388_v52 }
 0x79d   :  { %v408_v53 = vpop.f32.mrf.mxu3 }
 0x79e   :  { %v409_v54 = vadd.f32 %v3593_v15, %v408_v53 }
 0x7a0   :  { %v412_v55 = vrot.slane %v409_v54, 2 }
 0x7a2   :  { %434 = vrot.lane.b32.xlu1 %v412_v55, %s3412_s29  ;;  %v414_v56 = vadd.f32 %v412_v55, %v3616_v26 }
 0x7a4   :  { %v2996_v57 = vmul.f32 -1.442695, %v414_v56 }
 0x7a6   :  { %3153 = vpow2.f32 %v2996_v57 }
 0x7aa   :  { %75 = vperm.xlu1 %3127, %v68_v8  }
 0x7ac   :  { %v3154_v58 = vpop.eup %3153 }
 0x7ad   :  { %v418_v59 = vadd.f32 1.0, %v3154_v58 }
 0x7af   :  { %3155 = vrcp.f32 %v418_v59  ;;  %v430_v1 = vand.u32 2147483648, %v418_v59  ;;  %vm424_vm3 = vweird.f32 %v418_v59  ;;  %v428_v2 = vand.u32 2147483647, %v418_v59 }
 0x7b1   :  { %v431_v4 = vor.u32 1.1754944e-38, %v430_v1  ;;  %vm429_vm5 = vcmp.eq.f32.partialorder %v428_v2, 8.507059e+37 }
 0x7b5   :  { %v3156_v60 = vpop.eup %3155 }
 0x7b6   :  { %v420_v61 = vmul.f32 %v3156_v60, %v418_v59  ;;  %vm425_vm1 = vweird.f32 %v3156_v60 }
 0x7b7   :  { %vm426_vm4 = vmor %vm424_vm3, %vm425_vm1 }
 0x7b8   :  { %v421_v62 = vsub.f32 1.0, %v420_v61 }
 0x7ba   :  { %v422_v63 = vmul.f32 %v3156_v60, %v421_v62 }
 0x7bc   :  { %v423_v0 = vadd.f32 %v3156_v60, %v422_v63 }
 0x7be   :  { %v427_v3 = vsel %vm426_vm4, %v3156_v60, %v423_v0 }
 0x7bf   :  { %v432_v6 = vsel %vm429_vm5, %v431_v4, %v427_v3 }
 0x7c0   :  { %v444_v16 = vsub.f32 1.0, %v432_v6  ;;  %v452_v21 = vmul.f32 %v450_v18, %v432_v6 }
 0x814   :  { %v435_v5 = vpop.permute.xlu1 %434 }
 0x815   :  { %v437_v7 = vmul.f32 %v435_v5, %v432_v6 }
 0x817   :  { %439 = vrot.lane.b32.xlu2 %v437_v7, %s3412_s29 }
 0x81c   :  { %v76_v13 = vpop.permute.xlu1 %75 }
 0x81d   :  { %vm78_vm6 = vcmp.eq.s32.totalorder %v76_v13, %v3597_v20 }
 0x81e   :  { %v2983_v14 = vsel %vm78_vm6, 1.0, %v3411_v10 }
 0x81f   :  { %2989 = vmatmul.msk.f32.gmra.mxu1 %vm135_vm2, %v2983_v14 }
 0x871   :  { %v440_v9 = vpop.permute.xlu2 %439 }
 0x872   :  { %v442_v11 = vadd.f32 %v440_v9, %v3616_v26 }
 0x874   :  { %3157 = vtanh.f32 %v442_v11 }
 0x87a   :  { %v3158_v12 = vpop.eup %3157 }
 0x87b   :  { %446 = vrot.lane.b32.xlu0 %v3158_v12, %s3413_s7 }
 0x89c   :  { %v162_v27 = vpop.f32.mrf.mxu1 }
 0x89d   :  { %v3673_v30 = vadd.f32 %v3613_v24, %v162_v27 }
 0x8ed   :  { %v447_v19 = vpop.permute.xlu0 %446 }
 0x8ee   :  { %v449_v22 = vmul.f32 %v447_v19, %v444_v16 }
 0x8f0   :  { %v3665_v23 = vadd.f32 %v452_v21, %v449_v22 }
 0x8f2   :  { %v460_v26 = vrot.slane %v3665_v23, 6 }
 0x8f4   :  { %461 = vrot.lane.b32.xlu2 %v460_v26, %s3413_s7 }
 0x94e   :  { %v462_v25 = vpop.permute.xlu2 %461 }
 0x94f   :  { %2997 = vmatmul.msk.f32.vlgmr.msrb.gmra.mxu1 %vm135_vm2, %v462_v25 }
 0x9cc   :  { %v482_v28 = vpop.f32.mrf.mxu1 }
 0x9cd   :  { %v483_v29 = vadd.f32 %v3593_v15, %v482_v28 }
 0x9cf   :  { %506 = vrot.lane.b32.xlu0 %v483_v29, %s3412_s29  ;;  %v485_v31 = vadd.f32 %v483_v29, %v3673_v30 }
 0x9d1   :  { %v2998_v32 = vmul.f32 -1.442695, %v485_v31 }
 0x9d3   :  { %3159 = vpow2.f32 %v2998_v32 }
 0x9d9   :  { %v3160_v33 = vpop.eup %3159 }
 0x9da   :  { %v489_v34 = vadd.f32 1.0, %v3160_v33 }
 0x9dc   :  { %3161 = vrcp.f32 %v489_v34  ;;  %v501_v40 = vand.u32 2147483648, %v489_v34  ;;  %vm495_vm9 = vweird.f32 %v489_v34  ;;  %v499_v41 = vand.u32 2147483647, %v489_v34 }
 0x9de   :  { %v502_v24 = vor.u32 1.1754944e-38, %v501_v40  ;;  %vm500_vm11 = vcmp.eq.f32.partialorder %v499_v41, 8.507059e+37 }
 0x9e2   :  { %v3162_v35 = vpop.eup %3161 }
 0x9e3   :  { %v491_v36 = vmul.f32 %v3162_v35, %v489_v34  ;;  %vm496_vm8 = vweird.f32 %v3162_v35 }
 0x9e4   :  { %vm497_vm10 = vmor %vm495_vm9, %vm496_vm8 }
 0x9e5   :  { %v492_v37 = vsub.f32 1.0, %v491_v36 }
 0x9e7   :  { %v493_v38 = vmul.f32 %v3162_v35, %v492_v37 }
 0x9e9   :  { %v494_v39 = vadd.f32 %v3162_v35, %v493_v38 }
 0x9eb   :  { %v498_v42 = vsel %vm497_vm10, %v3162_v35, %v494_v39 }
 0x9ec   :  { %v503_v44 = vsel %vm500_vm11, %v502_v24, %v498_v42 }
 0x9ed   :  { %v516_v49 = vsub.f32 1.0, %v503_v44  ;;  %v523_v52 = vmul.f32 %v503_v44, %v460_v26 }
 0xa41   :  { %v507_v43 = vpop.permute.xlu0 %506 }
 0xa42   :  { %v509_v45 = vmul.f32 %v507_v43, %v503_v44 }
 0xa44   :  { %511 = vrot.lane.b32.xlu1 %v509_v45, %s3412_s29 }
 0xab6   :  { %v512_v46 = vpop.permute.xlu1 %511 }
 0xab7   :  { %v514_v47 = vadd.f32 %v512_v46, %v3673_v30 }
 0xab9   :  { %3163 = vtanh.f32 %v514_v47 }
 0xabf   :  { %v3164_v48 = vpop.eup %3163 }
 0xac0   :  { %518 = vrot.lane.b32.xlu2 %v3164_v48, %s3413_s7 }
 0xb1a   :  { %v519_v51 = vpop.permute.xlu2 %518 }
 0xb1b   :  { %v521_v53 = vmul.f32 %v519_v51, %v516_v49 }
 0xb1d   :  { %v524_v54 = vadd.f32 %v523_v52, %v521_v53 }
 0xb1f   :  { %526 = vrot.lane.b32.xlu0 %v524_v54, %s3413_s7  ;;  %v591_v16 = vrot.slane %v524_v54, 6 }
 0xb91   :  { %v527_v55 = vpop.permute.xlu0 %526 }
 0xb92   :  { %529 = vst.msk [vmem:[#allocation2 + $0x8] sm:$0x3] %vm239_vm7, %v527_v55  ;;  %2999 = vmatmul.msk.f32.vlgmr.msra.gmra.mxu2 %vm135_vm2, %v527_v55 }
 0xc15   :  { %v549_v56 = vpop.f32.mrf.mxu2 }
 0xc16   :  { %v550_v57 = vadd.f32 %v3593_v15, %v549_v56 }
 0xc18   :  { %v553_v58 = vrot.slane %v550_v57, 6 }
 0xc1a   :  { %575 = vrot.lane.b32.xlu1 %v553_v58, %s3412_s29  ;;  %v555_v59 = vadd.f32 %v553_v58, %v3673_v30 }
 0xc1c   :  { %v3000_v60 = vmul.f32 -1.442695, %v555_v59  ;;  %v767_v59 = vld [vmem:[%s4527_s10 + $0x8] sm:$0xff] }
 0xc1d   :  { %794 = vmatpush.msrb.mxu2 %v767_v59 }
 0xc1e   :  { %3165 = vpow2.f32 %v3000_v60  ;;  %v766_v60 = vld [vmem:[%s4527_s10] sm:$0xff]  ;;  %s4551_s10 = sld [smem:[#allocation13_spill]] }
 0xc1f   :  { %795 = vmatpush.msrb.mxu2 %v766_v60 }
 0xc24   :  { %v3166_v61 = vpop.eup %3165 }
 0xc25   :  { %v559_v62 = vadd.f32 1.0, %v3166_v61  ;;  %v762_v61 = vld [vmem:[%s4526_s9] sm:$0xff] }
 0xc26   :  { %3007 = vmatmul.msk.f32.vlgmr.msrb.gmra.mxu2 %vm89_vm0, %v762_v61 }
 0xc27   :  { %3167 = vrcp.f32 %v559_v62  ;;  %v571_v4 = vand.u32 2147483648, %v559_v62  ;;  %vm565_vm13 = vweird.f32 %v559_v62  ;;  %v569_v5 = vand.u32 2147483647, %v559_v62 }
 0xc29   :  { %v572_v7 = vor.u32 1.1754944e-38, %v571_v4  ;;  %vm570_vm15 = vcmp.eq.f32.partialorder %v569_v5, 8.507059e+37 }
 0xc2d   :  { %v3168_v63 = vpop.eup %3167 }
 0xc2e   :  { %v561_v0 = vmul.f32 %v3168_v63, %v559_v62  ;;  %vm566_vm12 = vweird.f32 %v3168_v63  ;;  %v763_v62 = vld [vmem:[%s4526_s9 + $0x8] sm:$0xff] }
 0xc2f   :  { %vm567_vm14 = vmor %vm565_vm13, %vm566_vm12  ;;  %3008 = vmatmul.msk.f32.gmra.mxu2 %vm89_vm0, %v763_v62 }
 0xc30   :  { %v562_v1 = vsub.f32 1.0, %v561_v0 }
 0xc32   :  { %v563_v2 = vmul.f32 %v3168_v63, %v562_v1 }
 0xc34   :  { %v564_v3 = vadd.f32 %v3168_v63, %v563_v2  ;;  %v764_v2 = vld [vmem:[%s4526_s9 + $0x10] sm:$0xff] }
 0xc36   :  { %v568_v6 = vsel %vm567_vm14, %v3168_v63, %v564_v3  ;;  %v765_v3 = vld [vmem:[%s4526_s9 + $0x18] sm:$0xff]  ;;  %s2935_s9 = sshll.u32 %s3418_s26, 4  ;;  %s2936_s9 = int_to_ptr.vmem [resolvable:$true] %s2935_s9 }
 0xc37   :  { %v573_v9 = vsel %vm570_vm15, %v572_v7, %v568_v6  ;;  %3009 = vmatmul.msk.f32.gmra.mxu2 %vm89_vm0, %v764_v2 }
 0xc38   :  { %v585_v18 = vsub.f32 1.0, %v573_v9  ;;  %v593_v22 = vmul.f32 %v591_v16, %v573_v9 }
 0xc3f   :  { %3010 = vmatmul.msk.f32.gmra.mxu2 %vm89_vm0, %v765_v3 }
 0xc8c   :  { %v576_v8 = vpop.permute.xlu1 %575 }
 0xc8d   :  { %v578_v11 = vmul.f32 %v576_v8, %v573_v9 }
 0xc8f   :  { %580 = vrot.lane.b32.xlu2 %v578_v11, %s3412_s29 }
 0xce9   :  { %v581_v12 = vpop.permute.xlu2 %580 }
 0xcea   :  { %v583_v13 = vadd.f32 %v581_v12, %v3673_v30 }
 0xcec   :  { %3169 = vtanh.f32 %v583_v13 }
 0xcf2   :  { %v3170_v14 = vpop.eup %3169 }
 0xcf3   :  { %587 = vrot.lane.b32.xlu0 %v3170_v14, %s3413_s7 }
 0xd65   :  { %v588_v19 = vpop.permute.xlu0 %587 }
 0xd66   :  { %v590_v21 = vmul.f32 %v588_v19, %v585_v18 }
 0xd68   :  { %v3688_v26 = vadd.f32 %v593_v22, %v590_v21 }
 0xd6a   :  { %v600_v25 = vrot.slane %v3688_v26, 2  ;;  %v664_v52 = vrot.slane %v3688_v26, 6 }
 0xd6c   :  { %601 = vrot.lane.b32.xlu1 %v600_v25, %s3413_s7  ;;  %v748_v25 = vld [vmem:[%s4550_s4] sm:$0xff] }
 0xdde   :  { %v602_v27 = vpop.permute.xlu1 %601 }
 0xddf   :  { %3001 = vmatmul.msk.f32.vlgmr.msra.gmra.mxu3 %vm135_vm2, %v602_v27  ;;  %v797_v27 = vpop.f32.mrf.mxu2 }
 0xe62   :  { %v622_v28 = vpop.f32.mrf.mxu3 }
 0xe63   :  { %v623_v29 = vadd.f32 %v3593_v15, %v622_v28  ;;  %v800_v28 = vpop.f32.mrf.mxu2 }
 0xe65   :  { %v626_v31 = vrot.slane %v623_v29, 4 }
 0xe67   :  { %648 = vrot.lane.b32.xlu2 %v626_v31, %s3412_s29  ;;  %v628_v32 = vadd.f32 %v626_v31, %v3673_v30 }
 0xe69   :  { %v3002_v33 = vmul.f32 -1.442695, %v628_v32 }
 0xe6b   :  { %3171 = vpow2.f32 %v3002_v33  ;;  %v803_v29 = vpop.f32.mrf.mxu2 }
 0xe71   :  { %v3172_v34 = vpop.eup %3171 }
 0xe72   :  { %v632_v35 = vadd.f32 1.0, %v3172_v34 }
 0xe73   :  { %v806_v31 = vpop.f32.mrf.mxu2 }
 0xe74   :  { %3173 = vrcp.f32 %v632_v35  ;;  %v644_v41 = vand.u32 2147483648, %v632_v35  ;;  %vm638_vm3 = vweird.f32 %v632_v35  ;;  %v642_v42 = vand.u32 2147483647, %v632_v35  ;;  %831 = vmatpush.msrb.mxu3 %v806_v31  ;;  %v3856_v31 = vld [vmem:[%s4531_s14 + $0x20] sm:$0xff] }
 0xe76   :  { %v645_v43 = vor.u32 1.1754944e-38, %v644_v41  ;;  %vm643_vm5 = vcmp.eq.f32.partialorder %v642_v42, 8.507059e+37  ;;  %832 = vmatpush.msrb.mxu3 %v803_v29  ;;  %v3850_v29 = vld [vmem:[%s4531_s14 + $0x28] sm:$0xff] }
 0xe78   :  { %833 = vmatpush.msrb.mxu3 %v800_v28 }
 0xe7a   :  { %v3174_v36 = vpop.eup %3173  ;;  %834 = vmatpush.msrb.mxu3 %v797_v27  ;;  %v3841_v27 = vld [vmem:[%s4531_s14 + $0x30] sm:$0xff] }
 0xe7b   :  { %v634_v37 = vmul.f32 %v3174_v36, %v632_v35  ;;  %vm639_vm1 = vweird.f32 %v3174_v36 }
 0xe7c   :  { %vm640_vm4 = vmor %vm638_vm3, %vm639_vm1  ;;  %vm310_vm1 = vcmask 257026   ;;  %vm384_vm3 = vcmask 259076  }
 0xe7d   :  { %v635_v38 = vsub.f32 1.0, %v634_v37 }
 0xe7f   :  { %v636_v39 = vmul.f32 %v3174_v36, %v635_v38 }
 0xe81   :  { %v637_v40 = vadd.f32 %v3174_v36, %v636_v39 }
 0xe83   :  { %v641_v24 = vsel %vm640_vm4, %v3174_v36, %v637_v40  ;;  %vm458_vm4 = vcmask 261126  }
 0xe84   :  { %v646_v45 = vsel %vm643_vm5, %v645_v43, %v641_v24  ;;  %v3749_v24 = vld [vmem:[%s4528_s11 + $0x18] sm:$0xff]  ;;  %v3754_v43 = vld [vmem:[%s4528_s11 + $0x10] sm:$0xff]  ;;  %vm984_vm5 = vcmask 58368  }
 0xe85   :  { %v658_v51 = vsub.f32 1.0, %v646_v45  ;;  %v666_v54 = vmul.f32 %v664_v52, %v646_v45  ;;  %881 = vmatpush.msrb.mxu0 %v3749_v24 }
 0xe87   :  { %882 = vmatpush.msrb.mxu0 %v3754_v43 }
 0xec1   :  { %v649_v44 = vpop.permute.xlu2 %648 }
 0xec2   :  { %v651_v46 = vmul.f32 %v649_v44, %v646_v45  ;;  %v3760_v44 = vld [vmem:[%s4528_s11 + $0x8] sm:$0xff]  ;;  %v3766_v45 = vld [vmem:[%s4528_s11] sm:$0xff] }
 0xec3   :  { %883 = vmatpush.msrb.mxu0 %v3760_v44 }
 0xec4   :  { %653 = vrot.lane.b32.xlu0 %v651_v46, %s3412_s29 }
 0xec5   :  { %884 = vmatpush.msrb.mxu0 %v3766_v45 }
 0xf36   :  { %v654_v47 = vpop.permute.xlu0 %653 }
 0xf37   :  { %v656_v48 = vadd.f32 %v654_v47, %v3673_v30  ;;  %v3774_v47 = vld [vmem:[%s4530_s13] ss:$0 sm:$0xff] }
 0xf39   :  { %3175 = vtanh.f32 %v656_v48 }
 0xf3f   :  { %v3176_v49 = vpop.eup %3175 }
 0xf40   :  { %660 = vrot.lane.b32.xlu1 %v3176_v49, %s3413_s7 }
 0xfb2   :  { %v661_v53 = vpop.permute.xlu1 %660 }
 0xfb3   :  { %v663_v55 = vmul.f32 %v661_v53, %v658_v51  ;;  %v3785_v51 = vld [vmem:[%s4529_s12] ss:$0 sm:$0xff]  ;;  %s3416_s12 = smov 2  }
 0xfb5   :  { %v3700_v56 = vadd.f32 %v666_v54, %v663_v55 }
 0xfb7   :  { %v673_v57 = vrot.slane %v3700_v56, 4  ;;  %v737_v38 = vrot.slane %v3700_v56, 6 }
 0xfb9   :  { %674 = vrot.lane.b32.xlu2 %v673_v57, %s3413_s7 }
0x1013   :  { %v675_v58 = vpop.permute.xlu2 %674 }
0x1014   :  { %3003 = vmatmul.msk.f32.vlgmr.msra.gmra.mxu1 %vm135_vm2, %v675_v58 }
0x1091   :  { %v695_v63 = vpop.f32.mrf.mxu1 }
0x1092   :  { %v696_v0 = vadd.f32 %v3593_v15, %v695_v63 }
0x1094   :  { %v699_v1 = vrot.slane %v696_v0, 2 }
0x1096   :  { %721 = vrot.lane.b32.xlu0 %v699_v1, %s3412_s29  ;;  %v701_v4 = vadd.f32 %v699_v1, %v3673_v30 }
0x1098   :  { %v3004_v5 = vmul.f32 -1.442695, %v701_v4 }
0x109a   :  { %3177 = vpow2.f32 %v3004_v5 }
0x10a0   :  { %v3178_v15 = vpop.eup %3177 }
0x10a1   :  { %v705_v6 = vadd.f32 1.0, %v3178_v15 }
0x10a3   :  { %3179 = vrcp.f32 %v705_v6  ;;  %v717_v13 = vand.u32 2147483648, %v705_v6  ;;  %vm711_vm8 = vweird.f32 %v705_v6  ;;  %v715_v14 = vand.u32 2147483647, %v705_v6 }
0x10a5   :  { %v718_v18 = vor.u32 1.1754944e-38, %v717_v13  ;;  %vm716_vm10 = vcmp.eq.f32.partialorder %v715_v14, 8.507059e+37 }
0x10a9   :  { %v3180_v7 = vpop.eup %3179 }
0x10aa   :  { %v707_v8 = vmul.f32 %v3180_v7, %v705_v6  ;;  %vm712_vm6 = vweird.f32 %v3180_v7 }
0x10ab   :  { %vm713_vm9 = vmor %vm711_vm8, %vm712_vm6 }
0x10ac   :  { %v708_v9 = vsub.f32 1.0, %v707_v8 }
0x10ae   :  { %v709_v11 = vmul.f32 %v3180_v7, %v708_v9 }
0x10b0   :  { %v710_v12 = vadd.f32 %v3180_v7, %v709_v11 }
0x10b2   :  { %v714_v16 = vsel %vm713_vm9, %v3180_v7, %v710_v12 }
0x10b3   :  { %v719_v21 = vsel %vm716_vm10, %v718_v18, %v714_v16 }
0x10b4   :  { %v731_v37 = vsub.f32 1.0, %v719_v21  ;;  %v739_v40 = vmul.f32 %v737_v38, %v719_v21 }
0x1108   :  { %v722_v19 = vpop.permute.xlu0 %721 }
0x1109   :  { %v724_v22 = vmul.f32 %v722_v19, %v719_v21  ;;  %v3823_v21 = vld [vmem:[%s4551_s10 + $0x8] sm:$0xff] }
0x110a   :  { %978 = vmatpush.msra.mxu0 %v3823_v21  ;;  %1246 = vmatpush.msra.mxu2 %v3823_v21 }
0x110b   :  { %726 = vrot.lane.b32.xlu1 %v724_v22, %s3412_s29  ;;  %v3828_v22 = vld [vmem:[%s4551_s10] sm:$0xff] }
0x110c   :  { %979 = vmatpush.msra.mxu0 %v3828_v22  ;;  %1247 = vmatpush.msra.mxu2 %v3828_v22 }
0x1113   :  { %751 = vperm.xlu1 %3127, %v748_v25   ;;  %v3834_v25 = vld [vmem:[%s4531_s14 + $0x38] sm:$0xff] }
0x117d   :  { %v727_v32 = vpop.permute.xlu1 %726 }
0x117e   :  { %v729_v33 = vadd.f32 %v727_v32, %v3673_v30  ;;  %v3862_v32 = vld [vmem:[%s4552_s22] sm:$0x3] }
0x1180   :  { %3181 = vtanh.f32 %v729_v33 }
0x1185   :  { %v752_v34 = vpop.permute.xlu1 %751 }
0x1186   :  { %v3182_v35 = vpop.eup %3181  ;;  %vm756_vm11 = vcmp.eq.s32.totalorder %v752_v34, %v3597_v20 }
0x1187   :  { %v3005_v36 = vsel %vm756_vm11, 1.0, %v3411_v10  ;;  %733 = vrot.lane.b32.xlu2 %v3182_v35, %s3413_s7  ;;  %v749_v35 = vld [vmem:[%s4550_s4 + $0x8] sm:$0xff] }
0x1188   :  { %3011 = vmatmul.msk.f32.vlgmr.msrb.gmra.mxu3 %vm135_vm2, %v3005_v36 }
0x11e1   :  { %v734_v39 = vpop.permute.xlu2 %733 }
0x11e2   :  { %v736_v41 = vmul.f32 %v734_v39, %v731_v37 }
0x11e4   :  { %v3740_v42 = vadd.f32 %v739_v40, %v736_v41 }
0x11e6   :  { %v864_v30 = vrot.slane %v3740_v42, 6 }
0x11e8   :  { %865 = vrot.lane.b32.xlu0 %v864_v30, %s3413_s7 }
0x120b   :  { %v836_v52 = vpop.f32.mrf.mxu3 }
0x120c   :  { %v3788_v53 = vadd.f32 %v3785_v51, %v836_v52 }
0x125a   :  { %v866_v46 = vpop.permute.xlu0 %865 }
0x125b   :  { %3013 = vmatmul.msk.f32.vlgmr.msrb.gmra.mxu0 %vm135_vm2, %v866_v46 }
0x125c   :  { %1062 = vmatpush.msrb.mxu0 %v3834_v25 }
0x125e   :  { %1063 = vmatpush.msrb.mxu0 %v3841_v27 }
0x1260   :  { %1064 = vmatpush.msrb.mxu0 %v3850_v29 }
0x1262   :  { %1065 = vmatpush.msrb.mxu0 %v3856_v31 }
0x12d8   :  { %v886_v48 = vpop.f32.mrf.mxu0 }
0x12d9   :  { %v887_v49 = vadd.f32 %v3774_v47, %v886_v48 }
0x12db   :  { %910 = vrot.lane.b32.xlu2 %v887_v49, %s3412_s29  ;;  %v889_v54 = vadd.f32 %v887_v49, %v3788_v53 }
0x12dd   :  { %v3014_v55 = vmul.f32 -1.442695, %v889_v54 }
0x12df   :  { %3183 = vpow2.f32 %v3014_v55 }
0x12e3   :  { %596 = vrot.lane.b32.xlu2 %v3688_v26, %s3413_s7 }
0x12e5   :  { %v3184_v57 = vpop.eup %3183 }
0x12e6   :  { %v893_v58 = vadd.f32 1.0, %v3184_v57 }
0x12e8   :  { %3185 = vrcp.f32 %v893_v58  ;;  %v905_v62 = vand.u32 2147483648, %v893_v58  ;;  %vm899_vm13 = vweird.f32 %v893_v58  ;;  %v903_v63 = vand.u32 2147483647, %v893_v58 }
0x12ea   :  { %v906_v1 = vor.u32 1.1754944e-38, %v905_v62  ;;  %vm904_vm15 = vcmp.eq.f32.partialorder %v903_v63, 8.507059e+37 }
0x12eb   :  { %307 = vrot.lane.b32.xlu2 %v3635_v17, %s3413_s7 }
0x12ee   :  { %v3186_v26 = vpop.eup %3185 }
0x12ef   :  { %v895_v59 = vmul.f32 %v3186_v26, %v893_v58  ;;  %vm900_vm12 = vweird.f32 %v3186_v26 }
0x12f0   :  { %vm901_vm14 = vmor %vm899_vm13, %vm900_vm12  ;;  %vm996_vm12 = vcmask 64512  }
0x12f1   :  { %v896_v60 = vsub.f32 1.0, %v895_v59 }
0x12f3   :  { %v897_v17 = vmul.f32 %v3186_v26, %v896_v60 }
0x12f5   :  { %v898_v61 = vadd.f32 %v3186_v26, %v897_v17 }
0x12f7   :  { %v902_v0 = vsel %vm901_vm14, %v3186_v26, %v898_v61 }
0x12f8   :  { %v907_v3 = vsel %vm904_vm15, %v906_v1, %v902_v0 }
0x12f9   :  { %v927_v12 = vmul.f32 %v907_v3, %v864_v30 }
0x1335   :  { %v911_v2 = vpop.permute.xlu2 %910 }
0x1336   :  { %v913_v4 = vmul.f32 %v911_v2, %v907_v3 }
0x1338   :  { %915 = vrot.lane.b32.xlu0 %v913_v4, %s3412_s29 }
0x133d   :  { %v597_v5 = vpop.permute.xlu2 %596 }
0x133e   :  { %599 = vst.msk [vmem:[#allocation2 + $0x8] sm:$0xc] %vm310_vm1, %v597_v5 }
0x1340   :  { %669 = vrot.lane.b32.xlu0 %v3700_v56, %s3413_s7  ;;  %v920_v56 = vsub.f32 1.0, %v907_v3 }
0x1345   :  { %v308_v15 = vpop.permute.xlu2 %307 }
0x1346   :  { %311 = vst.msk [vmem:[#allocation2] sm:$0xc] %vm310_vm1, %v308_v15 }
0x1348   :  { %381 = vrot.lane.b32.xlu0 %v3647_v50, %s3413_s7 }
0x13aa   :  { %v916_v6 = vpop.permute.xlu0 %915 }
0x13ab   :  { %v918_v7 = vadd.f32 %v916_v6, %v3788_v53 }
0x13ad   :  { %3187 = vtanh.f32 %v918_v7 }
0x13b2   :  { %v670_v8 = vpop.permute.xlu0 %669 }
0x13b3   :  { %v3188_v9 = vpop.eup %3187  ;;  %672 = vst.msk [vmem:[#allocation2 + $0x8] sm:$0x30] %vm384_vm3, %v670_v8  ;;  %v3902_v8 = vld [vmem:[%s4531_s14 + $0x18] sm:$0xff] }
0x13b4   :  { %922 = vrot.lane.b32.xlu1 %v3188_v9, %s3413_s7  ;;  %1345 = vmatpush.msrb.mxu2 %v3902_v8  ;;  %v3909_v9 = vld [vmem:[%s4531_s14 + $0x10] sm:$0xff] }
0x13b6   :  { %1346 = vmatpush.msrb.mxu2 %v3909_v9 }
0x13ba   :  { %v382_v11 = vpop.permute.xlu0 %381 }
0x13bb   :  { %385 = vst.msk [vmem:[#allocation2] sm:$0x30] %vm384_vm3, %v382_v11  ;;  %v3916_v11 = vld [vmem:[%s4531_s14 + $0x8] sm:$0xff] }
0x13bc   :  { %742 = vrot.lane.b32.xlu1 %v3740_v42, %s3413_s7  ;;  %1347 = vmatpush.msrb.mxu2 %v3916_v11 }
0x13c4   :  { %455 = vrot.lane.b32.xlu1 %v3665_v23, %s3413_s7 }
0x1426   :  { %v923_v50 = vpop.permute.xlu1 %922 }
0x1427   :  { %v925_v13 = vmul.f32 %v923_v50, %v920_v56  ;;  %v3923_v56 = vld [vmem:[%s4531_s14] sm:$0xff] }
0x1428   :  { %1348 = vmatpush.msrb.mxu2 %v3923_v56 }
0x1429   :  { %v3804_v14 = vadd.f32 %v927_v12, %v925_v13 }
0x142b   :  { %930 = vrot.lane.b32.xlu2 %v3804_v14, %s3413_s7  ;;  %v1198_v60 = vrot.slane %v3804_v14, 6 }
0x142e   :  { %v743_v16 = vpop.permute.xlu1 %742 }
0x142f   :  { %745 = vst.msk [vmem:[#allocation2 + $0x8] sm:$0xc0] %vm458_vm4, %v743_v16 }
0x1433   :  { %754 = vperm.xlu2 %3128, %v749_v35  }
0x1436   :  { %v3809_v18 = vld [vmem:[#allocation2 + $0x8] sm:$0xff]  ;;  %v456_v19 = vpop.permute.xlu1 %455 }
0x1437   :  { %459 = vst.msk [vmem:[#allocation2] sm:$0xc0] %vm458_vm4, %v456_v19  ;;  %3015 = vmatpush.xpose.msk.msrb.mxu1 %vm135_vm2, %v3809_v18  ;;  %1044 = vmatpush.msra.mxu3 %v3809_v18 }
0x143e   :  { %v3815_v23 = vld [vmem:[#allocation2] sm:$0xff] }
0x143f   :  { %3016 = vmatpush.xpose.msk.msrb.mxu1 %vm135_vm2, %v3815_v23  ;;  %1045 = vmatpush.msra.mxu3 %v3815_v23 }
0x1443   :  { %3019 = vmatpush.xpose.msk.msra.mxu1 %vm996_vm12, %v3823_v21 }
0x1447   :  { %3020 = vmatpush.xpose.msk.msra.mxu1 %vm996_vm12, %v3828_v22 }
0x1485   :  { %v931_v28 = vpop.permute.xlu2 %930 }
0x1486   :  { %3017 = vmatmul.msk.f32.vlgmr.msrb.gmra.mxu1 %vm135_vm2, %v931_v28 }
0x1487   :  { %1085 = vmatpush.msrb.mxu1 %v3902_v8 }
0x1489   :  { %1086 = vmatpush.msrb.mxu1 %v3909_v9 }
0x148b   :  { %1087 = vmatpush.msrb.mxu1 %v3916_v11 }
0x148d   :  { %v755_v63 = vpop.permute.xlu2 %754  ;;  %1088 = vmatpush.msrb.mxu1 %v3923_v56 }
0x148e   :  { %vm757_vm11 = vcmp.eq.s32.totalorder %v755_v63, %v3597_v20 }
0x148f   :  { %v3006_v0 = vsel %vm757_vm11, 1.0, %v3411_v10 }
0x1490   :  { %3012 = vmatmul.msk.f32.gmra.mxu3 %vm135_vm2, %v3006_v0 }
0x1503   :  { %v957_v33 = vpop.f32.mrf.mxu1 }
0x1504   :  { %v960_v34 = vmul.f32 %v957_v33, %v3862_v32 }
0x1506   :  { %3018 = vmatmul.msk.f32.vlgmr.msra.gmra.mxu0 %vm89_vm0, %v960_v34 }
0x1507   :  { %1151 = vmatpush.msra.mxu0 %v3749_v24 }
0x1509   :  { %1152 = vmatpush.msra.mxu0 %v3754_v43 }
0x150b   :  { %1153 = vmatpush.msra.mxu0 %v3760_v44 }
0x150d   :  { %1154 = vmatpush.msra.mxu0 %v3766_v45 }
0x150e   :  { %3023 = vmatmul.msk.f32.vlgmr.msrb.gmra.mxu0 %vm135_vm2, %v931_v28 }
0x150f   :  { %1304 = vmatpush.msrb.mxu0 %v3809_v18 }
0x1511   :  { %1305 = vmatpush.msrb.mxu0 %v3815_v23 }
0x1516   :  { %3026 = vmatmul.msk.f32.vlgmr.msra.gmra.mxu0 %vm135_vm2, %v931_v28 }
0x1517   :  { %1407 = vmatpush.msra.mxu0 %v3749_v24 }
0x1519   :  { %1408 = vmatpush.msra.mxu0 %v3754_v43 }
0x151b   :  { %1409 = vmatpush.msra.mxu0 %v3760_v44 }
0x151d   :  { %1410 = vmatpush.msra.mxu0 %v3766_v45 }
0x1583   :  { %v981_v36 = vpop.f32.mrf.mxu0 }
0x1584   :  { %v985_v37 = vsel %vm984_vm5, %v981_v36, -inf }
0x1585   :  { %986 = vmax.xlane.f32.xlu0 %v985_v37 }
0x158b   :  { %v3882_v38 = vpop.f32.mrf.mxu0 }
0x1593   :  { %v1156_v39 = vpop.f32.mrf.mxu0 }
0x1594   :  { %v1157_v40 = vadd.f32 %v3774_v47, %v1156_v39 }
0x1596   :  { %v1160_v41 = vrot.slane %v1157_v40, 6  ;;  %v3959_v40 = vld [vmem:[%s4533_s16 + $0x18] sm:$0xff] }
0x1597   :  { %1116 = vmatpush.msrb.mxu3 %v3959_v40 }
0x1598   :  { %v1162_v42 = vadd.f32 %v1160_v41, %v3788_v53  ;;  %1182 = vrot.lane.b32.xlu2 %v1160_v41, %s3412_s29  ;;  %v3964_v41 = vld [vmem:[%s4533_s16 + $0x10] sm:$0xff] }
0x1599   :  { %1117 = vmatpush.msrb.mxu3 %v3964_v41 }
0x159a   :  { %v3027_v30 = vmul.f32 -1.442695, %v1162_v42  ;;  %v3971_v42 = vld [vmem:[%s4533_s16 + $0x8] sm:$0xff] }
0x159b   :  { %1118 = vmatpush.msrb.mxu3 %v3971_v42 }
0x159c   :  { %3189 = vpow2.f32 %v3027_v30  ;;  %v3976_v30 = vld [vmem:[%s4533_s16] sm:$0xff] }
0x159d   :  { %1119 = vmatpush.msrb.mxu3 %v3976_v30 }
0x15a2   :  { %v3190_v46 = vpop.eup %3189 }
0x15a3   :  { %v1166_v48 = vadd.f32 1.0, %v3190_v46  ;;  %v3987_v46 = vld [vmem:[%s4532_s15] ss:$0 sm:$0xff] }
0x15a5   :  { %3191 = vrcp.f32 %v1166_v48  ;;  %v1178_v55 = vand.u32 2147483648, %v1166_v48  ;;  %v1176_v58 = vand.u32 2147483647, %v1166_v48  ;;  %vm1172_vm8 = vweird.f32 %v1166_v48 }
0x15a7   :  { %v1179_v59 = vor.u32 1.1754944e-38, %v1178_v55  ;;  %vm1177_vm10 = vcmp.eq.f32.partialorder %v1176_v58, 8.507059e+37 }
0x15ab   :  { %v3192_v49 = vpop.eup %3191 }
0x15ac   :  { %v1168_v52 = vmul.f32 %v3192_v49, %v1166_v48  ;;  %vm1173_vm6 = vweird.f32 %v3192_v49 }
0x15ad   :  { %vm1174_vm9 = vmor %vm1172_vm8, %vm1173_vm6 }
0x15ae   :  { %v1169_v54 = vsub.f32 1.0, %v1168_v52 }
0x15b0   :  { %v1170_v57 = vmul.f32 %v3192_v49, %v1169_v54 }
0x15b2   :  { %v1171_v26 = vadd.f32 %v3192_v49, %v1170_v57 }
0x15b4   :  { %v1175_v17 = vsel %vm1174_vm9, %v3192_v49, %v1171_v26 }
0x15b5   :  { %v1180_v61 = vsel %vm1177_vm10, %v1179_v59, %v1175_v17 }
0x15b6   :  { %v1200_v62 = vmul.f32 %v1198_v60, %v1180_v61  ;;  %v1192_v14 = vsub.f32 1.0, %v1180_v61 }
0x15f2   :  { %v1183_v1 = vpop.permute.xlu2 %1182 }
0x15f3   :  { %v1185_v2 = vmul.f32 %v1183_v1, %v1180_v61 }
0x15f5   :  { %1187 = vrot.lane.b32.xlu2 %v1185_v2, %s3412_s29 }
0x15f8   :  { %v987_v3 = vpop.xlane.xlu0 %986 }
0x15f9   :  { %v988_v4 = vsub.f32 %v981_v36, %v987_v3  ;;  %v3939_v36 = vpop.f32.mrf.mxu3 }
0x15fb   :  { %v989_v5 = vmul.f32 1.442695, %v988_v4 }
0x15fd   :  { %3193 = vpow2.f32 %v989_v5 }
0x1603   :  { %v3194_v15 = vpop.eup %3193 }
0x1604   :  { %v991_v6 = vsel %vm984_vm5, %v3194_v15, 0.0 }
0x1605   :  { %992 = vadd.xlane.f32.xlu1 %v991_v6 }
0x164f   :  { %v1188_v10 = vpop.permute.xlu2 %1187 }
0x1650   :  { %v1190_v20 = vadd.f32 %v1188_v10, %v3788_v53 }
0x1652   :  { %3195 = vtanh.f32 %v1190_v20 }
0x1658   :  { %v3196_v7 = vpop.eup %3195 }
0x1659   :  { %1194 = vrot.lane.b32.xlu2 %v3196_v7, %s3413_s7 }
0x1678   :  { %v993_v50 = vpop.xlane.xlu1 %992 }
0x1679   :  { %3197 = vrcp.f32 %v993_v50 }
0x167f   :  { %v3198_v12 = vpop.eup %3197 }
0x1680   :  { %v995_v13 = vmul.f32 %v3198_v12, %v3194_v15 }
0x1682   :  { %1138 = vst.msk [vmem:[#allocation5] sm:$0x3] %vm984_vm5, %v995_v13  ;;  %3021 = vmatmul.msk.f32.vlgmr.msra.gmra.mxu1 %vm996_vm12, %v995_v13 }
0x1683   :  { %3028 = vmatpush.xpose.msk.msra.mxu1 %vm135_vm2, %v3809_v18 }
0x1687   :  { %3029 = vmatpush.xpose.msk.msra.mxu1 %vm135_vm2, %v3815_v23 }
0x16b3   :  { %v1195_v16 = vpop.permute.xlu2 %1194 }
0x16b4   :  { %v1197_v19 = vmul.f32 %v1195_v16, %v1192_v14 }
0x16b6   :  { %v3933_v28 = vadd.f32 %v1200_v62, %v1197_v19 }
0x16b8   :  { %v1203_v33 = vrot.slane %v3933_v28, 2 }
0x16ba   :  { %1204 = vrot.lane.b32.xlu2 %v1203_v33, %s3413_s7 }
0x16ff   :  { %v1023_v34 = vpop.f32.mrf.mxu1 }
0x1700   :  { %v1026_v35 = vmul.f32 %v1023_v34, %v3862_v32 }
0x1702   :  { %3022 = vmatmul.msk.f32.vlgmr.msra.gmra.mxu3 %vm89_vm0, %v1026_v35 }
0x1703   :  { %3032 = vmatpush.xpose.msk.msra.mxu3 %vm996_vm12, %v3823_v21 }
0x1707   :  { %3033 = vmatpush.xpose.msk.msra.mxu3 %vm996_vm12, %v3828_v22 }
0x1714   :  { %v1205_v39 = vpop.permute.xlu2 %1204 }
0x1785   :  { %v1047_v37 = vpop.f32.mrf.mxu3 }
0x1786   :  { %3024 = vmatmul.msk.f32.vlgmr.msrb.gmra.mxu1 %vm135_vm2, %v1047_v37 }
0x1787   :  { %1322 = vmatpush.msrb.mxu1 %v3834_v25 }
0x1789   :  { %1323 = vmatpush.msrb.mxu1 %v3841_v27 }
0x178b   :  { %1324 = vmatpush.msrb.mxu1 %v3850_v29 }
0x178d   :  { %1325 = vmatpush.msrb.mxu1 %v3856_v31 }
0x178e   :  { %3030 = vmatmul.msk.f32.vlgmr.msra.gmra.mxu1 %vm135_vm2, %v1205_v39 }
0x178f   :  { %3041 = vmatpush.xpose.msk.msra.mxu1 %vm135_vm2, %v3809_v18 }
0x1793   :  { %3042 = vmatpush.xpose.msk.msra.mxu1 %vm135_vm2, %v3815_v23 }
0x1796   :  { %3036 = vmatmul.msk.f32.vlgmr.msrb.gmra.mxu1 %vm135_vm2, %v1205_v39 }
0x1797   :  { %1578 = vmatpush.msrb.mxu1 %v3834_v25 }
0x1799   :  { %1579 = vmatpush.msrb.mxu1 %v3841_v27 }
0x179b   :  { %1580 = vmatpush.msrb.mxu1 %v3850_v29 }
0x179d   :  { %1581 = vmatpush.msrb.mxu1 %v3856_v31 }
0x1803   :  { %v1090_v48 = vpop.f32.mrf.mxu1 }
0x1804   :  { %v1091_v49 = vadd.f32 %v1090_v48, %v3882_v38 }
0x1806   :  { %v1096_v52 = vadd.f32 %v3987_v46, %v1091_v49 }
0x1808   :  { %3199 = vtanh.f32 %v1096_v52 }
0x180b   :  { %v1225_v54 = vpop.f32.mrf.mxu1 }
0x180c   :  { %v1228_v55 = vmul.f32 %v1225_v54, %v3862_v32 }
0x180e   :  { %v3200_v57 = vpop.eup %3199  ;;  %3031 = vmatmul.msk.f32.vlgmr.msra.gmra.mxu2 %vm89_vm0, %v1228_v55 }
0x180f   :  { %3025 = vmatmul.msk.f32.vlgmr.msrb.gmra.mxu3 %vm135_vm2, %v3200_v57  ;;  %1502 = vmatpush.msra.mxu2 %v3823_v21 }
0x1810   :  { %1370 = vmatpush.msrb.mxu3 %v3959_v40 }
0x1811   :  { %1503 = vmatpush.msra.mxu2 %v3828_v22 }
0x1812   :  { %1371 = vmatpush.msrb.mxu3 %v3964_v41 }
0x1813   :  { %v1327_v52 = vpop.f32.mrf.mxu1 }
0x1814   :  { %1372 = vmatpush.msrb.mxu3 %v3971_v42 }
0x1816   :  { %1373 = vmatpush.msrb.mxu3 %v3976_v30 }
0x1891   :  { %v1249_v38 = vpop.f32.mrf.mxu2 }
0x1892   :  { %v1252_v58 = vsel %vm984_vm5, %v1249_v38, -inf  ;;  %v4008_v1 = vpop.f32.mrf.mxu3 }
0x1893   :  { %1253 = vmax.xlane.f32.xlu2 %v1252_v58 }
0x1906   :  { %v1254_v26 = vpop.xlane.xlu2 %1253 }
0x1907   :  { %v1255_v59 = vsub.f32 %v1249_v38, %v1254_v26 }
0x1909   :  { %v1256_v60 = vmul.f32 1.442695, %v1255_v59 }
0x190b   :  { %3201 = vpow2.f32 %v1256_v60  ;;  %v1454_v60 = vrot.slane %v3933_v28, 6 }
0x1911   :  { %v3202_v17 = vpop.eup %3201 }
0x1912   :  { %v1258_v61 = vsel %vm984_vm5, %v3202_v17, 0.0 }
0x1913   :  { %1259 = vadd.xlane.f32.xlu0 %v1258_v61 }
0x1986   :  { %v1260_v62 = vpop.xlane.xlu0 %1259 }
0x1987   :  { %3203 = vrcp.f32 %v1260_v62 }
0x198d   :  { %v3204_v63 = vpop.eup %3203 }
0x198e   :  { %v1262_v0 = vmul.f32 %v3204_v63, %v3202_v17 }
0x1990   :  { %1394 = vst.msk [vmem:[#allocation5 + $0x2] sm:$0x3] %vm984_vm5, %v1262_v0  ;;  %3034 = vmatmul.msk.f32.vlgmr.msra.gmra.mxu3 %vm996_vm12, %v1262_v0 }
0x1991   :  { %3045 = vmatpush.xpose.msk.msra.mxu3 %vm996_vm12, %v3823_v21 }
0x1995   :  { %3046 = vmatpush.xpose.msk.msra.mxu3 %vm996_vm12, %v3828_v22 }
0x1a13   :  { %v1283_v2 = vpop.f32.mrf.mxu3 }
0x1a14   :  { %v1286_v3 = vmul.f32 %v1283_v2, %v3862_v32 }
0x1a16   :  { %3035 = vmatmul.msk.f32.vlgmr.msrb.gmra.mxu0 %vm89_vm0, %v1286_v3 }
0x1a17   :  { %1560 = vmatpush.msrb.mxu0 %v3809_v18 }
0x1a19   :  { %1561 = vmatpush.msrb.mxu0 %v3815_v23 }
0x1a1e   :  { %3039 = vmatmul.msk.f32.vlgmr.msra.gmra.mxu0 %vm135_vm2, %v1205_v39 }
0x1a1f   :  { %1663 = vmatpush.msra.mxu0 %v3749_v24 }
0x1a21   :  { %1664 = vmatpush.msra.mxu0 %v3754_v43 }
0x1a23   :  { %1665 = vmatpush.msra.mxu0 %v3760_v44 }
0x1a25   :  { %1666 = vmatpush.msra.mxu0 %v3766_v45 }
0x1a93   :  { %v1307_v4 = vpop.f32.mrf.mxu0 }
0x1a94   :  { %3037 = vmatmul.msk.f32.vlgmr.msrb.gmra.mxu2 %vm135_vm2, %v1307_v4 }
0x1a95   :  { %1601 = vmatpush.msrb.mxu2 %v3902_v8 }
0x1a97   :  { %1602 = vmatpush.msrb.mxu2 %v3909_v9 }
0x1a99   :  { %1603 = vmatpush.msrb.mxu2 %v3916_v11 }
0x1a9b   :  { %v1412_v5 = vpop.f32.mrf.mxu0  ;;  %1604 = vmatpush.msrb.mxu2 %v3923_v56 }
0x1a9c   :  { %v1413_v15 = vadd.f32 %v3774_v47, %v1412_v5 }
0x1a9e   :  { %v1416_v6 = vrot.slane %v1413_v15, 4 }
0x1aa0   :  { %1438 = vrot.lane.b32.xlu1 %v1416_v6, %s3412_s29  ;;  %v1418_v10 = vadd.f32 %v1416_v6, %v3788_v53 }
0x1aa2   :  { %v3040_v20 = vmul.f32 -1.442695, %v1418_v10 }
0x1aa4   :  { %3205 = vpow2.f32 %v3040_v20 }
0x1aaa   :  { %v3206_v7 = vpop.eup %3205 }
0x1aab   :  { %v1422_v50 = vadd.f32 1.0, %v3206_v7 }
0x1aad   :  { %3207 = vrcp.f32 %v1422_v50  ;;  %v1434_v33 = vand.u32 2147483648, %v1422_v50  ;;  %vm1428_vm14 = vweird.f32 %v1422_v50  ;;  %v1432_v34 = vand.u32 2147483647, %v1422_v50 }
0x1aaf   :  { %v1435_v37 = vor.u32 1.1754944e-38, %v1434_v33  ;;  %vm1433_vm1 = vcmp.eq.f32.partialorder %v1432_v34, 8.507059e+37 }
0x1ab3   :  { %v3208_v12 = vpop.eup %3207 }
0x1ab4   :  { %v1424_v13 = vmul.f32 %v3208_v12, %v1422_v50  ;;  %vm1429_vm13 = vweird.f32 %v3208_v12 }
0x1ab5   :  { %vm1430_vm15 = vmor %vm1428_vm14, %vm1429_vm13 }
0x1ab6   :  { %v1425_v14 = vsub.f32 1.0, %v1424_v13 }
0x1ab8   :  { %v1426_v16 = vmul.f32 %v3208_v12, %v1425_v14 }
0x1aba   :  { %v1427_v19 = vadd.f32 %v3208_v12, %v1426_v16 }
0x1abc   :  { %v1431_v35 = vsel %vm1430_vm15, %v3208_v12, %v1427_v19 }
0x1abd   :  { %v1436_v48 = vsel %vm1433_vm1, %v1435_v37, %v1431_v35 }
0x1abe   :  { %v1448_v17 = vsub.f32 1.0, %v1436_v48  ;;  %v1456_v62 = vmul.f32 %v1454_v60, %v1436_v48 }
0x1b12   :  { %v1439_v39 = vpop.permute.xlu1 %1438 }
0x1b13   :  { %v1441_v49 = vmul.f32 %v1439_v39, %v1436_v48 }
0x1b15   :  { %1443 = vrot.lane.b32.xlu0 %v1441_v49, %s3412_s29 }
0x1b17   :  { %v1350_v54 = vpop.f32.mrf.mxu2 }
0x1b18   :  { %v1351_v55 = vadd.f32 %v1350_v54, %v1327_v52 }
0x1b1a   :  { %v1353_v57 = vadd.f32 %v3987_v46, %v1351_v55 }
0x1b1c   :  { %3209 = vtanh.f32 %v1353_v57 }
0x1b22   :  { %v3210_v38 = vpop.eup %3209 }
0x1b23   :  { %3038 = vmatmul.msk.f32.vlgmr.msrb.gmra.mxu3 %vm135_vm2, %v3210_v38 }
0x1b24   :  { %1626 = vmatpush.msrb.mxu3 %v3959_v40 }
0x1b26   :  { %1627 = vmatpush.msrb.mxu3 %v3964_v41 }
0x1b28   :  { %1628 = vmatpush.msrb.mxu3 %v3971_v42 }
0x1b2a   :  { %1629 = vmatpush.msrb.mxu3 %v3976_v30 }
0x1b87   :  { %v1444_v58 = vpop.permute.xlu0 %1443 }
0x1b88   :  { %v1446_v26 = vadd.f32 %v1444_v58, %v3788_v53 }
0x1b8a   :  { %3211 = vtanh.f32 %v1446_v26 }
0x1b90   :  { %v3212_v59 = vpop.eup %3211 }
0x1b91   :  { %1450 = vrot.lane.b32.xlu1 %v3212_v59, %s3413_s7 }
0x1ba6   :  { %v4063_v16 = vpop.f32.mrf.mxu3 }
0x1c03   :  { %v1451_v61 = vpop.permute.xlu1 %1450 }
0x1c04   :  { %v1453_v63 = vmul.f32 %v1451_v61, %v1448_v17 }
0x1c06   :  { %v4037_v0 = vadd.f32 %v1456_v62, %v1453_v63 }
0x1c08   :  { %v1459_v2 = vrot.slane %v4037_v0, 4  ;;  %v1710_v61 = vrot.slane %v4037_v0, 6 }
0x1c0a   :  { %1460 = vrot.lane.b32.xlu0 %v1459_v2, %s3413_s7 }
0x1c7c   :  { %v1461_v3 = vpop.permute.xlu0 %1460 }
0x1c7d   :  { %3043 = vmatmul.msk.f32.vlgmr.msra.gmra.mxu1 %vm135_vm2, %v1461_v3 }
0x1c7e   :  { %3054 = vmatpush.xpose.msk.msra.mxu1 %vm135_vm2, %v3809_v18 }
0x1c82   :  { %3055 = vmatpush.xpose.msk.msra.mxu1 %vm135_vm2, %v3815_v23 }
0x1c85   :  { %3049 = vmatmul.msk.f32.vlgmr.msrb.gmra.mxu1 %vm135_vm2, %v1461_v3 }
0x1c86   :  { %1834 = vmatpush.msrb.mxu1 %v3834_v25 }
0x1c88   :  { %1835 = vmatpush.msrb.mxu1 %v3841_v27 }
0x1c8a   :  { %1836 = vmatpush.msrb.mxu1 %v3850_v29 }
0x1c8c   :  { %1837 = vmatpush.msrb.mxu1 %v3856_v31 }
0x1cfa   :  { %v1481_v28 = vpop.f32.mrf.mxu1 }
0x1cfb   :  { %v1484_v4 = vmul.f32 %v1481_v28, %v3862_v32 }
0x1cfd   :  { %3044 = vmatmul.msk.f32.vlgmr.msra.gmra.mxu2 %vm89_vm0, %v1484_v4 }
0x1cfe   :  { %1758 = vmatpush.msra.mxu2 %v3823_v21 }
0x1d00   :  { %1759 = vmatpush.msra.mxu2 %v3828_v22 }
0x1d02   :  { %v1583_v4 = vpop.f32.mrf.mxu1 }
0x1d80   :  { %v1505_v5 = vpop.f32.mrf.mxu2 }
0x1d81   :  { %v1508_v15 = vsel %vm984_vm5, %v1505_v5, -inf }
0x1d82   :  { %1509 = vmax.xlane.f32.xlu1 %v1508_v15 }
0x1df5   :  { %v1510_v6 = vpop.xlane.xlu1 %1509 }
0x1df6   :  { %v1511_v10 = vsub.f32 %v1505_v5, %v1510_v6 }
0x1df8   :  { %v1512_v20 = vmul.f32 1.442695, %v1511_v10 }
0x1dfa   :  { %3213 = vpow2.f32 %v1512_v20 }
0x1e00   :  { %v3214_v7 = vpop.eup %3213 }
0x1e01   :  { %v1514_v50 = vsel %vm984_vm5, %v3214_v7, 0.0 }
0x1e02   :  { %1515 = vadd.xlane.f32.xlu0 %v1514_v50 }
0x1e75   :  { %v1516_v12 = vpop.xlane.xlu0 %1515 }
0x1e76   :  { %3215 = vrcp.f32 %v1516_v12 }
0x1e7c   :  { %v3216_v13 = vpop.eup %3215 }
0x1e7d   :  { %v1518_v14 = vmul.f32 %v3216_v13, %v3214_v7 }
0x1e7f   :  { %1650 = vst.msk [vmem:[#allocation5 + $0x4] sm:$0x3] %vm984_vm5, %v1518_v14  ;;  %3047 = vmatmul.msk.f32.vlgmr.msra.gmra.mxu3 %vm996_vm12, %v1518_v14 }
0x1e80   :  { %3058 = vmatpush.xpose.msk.msra.mxu3 %vm996_vm12, %v3823_v21 }
0x1e84   :  { %3059 = vmatpush.xpose.msk.msra.mxu3 %vm996_vm12, %v3828_v22 }
0x1f02   :  { %v1539_v19 = vpop.f32.mrf.mxu3 }
0x1f03   :  { %v1542_v33 = vmul.f32 %v1539_v19, %v3862_v32 }
0x1f05   :  { %3048 = vmatmul.msk.f32.vlgmr.msrb.gmra.mxu0 %vm89_vm0, %v1542_v33 }
0x1f06   :  { %1816 = vmatpush.msrb.mxu0 %v3809_v18 }
0x1f08   :  { %1817 = vmatpush.msrb.mxu0 %v3815_v23 }
0x1f0d   :  { %3052 = vmatmul.msk.f32.vlgmr.msra.gmra.mxu0 %vm135_vm2, %v1461_v3 }
0x1f0e   :  { %1919 = vmatpush.msra.mxu0 %v3749_v24 }
0x1f10   :  { %1920 = vmatpush.msra.mxu0 %v3754_v43 }
0x1f12   :  { %1921 = vmatpush.msra.mxu0 %v3760_v44 }
0x1f14   :  { %1922 = vmatpush.msra.mxu0 %v3766_v45 }
0x1f82   :  { %v1563_v34 = vpop.f32.mrf.mxu0 }
0x1f83   :  { %3050 = vmatmul.msk.f32.vlgmr.msrb.gmra.mxu2 %vm135_vm2, %v1563_v34 }
0x1f84   :  { %1857 = vmatpush.msrb.mxu2 %v3902_v8 }
0x1f86   :  { %1858 = vmatpush.msrb.mxu2 %v3909_v9 }
0x1f88   :  { %1859 = vmatpush.msrb.mxu2 %v3916_v11 }
0x1f8a   :  { %v1668_v35 = vpop.f32.mrf.mxu0  ;;  %1860 = vmatpush.msrb.mxu2 %v3923_v56 }
0x1f8b   :  { %v1669_v37 = vadd.f32 %v3774_v47, %v1668_v35 }
0x1f8d   :  { %v1672_v39 = vrot.slane %v1669_v37, 2 }
0x1f8f   :  { %v1674_v48 = vadd.f32 %v1672_v39, %v3788_v53  ;;  %1694 = vrot.lane.b32.xlu2 %v1672_v39, %s3412_s29 }
0x1f91   :  { %v3053_v49 = vmul.f32 -1.442695, %v1674_v48 }
0x1f93   :  { %3217 = vpow2.f32 %v3053_v49 }
0x1f99   :  { %v3218_v52 = vpop.eup %3217 }
0x1f9a   :  { %v1678_v54 = vadd.f32 1.0, %v3218_v52 }
0x1f9c   :  { %3219 = vrcp.f32 %v1678_v54  ;;  %v1690_v58 = vand.u32 2147483648, %v1678_v54  ;;  %v1688_v59 = vand.u32 2147483647, %v1678_v54  ;;  %vm1684_vm6 = vweird.f32 %v1678_v54 }
0x1f9e   :  { %v1691_v17 = vor.u32 1.1754944e-38, %v1690_v58  ;;  %vm1689_vm9 = vcmp.eq.f32.partialorder %v1688_v59, 8.507059e+37 }
0x1fa2   :  { %v3220_v55 = vpop.eup %3219 }
0x1fa3   :  { %v1680_v57 = vmul.f32 %v3220_v55, %v1678_v54  ;;  %vm1685_vm3 = vweird.f32 %v3220_v55 }
0x1fa4   :  { %vm1686_vm8 = vmor %vm1684_vm6, %vm1685_vm3 }
0x1fa5   :  { %v1681_v38 = vsub.f32 1.0, %v1680_v57 }
0x1fa7   :  { %v1682_v26 = vmul.f32 %v3220_v55, %v1681_v38 }
0x1fa9   :  { %v1683_v60 = vadd.f32 %v3220_v55, %v1682_v26 }
0x1fab   :  { %v1687_v62 = vsel %vm1686_vm8, %v3220_v55, %v1683_v60 }
0x1fac   :  { %v1692_v63 = vsel %vm1689_vm9, %v1691_v17, %v1687_v62 }
0x1fad   :  { %v1712_v2 = vmul.f32 %v1710_v61, %v1692_v63  ;;  %v1704_v50 = vsub.f32 1.0, %v1692_v63 }
0x1fe9   :  { %v1695_v3 = vpop.permute.xlu2 %1694 }
0x1fea   :  { %v1697_v28 = vmul.f32 %v1695_v3, %v1692_v63 }
0x1fec   :  { %1699 = vrot.lane.b32.xlu2 %v1697_v28, %s3412_s29 }
0x2006   :  { %v1606_v5 = vpop.f32.mrf.mxu2 }
0x2007   :  { %v1607_v15 = vadd.f32 %v1606_v5, %v1583_v4 }
0x2009   :  { %v1609_v6 = vadd.f32 %v3987_v46, %v1607_v15 }
0x200b   :  { %3221 = vtanh.f32 %v1609_v6 }
0x2011   :  { %v3222_v10 = vpop.eup %3221 }
0x2012   :  { %3051 = vmatmul.msk.f32.vlgmr.msrb.gmra.mxu3 %vm135_vm2, %v3222_v10 }
0x2013   :  { %1882 = vmatpush.msrb.mxu3 %v3959_v40 }
0x2015   :  { %1883 = vmatpush.msrb.mxu3 %v3964_v41 }
0x2017   :  { %1884 = vmatpush.msrb.mxu3 %v3971_v42 }
0x2019   :  { %1885 = vmatpush.msrb.mxu3 %v3976_v30 }
0x2046   :  { %v1700_v0 = vpop.permute.xlu2 %1699 }
0x2047   :  { %v1702_v20 = vadd.f32 %v1700_v0, %v3788_v53 }
0x2049   :  { %3223 = vtanh.f32 %v1702_v20 }
0x204f   :  { %v3224_v7 = vpop.eup %3223 }
0x2050   :  { %1706 = vrot.lane.b32.xlu2 %v3224_v7, %s3413_s7 }
0x2095   :  { %v4120_v58 = vpop.f32.mrf.mxu3 }
0x20aa   :  { %v1707_v12 = vpop.permute.xlu2 %1706 }
0x20ab   :  { %v1709_v13 = vmul.f32 %v1707_v12, %v1704_v50 }
0x20ad   :  { %v4092_v14 = vadd.f32 %v1712_v2, %v1709_v13 }
0x20af   :  { %v1715_v19 = vrot.slane %v4092_v14, 6 }
0x20b1   :  { %1716 = vrot.lane.b32.xlu1 %v1715_v19, %s3413_s7 }
0x2123   :  { %v1717_v33 = vpop.permute.xlu1 %1716 }
0x2124   :  { %3056 = vmatmul.msk.f32.vlgmr.msra.gmra.mxu1 %vm135_vm2, %v1717_v33 }
0x2125   :  { %3067 = vmatpush.xpose.msk.msra.mxu1 %vm135_vm2, %v3809_v18 }
0x2129   :  { %3068 = vmatpush.xpose.msk.msra.mxu1 %vm135_vm2, %v3815_v23 }
0x212c   :  { %3062 = vmatmul.msk.f32.vlgmr.msrb.gmra.mxu1 %vm135_vm2, %v1717_v33 }
0x212d   :  { %2086 = vmatpush.msrb.mxu1 %v3834_v25 }
0x212f   :  { %2087 = vmatpush.msrb.mxu1 %v3841_v27 }
0x2131   :  { %2088 = vmatpush.msrb.mxu1 %v3850_v29 }
0x2133   :  { %2089 = vmatpush.msrb.mxu1 %v3856_v31 }
0x21a1   :  { %v1737_v53 = vpop.f32.mrf.mxu1 }
0x21a2   :  { %v1740_v34 = vmul.f32 %v1737_v53, %v3862_v32 }
0x21a4   :  { %3057 = vmatmul.msk.f32.vlgmr.msra.gmra.mxu2 %vm89_vm0, %v1740_v34 }
0x21a5   :  { %2010 = vmatpush.msra.mxu2 %v3823_v21 }
0x21a7   :  { %2011 = vmatpush.msra.mxu2 %v3828_v22 }
0x21a9   :  { %v1839_v0 = vpop.f32.mrf.mxu1 }
0x2227   :  { %v1761_v35 = vpop.f32.mrf.mxu2 }
0x2228   :  { %v1764_v37 = vsel %vm984_vm5, %v1761_v35, -inf }
0x2229   :  { %1765 = vmax.xlane.f32.xlu0 %v1764_v37 }
0x229c   :  { %v1766_v39 = vpop.xlane.xlu0 %1765 }
0x229d   :  { %v1767_v48 = vsub.f32 %v1761_v35, %v1766_v39 }
0x229f   :  { %v1768_v49 = vmul.f32 1.442695, %v1767_v48 }
0x22a1   :  { %3225 = vpow2.f32 %v1768_v49 }
0x22a7   :  { %v3226_v52 = vpop.eup %3225 }
0x22a8   :  { %v1770_v54 = vsel %vm984_vm5, %v3226_v52, 0.0 }
0x22a9   :  { %1771 = vadd.xlane.f32.xlu2 %v1770_v54 }
0x231c   :  { %v1772_v55 = vpop.xlane.xlu2 %1771 }
0x231d   :  { %3227 = vrcp.f32 %v1772_v55 }
0x2323   :  { %v3228_v57 = vpop.eup %3227 }
0x2324   :  { %v1774_v38 = vmul.f32 %v3228_v57, %v3226_v52 }
0x2326   :  { %1906 = vst.msk [vmem:[#allocation5 + $0x6] sm:$0x3] %vm984_vm5, %v1774_v38  ;;  %3060 = vmatmul.msk.f32.vlgmr.msra.gmra.mxu3 %vm996_vm12, %v1774_v38 }
0x2327   :  { %3071 = vmatpush.xpose.msk.msra.mxu3 %vm996_vm12, %v3823_v21 }
0x232b   :  { %3072 = vmatpush.xpose.msk.msra.mxu3 %vm996_vm12, %v3828_v22 }
0x23a9   :  { %v1795_v26 = vpop.f32.mrf.mxu3 }
0x23aa   :  { %v1798_v59 = vmul.f32 %v1795_v26, %v3862_v32 }
0x23ac   :  { %3061 = vmatmul.msk.f32.vlgmr.msrb.gmra.mxu0 %vm89_vm0, %v1798_v59 }
0x23ad   :  { %2068 = vmatpush.msrb.mxu0 %v3809_v18 }
0x23af   :  { %2069 = vmatpush.msrb.mxu0 %v3815_v23 }
0x23b4   :  { %3065 = vmatmul.msk.f32.vlgmr.msra.gmra.mxu0 %vm135_vm2, %v1717_v33 }
0x23b5   :  { %2171 = vmatpush.msra.mxu0 %v3749_v24 }
0x23b7   :  { %2172 = vmatpush.msra.mxu0 %v3754_v43  ;;  %v4140_v43 = vadd.f32 %v3785_v51, %v3939_v36 }
0x23b9   :  { %2173 = vmatpush.msra.mxu0 %v3760_v44 }
0x23bb   :  { %2174 = vmatpush.msra.mxu0 %v3766_v45 }
0x2429   :  { %v1819_v60 = vpop.f32.mrf.mxu0 }
0x242a   :  { %3063 = vmatmul.msk.f32.vlgmr.msrb.gmra.mxu2 %vm135_vm2, %v1819_v60 }
0x242b   :  { %2109 = vmatpush.msrb.mxu2 %v3902_v8 }
0x242d   :  { %2110 = vmatpush.msrb.mxu2 %v3909_v9 }
0x242f   :  { %2111 = vmatpush.msrb.mxu2 %v3916_v11 }
0x2431   :  { %v1924_v17 = vpop.f32.mrf.mxu0  ;;  %2112 = vmatpush.msrb.mxu2 %v3923_v56 }
0x2432   :  { %v1925_v24 = vadd.f32 %v3774_v47, %v1924_v17 }
0x2434   :  { %1948 = vrot.lane.b32.xlu0 %v1925_v24, %s3412_s29  ;;  %v1927_v44 = vadd.f32 %v1925_v24, %v4140_v43 }
0x2436   :  { %v3066_v45 = vmul.f32 -1.442695, %v1927_v44  ;;  %v4219_v44 = vld [vmem:[%s4530_s13] ss:$0 sm:$0xff] }
0x2438   :  { %3229 = vpow2.f32 %v3066_v45 }
0x243e   :  { %v3230_v61 = vpop.eup %3229 }
0x243f   :  { %v1931_v62 = vadd.f32 1.0, %v3230_v61 }
0x2441   :  { %3231 = vrcp.f32 %v1931_v62  ;;  %v1943_v47 = vand.u32 2147483648, %v1931_v62  ;;  %vm1937_vm11 = vweird.f32 %v1931_v62  ;;  %v1941_v5 = vand.u32 2147483647, %v1931_v62 }
0x2443   :  { %v1944_v51 = vor.u32 1.1754944e-38, %v1943_v47  ;;  %vm1942_vm14 = vcmp.eq.f32.partialorder %v1941_v5, 8.507059e+37 }
0x2447   :  { %v3232_v63 = vpop.eup %3231 }
0x2448   :  { %v1933_v2 = vmul.f32 %v3232_v63, %v1931_v62  ;;  %vm1938_vm10 = vweird.f32 %v3232_v63 }
0x2449   :  { %vm1939_vm13 = vmor %vm1937_vm11, %vm1938_vm10 }
0x244a   :  { %v1934_v3 = vsub.f32 1.0, %v1933_v2 }
0x244c   :  { %v1935_v28 = vmul.f32 %v3232_v63, %v1934_v3 }
0x244e   :  { %v1936_v4 = vadd.f32 %v3232_v63, %v1935_v28 }
0x2450   :  { %v1940_v15 = vsel %vm1939_vm13, %v3232_v63, %v1936_v4 }
0x2451   :  { %v1945_v6 = vsel %vm1942_vm14, %v1944_v51, %v1940_v15 }
0x2452   :  { %v1958_v34 = vsub.f32 1.0, %v1945_v6  ;;  %v1965_v37 = vmul.f32 %v1945_v6, %v1715_v19 }
0x24a6   :  { %v1949_v36 = vpop.permute.xlu0 %1948 }
0x24a7   :  { %v1951_v10 = vmul.f32 %v1949_v36, %v1945_v6 }
0x24a9   :  { %1953 = vrot.lane.b32.xlu1 %v1951_v10, %s3412_s29 }
0x24ad   :  { %v1862_v20 = vpop.f32.mrf.mxu2 }
0x24ae   :  { %v1863_v7 = vadd.f32 %v1862_v20, %v1839_v0 }
0x24b0   :  { %v1865_v50 = vadd.f32 %v3987_v46, %v1863_v7 }
0x24b2   :  { %3233 = vtanh.f32 %v1865_v50 }
0x24b8   :  { %v3234_v12 = vpop.eup %3233 }
0x24b9   :  { %3064 = vmatmul.msk.f32.vlgmr.msrb.gmra.mxu3 %vm135_vm2, %v3234_v12 }
0x24ba   :  { %2134 = vmatpush.msrb.mxu3 %v3959_v40 }
0x24bc   :  { %2135 = vmatpush.msrb.mxu3 %v3964_v41 }
0x24be   :  { %2136 = vmatpush.msrb.mxu3 %v3971_v42 }
0x24c0   :  { %2137 = vmatpush.msrb.mxu3 %v3976_v30 }
0x251b   :  { %v1954_v13 = vpop.permute.xlu1 %1953 }
0x251c   :  { %v1956_v33 = vadd.f32 %v1954_v13, %v4140_v43 }
0x251e   :  { %3235 = vtanh.f32 %v1956_v33 }
0x2524   :  { %v3236_v53 = vpop.eup %3235 }
0x2525   :  { %1960 = vrot.lane.b32.xlu0 %v3236_v53, %s3413_s7 }
0x253c   :  { %v4180_v59 = vpop.f32.mrf.mxu3 }
0x2597   :  { %v1961_v35 = vpop.permute.xlu0 %1960 }
0x2598   :  { %v1963_v39 = vmul.f32 %v1961_v35, %v1958_v34 }
0x259a   :  { %v4154_v48 = vadd.f32 %v1965_v37, %v1963_v39 }
0x259c   :  { %1968 = vrot.lane.b32.xlu1 %v4154_v48, %s3413_s7  ;;  %v2218_v10 = vrot.slane %v4154_v48, 6 }
0x260e   :  { %v1969_v49 = vpop.permute.xlu1 %1968 }
0x260f   :  { %3069 = vmatmul.msk.f32.vlgmr.msra.gmra.mxu1 %vm135_vm2, %v1969_v49 }
0x2610   :  { %3080 = vmatpush.xpose.msk.msra.mxu1 %vm135_vm2, %v3809_v18 }
0x2614   :  { %3081 = vmatpush.xpose.msk.msra.mxu1 %vm135_vm2, %v3815_v23 }
0x2617   :  { %3075 = vmatmul.msk.f32.vlgmr.msrb.gmra.mxu1 %vm135_vm2, %v1969_v49 }
0x2618   :  { %2342 = vmatpush.msrb.mxu1 %v3834_v25 }
0x261a   :  { %2343 = vmatpush.msrb.mxu1 %v3841_v27 }
0x261c   :  { %2344 = vmatpush.msrb.mxu1 %v3850_v29 }
0x261e   :  { %2345 = vmatpush.msrb.mxu1 %v3856_v31 }
0x268c   :  { %v1989_v14 = vpop.f32.mrf.mxu1 }
0x268d   :  { %v1992_v19 = vmul.f32 %v1989_v14, %v3862_v32 }
0x268f   :  { %3070 = vmatmul.msk.f32.vlgmr.msra.gmra.mxu2 %vm89_vm0, %v1992_v19 }
0x2690   :  { %2266 = vmatpush.msra.mxu2 %v3823_v21 }
0x2692   :  { %2267 = vmatpush.msra.mxu2 %v3828_v22 }
0x2694   :  { %v2091_v13 = vpop.f32.mrf.mxu1 }
0x2712   :  { %v2013_v52 = vpop.f32.mrf.mxu2 }
0x2713   :  { %v2016_v54 = vsel %vm984_vm5, %v2013_v52, -inf }
0x2714   :  { %2017 = vmax.xlane.f32.xlu0 %v2016_v54 }
0x2787   :  { %v2018_v25 = vpop.xlane.xlu0 %2017 }
0x2788   :  { %v2019_v55 = vsub.f32 %v2013_v52, %v2018_v25 }
0x278a   :  { %v2020_v27 = vmul.f32 1.442695, %v2019_v55  ;;  %v4239_v55 = vld [vmem:[#allocation2 + $0x8] sm:$0xff] }
0x278c   :  { %3237 = vpow2.f32 %v2020_v27  ;;  %v4243_v27 = vld [vmem:[#allocation2] sm:$0xff] }
0x2792   :  { %v3238_v29 = vpop.eup %3237 }
0x2793   :  { %v2022_v31 = vsel %vm984_vm5, %v3238_v29, 0.0 }
0x2794   :  { %2023 = vadd.xlane.f32.xlu1 %v2022_v31  ;;  %v4257_v31 = vld [vmem:[%s4531_s14 + $0x30] sm:$0xff] }
0x2807   :  { %v2024_v57 = vpop.xlane.xlu1 %2023 }
0x2808   :  { %3239 = vrcp.f32 %v2024_v57  ;;  %v4263_v57 = vld [vmem:[%s4531_s14 + $0x28] sm:$0xff] }
0x280e   :  { %v3240_v38 = vpop.eup %3239 }
0x280f   :  { %v2026_v26 = vmul.f32 %v3240_v38, %v3238_v29  ;;  %v4251_v29 = vld [vmem:[%s4531_s14 + $0x38] sm:$0xff]  ;;  %v4269_v38 = vld [vmem:[%s4531_s14 + $0x20] sm:$0xff] }
0x2811   :  { %2158 = vst.msk [vmem:[#allocation5 + $0x8] sm:$0x3] %vm984_vm5, %v2026_v26  ;;  %3073 = vmatmul.msk.f32.vlgmr.msra.gmra.mxu3 %vm996_vm12, %v2026_v26 }
0x2812   :  { %3084 = vmatpush.xpose.msk.msra.mxu3 %vm996_vm12, %v3823_v21  ;;  %v4190_v21 = vld [vmem:[%s4528_s11 + $0x18] sm:$0xff] }
0x2816   :  { %3085 = vmatpush.xpose.msk.msra.mxu3 %vm996_vm12, %v3828_v22  ;;  %v4196_v22 = vld [vmem:[%s4528_s11 + $0x10] sm:$0xff] }
0x2894   :  { %v2047_v60 = vpop.f32.mrf.mxu3 }
0x2895   :  { %v2050_v17 = vmul.f32 %v2047_v60, %v3862_v32  ;;  %v4275_v60 = vld [vmem:[%s4552_s22] sm:$0x3] }
0x2897   :  { %3074 = vmatmul.msk.f32.vlgmr.msrb.gmra.mxu0 %vm89_vm0, %v2050_v17 }
0x2898   :  { %2324 = vmatpush.msrb.mxu0 %v3809_v18  ;;  %v4202_v18 = vld [vmem:[%s4528_s11 + $0x8] sm:$0xff] }
0x289a   :  { %2325 = vmatpush.msrb.mxu0 %v3815_v23  ;;  %v4208_v23 = vld [vmem:[%s4528_s11] sm:$0xff] }
0x289f   :  { %3078 = vmatmul.msk.f32.vlgmr.msra.gmra.mxu0 %vm135_vm2, %v1969_v49 }
0x28a0   :  { %2427 = vmatpush.msra.mxu0 %v4190_v21 }
0x28a2   :  { %2428 = vmatpush.msra.mxu0 %v4196_v22 }
0x28a4   :  { %2429 = vmatpush.msra.mxu0 %v4202_v18 }
0x28a6   :  { %2430 = vmatpush.msra.mxu0 %v4208_v23 }
0x2914   :  { %v2071_v32 = vpop.f32.mrf.mxu0 }
0x2915   :  { %3076 = vmatmul.msk.f32.vlgmr.msrb.gmra.mxu2 %vm135_vm2, %v2071_v32  ;;  %v4282_v32 = vld [vmem:[%s4551_s10 + $0x8] sm:$0xff] }
0x2916   :  { %2365 = vmatpush.msrb.mxu2 %v3902_v8 }
0x2918   :  { %2366 = vmatpush.msrb.mxu2 %v3909_v9 }
0x291a   :  { %2367 = vmatpush.msrb.mxu2 %v3916_v11 }
0x291c   :  { %v2176_v24 = vpop.f32.mrf.mxu0  ;;  %2368 = vmatpush.msrb.mxu2 %v3923_v56 }
0x291d   :  { %v2177_v45 = vadd.f32 %v4219_v44, %v2176_v24  ;;  %v4288_v24 = vld [vmem:[%s4551_s10] sm:$0xff] }
0x291f   :  { %v2180_v61 = vrot.slane %v2177_v45, 6 }
0x2921   :  { %v2182_v62 = vadd.f32 %v2180_v61, %v4140_v43  ;;  %2202 = vrot.lane.b32.xlu2 %v2180_v61, %s3412_s29 }
0x2923   :  { %v3079_v63 = vmul.f32 -1.442695, %v2182_v62 }
0x2925   :  { %3241 = vpow2.f32 %v3079_v63 }
0x292b   :  { %v3242_v2 = vpop.eup %3241 }
0x292c   :  { %v2186_v3 = vadd.f32 1.0, %v3242_v2 }
0x292e   :  { %3243 = vrcp.f32 %v2186_v3  ;;  %v2198_v5 = vand.u32 2147483648, %v2186_v3  ;;  %v2196_v51 = vand.u32 2147483647, %v2186_v3  ;;  %vm2192_vm1 = vweird.f32 %v2186_v3 }
0x2930   :  { %v2199_v6 = vor.u32 1.1754944e-38, %v2198_v5  ;;  %vm2197_vm6 = vcmp.eq.f32.partialorder %v2196_v51, 8.507059e+37 }
0x2934   :  { %v3244_v28 = vpop.eup %3243 }
0x2935   :  { %v2188_v4 = vmul.f32 %v3244_v28, %v2186_v3  ;;  %vm2193_vm15 = vweird.f32 %v3244_v28 }
0x2936   :  { %vm2194_vm3 = vmor %vm2192_vm1, %vm2193_vm15 }
0x2937   :  { %v2189_v47 = vsub.f32 1.0, %v2188_v4 }
0x2939   :  { %v2190_v15 = vmul.f32 %v3244_v28, %v2189_v47 }
0x293b   :  { %v2191_v36 = vadd.f32 %v3244_v28, %v2190_v15 }
0x293d   :  { %v2195_v0 = vsel %vm2194_vm3, %v3244_v28, %v2191_v36 }
0x293e   :  { %v2200_v20 = vsel %vm2197_vm6, %v2199_v6, %v2195_v0 }
0x293f   :  { %v2220_v7 = vmul.f32 %v2218_v10, %v2200_v20  ;;  %v2212_v49 = vsub.f32 1.0, %v2200_v20 }
0x297b   :  { %v2203_v50 = vpop.permute.xlu2 %2202 }
0x297c   :  { %v2205_v12 = vmul.f32 %v2203_v50, %v2200_v20 }
0x297e   :  { %2207 = vrot.lane.b32.xlu2 %v2205_v12, %s3412_s29 }
0x2998   :  { %v2114_v33 = vpop.f32.mrf.mxu2 }
0x2999   :  { %v2115_v53 = vadd.f32 %v2114_v33, %v2091_v13 }
0x299b   :  { %v2117_v34 = vadd.f32 %v3987_v46, %v2115_v53 }
0x299d   :  { %3245 = vtanh.f32 %v2117_v34 }
0x29a3   :  { %v3246_v35 = vpop.eup %3245 }
0x29a4   :  { %3077 = vmatmul.msk.f32.vlgmr.msrb.gmra.mxu3 %vm135_vm2, %v3246_v35 }
0x29a5   :  { %2390 = vmatpush.msrb.mxu3 %v3959_v40 }
0x29a7   :  { %2391 = vmatpush.msrb.mxu3 %v3964_v41 }
0x29a9   :  { %2392 = vmatpush.msrb.mxu3 %v3971_v42 }
0x29ab   :  { %2393 = vmatpush.msrb.mxu3 %v3976_v30 }
0x29d8   :  { %v2208_v37 = vpop.permute.xlu2 %2207 }
0x29d9   :  { %v2210_v39 = vadd.f32 %v2208_v37, %v4140_v43 }
0x29db   :  { %3247 = vtanh.f32 %v2210_v39 }
0x29e1   :  { %v3248_v48 = vpop.eup %3247 }
0x29e2   :  { %2214 = vrot.lane.b32.xlu2 %v3248_v48, %s3413_s7 }
0x2a27   :  { %v4299_v15 = vpop.f32.mrf.mxu3 }
0x2a3c   :  { %v2215_v14 = vpop.permute.xlu2 %2214 }
0x2a3d   :  { %v2217_v19 = vmul.f32 %v2215_v14, %v2212_v49 }
0x2a3f   :  { %v4234_v52 = vadd.f32 %v2220_v7, %v2217_v19 }
0x2a41   :  { %v2223_v54 = vrot.slane %v4234_v52, 2 }
0x2a43   :  { %2224 = vrot.lane.b32.xlu0 %v2223_v54, %s3413_s7 }
0x2ab5   :  { %v2225_v25 = vpop.permute.xlu0 %2224 }
0x2ab6   :  { %3082 = vmatmul.msk.f32.vlgmr.msra.gmra.mxu1 %vm135_vm2, %v2225_v25 }
0x2ab7   :  { %3093 = vmatpush.xpose.msk.msra.mxu1 %vm135_vm2, %v4239_v55 }
0x2abb   :  { %3094 = vmatpush.xpose.msk.msra.mxu1 %vm135_vm2, %v4243_v27 }
0x2abe   :  { %3088 = vmatmul.msk.f32.vlgmr.msrb.gmra.mxu1 %vm135_vm2, %v2225_v25 }
0x2abf   :  { %2598 = vmatpush.msrb.mxu1 %v4251_v29 }
0x2ac1   :  { %2599 = vmatpush.msrb.mxu1 %v4257_v31 }
0x2ac3   :  { %2600 = vmatpush.msrb.mxu1 %v4263_v57 }
0x2ac5   :  { %2601 = vmatpush.msrb.mxu1 %v4269_v38 }
0x2b33   :  { %v2245_v26 = vpop.f32.mrf.mxu1 }
0x2b34   :  { %v2248_v17 = vmul.f32 %v4275_v60, %v2245_v26 }
0x2b36   :  { %3083 = vmatmul.msk.f32.vlgmr.msra.gmra.mxu2 %vm89_vm0, %v2248_v17 }
0x2b37   :  { %2522 = vmatpush.msra.mxu2 %v4282_v32 }
0x2b39   :  { %2523 = vmatpush.msra.mxu2 %v4288_v24 }
0x2b3b   :  { %v2347_v37 = vpop.f32.mrf.mxu1 }
0x2bb9   :  { %v2269_v45 = vpop.f32.mrf.mxu2 }
0x2bba   :  { %v2272_v61 = vsel %vm984_vm5, %v2269_v45, -inf }
0x2bbb   :  { %2273 = vmax.xlane.f32.xlu1 %v2272_v61 }
0x2c2e   :  { %v2274_v62 = vpop.xlane.xlu1 %2273 }
0x2c2f   :  { %v2275_v63 = vsub.f32 %v2269_v45, %v2274_v62 }
0x2c31   :  { %v2276_v2 = vmul.f32 1.442695, %v2275_v63 }
0x2c33   :  { %3249 = vpow2.f32 %v2276_v2 }
0x2c39   :  { %v3250_v3 = vpop.eup %3249 }
0x2c3a   :  { %v2278_v28 = vsel %vm984_vm5, %v3250_v3, 0.0 }
0x2c3b   :  { %2279 = vadd.xlane.f32.xlu2 %v2278_v28 }
0x2cae   :  { %v2280_v4 = vpop.xlane.xlu2 %2279 }
0x2caf   :  { %3251 = vrcp.f32 %v2280_v4 }
0x2cb5   :  { %v3252_v47 = vpop.eup %3251 }
0x2cb6   :  { %v2282_v5 = vmul.f32 %v3252_v47, %v3250_v3 }
0x2cb8   :  { %2414 = vst.msk [vmem:[#allocation5 + $0xa] sm:$0x3] %vm984_vm5, %v2282_v5  ;;  %3086 = vmatmul.msk.f32.vlgmr.msra.gmra.mxu3 %vm996_vm12, %v2282_v5 }
0x2cb9   :  { %3097 = vmatpush.xpose.msk.msra.mxu3 %vm996_vm12, %v4282_v32 }
0x2cbd   :  { %3098 = vmatpush.xpose.msk.msra.mxu3 %vm996_vm12, %v4288_v24 }
0x2d3b   :  { %v2303_v51 = vpop.f32.mrf.mxu3 }
0x2d3c   :  { %v2306_v36 = vmul.f32 %v4275_v60, %v2303_v51 }
0x2d3e   :  { %3087 = vmatmul.msk.f32.vlgmr.msrb.gmra.mxu0 %vm89_vm0, %v2306_v36 }
0x2d3f   :  { %2580 = vmatpush.msrb.mxu0 %v4239_v55 }
0x2d41   :  { %2581 = vmatpush.msrb.mxu0 %v4243_v27 }
0x2d46   :  { %3091 = vmatmul.msk.f32.vlgmr.msra.gmra.mxu0 %vm135_vm2, %v2225_v25 }
0x2d47   :  { %2683 = vmatpush.msra.mxu0 %v4190_v21 }
0x2d49   :  { %2684 = vmatpush.msra.mxu0 %v4196_v22 }
0x2d4b   :  { %2685 = vmatpush.msra.mxu0 %v4202_v18 }
0x2d4d   :  { %2686 = vmatpush.msra.mxu0 %v4208_v23 }
0x2dbb   :  { %v2327_v6 = vpop.f32.mrf.mxu0 }
0x2dbc   :  { %3089 = vmatmul.msk.f32.vlgmr.msrb.gmra.mxu2 %vm135_vm2, %v2327_v6  ;;  %v3328_v6 = vld [vmem:[%s4531_s14] sm:$0xff] }
0x2dbd   :  { %2621 = vmatpush.msrb.mxu2 %v3902_v8 }
0x2dbf   :  { %2622 = vmatpush.msrb.mxu2 %v3909_v9 }
0x2dc1   :  { %2623 = vmatpush.msrb.mxu2 %v3916_v11 }
0x2dc3   :  { %v2432_v10 = vpop.f32.mrf.mxu0  ;;  %2624 = vmatpush.msrb.mxu2 %v3923_v56 }
0x2dc4   :  { %v2433_v21 = vadd.f32 %v4219_v44, %v2432_v10 }
0x2dc6   :  { %v2436_v0 = vrot.slane %v2433_v21, 4 }
0x2dc8   :  { %2458 = vrot.lane.b32.xlu1 %v2436_v0, %s3412_s29  ;;  %v2438_v22 = vadd.f32 %v2436_v0, %v4140_v43 }
0x2dca   :  { %v3092_v18 = vmul.f32 -1.442695, %v2438_v22 }
0x2dcc   :  { %3253 = vpow2.f32 %v3092_v18 }
0x2dd2   :  { %v3254_v23 = vpop.eup %3253 }
0x2dd3   :  { %v2442_v20 = vadd.f32 1.0, %v3254_v23 }
0x2dd5   :  { %3255 = vrcp.f32 %v2442_v20  ;;  %v2454_v12 = vand.u32 2147483648, %v2442_v20  ;;  %vm2448_vm9 = vweird.f32 %v2442_v20  ;;  %v2452_v56 = vand.u32 2147483647, %v2442_v20 }
0x2dd7   :  { %v2455_v33 = vor.u32 1.1754944e-38, %v2454_v12  ;;  %vm2453_vm11 = vcmp.eq.f32.partialorder %v2452_v56, 8.507059e+37 }
0x2ddb   :  { %v3256_v8 = vpop.eup %3255 }
0x2ddc   :  { %v2444_v7 = vmul.f32 %v3256_v8, %v2442_v20  ;;  %vm2449_vm8 = vweird.f32 %v3256_v8 }
0x2ddd   :  { %vm2450_vm10 = vmor %vm2448_vm9, %vm2449_vm8 }
0x2dde   :  { %v2445_v9 = vsub.f32 1.0, %v2444_v7 }
0x2de0   :  { %v2446_v50 = vmul.f32 %v3256_v8, %v2445_v9 }
0x2de2   :  { %v2447_v11 = vadd.f32 %v3256_v8, %v2446_v50 }
0x2de4   :  { %v2451_v13 = vsel %vm2450_vm10, %v3256_v8, %v2447_v11 }
0x2de5   :  { %v2456_v34 = vsel %vm2453_vm11, %v2455_v33, %v2451_v13 }
0x2de6   :  { %v2468_v26 = vsub.f32 1.0, %v2456_v34 }
0x2e3a   :  { %v2459_v53 = vpop.permute.xlu1 %2458 }
0x2e3b   :  { %v2461_v35 = vmul.f32 %v2459_v53, %v2456_v34 }
0x2e3d   :  { %2463 = vrot.lane.b32.xlu0 %v2461_v35, %s3412_s29 }
0x2e3f   :  { %v2370_v39 = vpop.f32.mrf.mxu2 }
0x2e40   :  { %v2371_v48 = vadd.f32 %v2370_v39, %v2347_v37 }
0x2e42   :  { %v2373_v49 = vadd.f32 %v3987_v46, %v2371_v48  ;;  %v2474_v46 = vrot.slane %v4234_v52, 6 }
0x2e44   :  { %3257 = vtanh.f32 %v2373_v49  ;;  %v2476_v45 = vmul.f32 %v2474_v46, %v2456_v34  ;;  %v4382_v49 = vld [vmem:[%s4532_s15] ss:$0 sm:$0xff]  ;;  %v3332_v46 = vld [vmem:[%s4533_s16 + $0x8] sm:$0xff] }
0x2e4a   :  { %v3258_v14 = vpop.eup %3257 }
0x2e4b   :  { %3090 = vmatmul.msk.f32.vlgmr.msrb.gmra.mxu3 %vm135_vm2, %v3258_v14 }
0x2e4c   :  { %2646 = vmatpush.msrb.mxu3 %v3959_v40 }
0x2e4e   :  { %2647 = vmatpush.msrb.mxu3 %v3964_v41 }
0x2e50   :  { %2648 = vmatpush.msrb.mxu3 %v3971_v42 }
0x2e52   :  { %2649 = vmatpush.msrb.mxu3 %v3976_v30 }
0x2eaf   :  { %v2464_v19 = vpop.permute.xlu0 %2463 }
0x2eb0   :  { %v2466_v54 = vadd.f32 %v2464_v19, %v4140_v43 }
0x2eb2   :  { %3259 = vtanh.f32 %v2466_v54  ;;  %v3330_v54 = vld [vmem:[%s4533_s16 + $0x18] sm:$0xff] }
0x2eb8   :  { %v3260_v25 = vpop.eup %3259 }
0x2eb9   :  { %2470 = vrot.lane.b32.xlu0 %v3260_v25, %s3413_s7  ;;  %v3331_v25 = vld [vmem:[%s4533_s16 + $0x10] sm:$0xff] }
0x2ece   :  { %v4354_v47 = vpop.f32.mrf.mxu3 }
0x2f2b   :  { %v2471_v17 = vpop.permute.xlu0 %2470 }
0x2f2c   :  { %v2473_v61 = vmul.f32 %v2471_v17, %v2468_v26  ;;  %v3333_v26 = vld [vmem:[%s4533_s16] sm:$0xff]  ;;  %s3414_s16 = smov [#allocation5]  }
0x2f2e   :  { %v4328_v40 = vadd.f32 %v2476_v45, %v2473_v61 }
0x2f30   :  { %v2479_v41 = vrot.slane %v4328_v40, 4  ;;  %v2730_v56 = vrot.slane %v4328_v40, 6 }
0x2f32   :  { %2480 = vrot.lane.b32.xlu1 %v2479_v41, %s3413_s7 }
0x2fa4   :  { %v2481_v42 = vpop.permute.xlu1 %2480 }
0x2fa5   :  { %3095 = vmatmul.msk.f32.vlgmr.msra.gmra.mxu1 %vm135_vm2, %v2481_v42 }
0x2fa6   :  { %3106 = vmatpush.xpose.msk.msra.mxu1 %vm135_vm2, %v4239_v55 }
0x2faa   :  { %3107 = vmatpush.xpose.msk.msra.mxu1 %vm135_vm2, %v4243_v27 }
0x2fad   :  { %3101 = vmatmul.msk.f32.vlgmr.msrb.gmra.mxu1 %vm135_vm2, %v2481_v42 }
0x2fae   :  { %2854 = vmatpush.msrb.mxu1 %v4251_v29 }
0x2fb0   :  { %2855 = vmatpush.msrb.mxu1 %v4257_v31 }
0x2fb2   :  { %2856 = vmatpush.msrb.mxu1 %v4263_v57 }
0x2fb4   :  { %2857 = vmatpush.msrb.mxu1 %v4269_v38 }
0x3022   :  { %v2501_v30 = vpop.f32.mrf.mxu1 }
0x3023   :  { %v2504_v52 = vmul.f32 %v4275_v60, %v2501_v30 }
0x3025   :  { %3096 = vmatmul.msk.f32.vlgmr.msra.gmra.mxu2 %vm89_vm0, %v2504_v52 }
0x3026   :  { %2778 = vmatpush.msra.mxu2 %v4282_v32 }
0x3028   :  { %2779 = vmatpush.msra.mxu2 %v4288_v24 }
0x302a   :  { %v2603_v37 = vpop.f32.mrf.mxu1 }
0x30a8   :  { %v2525_v62 = vpop.f32.mrf.mxu2 }
0x30a9   :  { %v2528_v63 = vsel %vm984_vm5, %v2525_v62, -inf }
0x30aa   :  { %2529 = vmax.xlane.f32.xlu0 %v2528_v63 }
0x311d   :  { %v2530_v29 = vpop.xlane.xlu0 %2529 }
0x311e   :  { %v2531_v2 = vsub.f32 %v2525_v62, %v2530_v29  ;;  %v4407_v62 = vld [vmem:[%s4534_s17] ss:$0 sm:$0xff]  ;;  %s2948_s17 = sshll.u32 %s3414_s16, 4  ;;  %s2949_s17 = int_to_ptr.vmem [resolvable:$true] %s2948_s17 }
0x3120   :  { %v2532_v31 = vmul.f32 1.442695, %v2531_v2 }
0x3122   :  { %3261 = vpow2.f32 %v2532_v31 }
0x3128   :  { %v3262_v57 = vpop.eup %3261 }
0x3129   :  { %v2534_v38 = vsel %vm984_vm5, %v3262_v57, 0.0 }
0x312a   :  { %2535 = vadd.xlane.f32.xlu1 %v2534_v38 }
0x319d   :  { %v2536_v3 = vpop.xlane.xlu1 %2535 }
0x319e   :  { %3263 = vrcp.f32 %v2536_v3 }
0x31a4   :  { %v3264_v28 = vpop.eup %3263 }
0x31a5   :  { %v2538_v4 = vmul.f32 %v3264_v28, %v3262_v57 }
0x31a7   :  { %2670 = vst.msk [vmem:[#allocation5 + $0xc] sm:$0x3] %vm984_vm5, %v2538_v4  ;;  %3099 = vmatmul.msk.f32.vlgmr.msra.gmra.mxu3 %vm996_vm12, %v2538_v4 }
0x31a8   :  { %3110 = vmatpush.xpose.msk.msra.mxu3 %vm996_vm12, %v4282_v32  ;;  %v3325_v32 = vld [vmem:[%s4531_s14 + $0x18] sm:$0xff] }
0x31ac   :  { %3111 = vmatpush.xpose.msk.msra.mxu3 %vm996_vm12, %v4288_v24  ;;  %v3326_v24 = vld [vmem:[%s4531_s14 + $0x10] sm:$0xff] }
0x322a   :  { %v2559_v5 = vpop.f32.mrf.mxu3 }
0x322b   :  { %v2562_v51 = vmul.f32 %v4275_v60, %v2559_v5 }
0x322d   :  { %3100 = vmatmul.msk.f32.vlgmr.msrb.gmra.mxu0 %vm89_vm0, %v2562_v51 }
0x322e   :  { %2836 = vmatpush.msrb.mxu0 %v4239_v55  ;;  %v3327_v55 = vld [vmem:[%s4531_s14 + $0x8] sm:$0xff] }
0x3230   :  { %2837 = vmatpush.msrb.mxu0 %v4243_v27 }
0x3235   :  { %3104 = vmatmul.msk.f32.vlgmr.msra.gmra.mxu0 %vm135_vm2, %v2481_v42 }
0x32aa   :  { %v2583_v36 = vpop.f32.mrf.mxu0 }
0x32ab   :  { %3102 = vmatmul.msk.f32.vlgmr.msrb.gmra.mxu2 %vm135_vm2, %v2583_v36 }
0x32ac   :  { %2877 = vmatpush.msrb.mxu2 %v3325_v32 }
0x32ae   :  { %2878 = vmatpush.msrb.mxu2 %v3326_v24 }
0x32b0   :  { %2879 = vmatpush.msrb.mxu2 %v3327_v55 }
0x32b2   :  { %v2688_v27 = vpop.f32.mrf.mxu0  ;;  %2880 = vmatpush.msrb.mxu2 %v3328_v6 }
0x32b3   :  { %v2689_v10 = vadd.f32 %v4219_v44, %v2688_v27  ;;  %v4421_v27 = vadd.f32 %v4407_v62, %v4008_v1 }
0x32b5   :  { %v2692_v21 = vrot.slane %v2689_v10, 2  ;;  %v1124_v6 = vsel %vm239_vm7, %v4421_v27, -inf  ;;  %v4427_v10 = vadd.f32 %v4407_v62, %v4120_v58 }
0x32b7   :  { %v2694_v0 = vadd.f32 %v2692_v21, %v4140_v43  ;;  %2714 = vrot.lane.b32.xlu2 %v2692_v21, %s3412_s29  ;;  %v1634_v21 = vsel %vm239_vm7, %v4427_v10, -inf }
0x32b9   :  { %v3105_v22 = vmul.f32 -1.442695, %v2694_v0  ;;  %v4433_v0 = vadd.f32 %v4407_v62, %v4180_v59 }
0x32bb   :  { %3265 = vpow2.f32 %v3105_v22  ;;  %v1890_v1 = vsel %vm239_vm7, %v4433_v0, -inf  ;;  %v4439_v22 = vadd.f32 %v4407_v62, %v4299_v15 }
0x32bd   :  { %v2142_v58 = vsel %vm239_vm7, %v4439_v22, -inf }
0x32c1   :  { %v3266_v18 = vpop.eup %3265 }
0x32c2   :  { %v2698_v23 = vadd.f32 1.0, %v3266_v18  ;;  %v4445_v18 = vadd.f32 %v4407_v62, %v4354_v47 }
0x32c4   :  { %3267 = vrcp.f32 %v2698_v23  ;;  %v2710_v9 = vand.u32 2147483648, %v2698_v23  ;;  %v2708_v11 = vand.u32 2147483647, %v2698_v23  ;;  %vm2704_vm14 = vweird.f32 %v2698_v23 }
0x32c5   :  { %v2398_v59 = vsel %vm239_vm7, %v4445_v18, -inf }
0x32c6   :  { %v2711_v44 = vor.u32 1.1754944e-38, %v2710_v9  ;;  %vm2709_vm1 = vcmp.eq.f32.partialorder %v2708_v11, 8.507059e+37 }
0x32ca   :  { %v3268_v20 = vpop.eup %3267 }
0x32cb   :  { %v2700_v8 = vmul.f32 %v3268_v20, %v2698_v23  ;;  %vm2705_vm13 = vweird.f32 %v3268_v20 }
0x32cc   :  { %vm2706_vm15 = vmor %vm2704_vm14, %vm2705_vm13 }
0x32cd   :  { %v2701_v7 = vsub.f32 1.0, %v2700_v8 }
0x32cf   :  { %v2702_v50 = vmul.f32 %v3268_v20, %v2701_v7 }
0x32d1   :  { %v2703_v12 = vadd.f32 %v3268_v20, %v2702_v50 }
0x32d3   :  { %v2707_v13 = vsel %vm2706_vm15, %v3268_v20, %v2703_v12 }
0x32d4   :  { %v2712_v33 = vsel %vm2709_vm1, %v2711_v44, %v2707_v13 }
0x32d5   :  { %v2732_v53 = vmul.f32 %v2730_v56, %v2712_v33  ;;  %v2724_v40 = vsub.f32 1.0, %v2712_v33 }
0x3311   :  { %v2715_v34 = vpop.permute.xlu2 %2714 }
0x3312   :  { %v2717_v35 = vmul.f32 %v2715_v34, %v2712_v33 }
0x3314   :  { %2719 = vrot.lane.b32.xlu2 %v2717_v35, %s3412_s29 }
0x332e   :  { %v2626_v39 = vpop.f32.mrf.mxu2 }
0x332f   :  { %v2627_v48 = vadd.f32 %v2626_v39, %v2603_v37 }
0x3331   :  { %v2629_v14 = vadd.f32 %v4382_v49, %v2627_v48 }
0x3333   :  { %3269 = vtanh.f32 %v2629_v14 }
0x3339   :  { %v3270_v19 = vpop.eup %3269 }
0x333a   :  { %3103 = vmatmul.msk.f32.vlgmr.msrb.gmra.mxu3 %vm135_vm2, %v3270_v19 }
0x333b   :  { %2902 = vmatpush.msrb.mxu3 %v3330_v54 }
0x333d   :  { %2903 = vmatpush.msrb.mxu3 %v3331_v25 }
0x333f   :  { %2904 = vmatpush.msrb.mxu3 %v3332_v46 }
0x3341   :  { %2905 = vmatpush.msrb.mxu3 %v3333_v26 }
0x336e   :  { %v2720_v17 = vpop.permute.xlu2 %2719 }
0x336f   :  { %v2722_v45 = vadd.f32 %v2720_v17, %v4140_v43  ;;  %v1376_v43 = vadd.f32 %v4407_v62, %v4063_v16 }
0x3371   :  { %3271 = vtanh.f32 %v2722_v45  ;;  %v1378_v63 = vsel %vm239_vm7, %v1376_v43, -inf }
0x3377   :  { %v3272_v61 = vpop.eup %3271 }
0x3378   :  { %2726 = vrot.lane.b32.xlu2 %v3272_v61, %s3413_s7 }
0x33bd   :  { %v2651_v11 = vpop.f32.mrf.mxu3 }
0x33be   :  { %v4452_v47 = vadd.f32 %v4407_v62, %v2651_v11 }
0x33c0   :  { %v2654_v56 = vsel %vm239_vm7, %v4452_v47, -inf }
0x33d2   :  { %v2727_v41 = vpop.permute.xlu2 %2726 }
0x33d3   :  { %v2729_v42 = vmul.f32 %v2727_v41, %v2724_v40 }
0x33d5   :  { %v4400_v30 = vadd.f32 %v2732_v53, %v2729_v42 }
0x33d7   :  { %v2735_v52 = vrot.slane %v4400_v30, 6 }
0x33d9   :  { %2736 = vrot.lane.b32.xlu0 %v2735_v52, %s3413_s7 }
0x3403   :  { %1379 = vmax.xlane.f32.xlu0 %v1378_v63 }
0x344b   :  { %v2737_v29 = vpop.permute.xlu0 %2736 }
0x344c   :  { %3108 = vmatmul.msk.f32.vlgmr.msra.gmra.mxu1 %vm135_vm2, %v2737_v29 }
0x3454   :  { %3114 = vmatmul.msk.f32.vlgmr.msrb.gmra.mxu1 %vm135_vm2, %v2737_v29 }
0x3476   :  { %v1380_v2 = vpop.xlane.xlu0 %1379 }
0x3477   :  { %v1381_v31 = vsub.f32 %v1376_v43, %v1380_v2 }
0x3479   :  { %v1382_v57 = vmul.f32 1.442695, %v1381_v31 }
0x347b   :  { %3273 = vpow2.f32 %v1382_v57 }
0x3481   :  { %v3274_v38 = vpop.eup %3273 }
0x3482   :  { %v1384_v3 = vsel %vm239_vm7, %v3274_v38, 0.0 }
0x3483   :  { %1385 = vadd.xlane.f32.xlu0 %v1384_v3 }
0x34c9   :  { %v2757_v28 = vpop.f32.mrf.mxu1 }
0x34ca   :  { %v2760_v4 = vmul.f32 %v4275_v60, %v2757_v28 }
0x34cc   :  { %3109 = vmatmul.msk.f32.vlgmr.msra.gmra.mxu2 %vm89_vm0, %v2760_v4 }
0x34f6   :  { %v1386_v16 = vpop.xlane.xlu0 %1385 }
0x34f7   :  { %3275 = vlog2.f32 %v1386_v16 }
0x34fd   :  { %v3276_v5 = vpop.eup %3275 }
0x34fe   :  { %v1388_v51 = vmul.f32 0.6931472, %v3276_v5 }
0x3500   :  { %v1389_v36 = vadd.f32 %v1388_v51, %v1380_v2 }
0x3502   :  { %v1390_v32 = vsub.f32 %v1376_v43, %v1389_v36 }
0x3504   :  { %1392 = vst.msk [vmem:[#allocation3 + $0x2] sm:$0x3] %vm239_vm7, %v1390_v32 }
0x354f   :  { %v2781_v24 = vpop.f32.mrf.mxu2 }
0x3550   :  { %v2784_v55 = vsel %vm984_vm5, %v2781_v24, -inf }
0x3551   :  { %2785 = vmax.xlane.f32.xlu1 %v2784_v55 }
0x3559   :  { %1125 = vmax.xlane.f32.xlu1 %v1124_v6 }
0x3561   :  { %1635 = vmax.xlane.f32.xlu1 %v1634_v21 }
0x3569   :  { %1891 = vmax.xlane.f32.xlu1 %v1890_v1 }
0x3571   :  { %2143 = vmax.xlane.f32.xlu1 %v2142_v58 }
0x3579   :  { %2399 = vmax.xlane.f32.xlu1 %v2398_v59 }
0x35c4   :  { %v2786_v23 = vpop.xlane.xlu1 %2785 }
0x35c5   :  { %v2787_v20 = vsub.f32 %v2781_v24, %v2786_v23 }
0x35c7   :  { %v2788_v8 = vmul.f32 1.442695, %v2787_v20 }
0x35c9   :  { %3277 = vpow2.f32 %v2788_v8 }
0x35cc   :  { %v1126_v7 = vpop.xlane.xlu1 %1125 }
0x35cd   :  { %v1127_v15 = vsub.f32 %v4421_v27, %v1126_v7 }
0x35cf   :  { %v3278_v9 = vpop.eup %3277  ;;  %v1128_v12 = vmul.f32 1.442695, %v1127_v15 }
0x35d0   :  { %v2790_v50 = vsel %vm984_vm5, %v3278_v9, 0.0 }
0x35d1   :  { %2791 = vadd.xlane.f32.xlu2 %v2790_v50  ;;  %3279 = vpow2.f32 %v1128_v12 }
0x35d4   :  { %v4454_v44 = vpop.xlane.xlu1 %1635 }
0x35d7   :  { %v3280_v33 = vpop.eup %3279 }
0x35d8   :  { %v1130_v35 = vsel %vm239_vm7, %v3280_v33, 0.0 }
0x35d9   :  { %2655 = vmax.xlane.f32.xlu2 %v2654_v56 }
0x35dc   :  { %v1892_v13 = vpop.xlane.xlu1 %1891 }
0x35dd   :  { %v1893_v53 = vsub.f32 %v4433_v0, %v1892_v13 }
0x35df   :  { %v1894_v34 = vmul.f32 1.442695, %v1893_v53 }
0x35e1   :  { %3281 = vpow2.f32 %v1894_v34  ;;  %1131 = vadd.xlane.f32.xlu2 %v1130_v35 }
0x35e4   :  { %v2144_v37 = vpop.xlane.xlu1 %2143 }
0x35e5   :  { %v2145_v39 = vsub.f32 %v4439_v22, %v2144_v37 }
0x35e7   :  { %v3282_v48 = vpop.eup %3281  ;;  %v2146_v14 = vmul.f32 1.442695, %v2145_v39 }
0x35e8   :  { %v1896_v19 = vsel %vm239_vm7, %v3282_v48, 0.0 }
0x35e9   :  { %3283 = vpow2.f32 %v2146_v14  ;;  %1897 = vadd.xlane.f32.xlu2 %v1896_v19 }
0x35ef   :  { %v3284_v54 = vpop.eup %3283 }
0x35f0   :  { %v2148_v25 = vsel %vm239_vm7, %v3284_v54, 0.0 }
0x35f1   :  { %2149 = vadd.xlane.f32.xlu0 %v2148_v25 }
0x3644   :  { %v2792_v46 = vpop.xlane.xlu2 %2791 }
0x3645   :  { %3285 = vrcp.f32 %v2792_v46 }
0x364b   :  { %v3286_v26 = vpop.eup %3285 }
0x364c   :  { %v2794_v17 = vmul.f32 %v3286_v26, %v3278_v9  ;;  %v2656_v45 = vpop.xlane.xlu2 %2655 }
0x364d   :  { %v2657_v61 = vsub.f32 %v4452_v47, %v2656_v45 }
0x364e   :  { %2926 = vst.msk [vmem:[#allocation5 + $0xe] sm:$0x3] %vm984_vm5, %v2794_v17  ;;  %3112 = vmatmul.msk.f32.vlgmr.msra.gmra.mxu3 %vm996_vm12, %v2794_v17 }
0x364f   :  { %v2658_v40 = vmul.f32 1.442695, %v2657_v61 }
0x3651   :  { %3287 = vpow2.f32 %v2658_v40 }
0x3654   :  { %v1132_v41 = vpop.xlane.xlu2 %1131 }
0x3655   :  { %3289 = vlog2.f32 %v1132_v41 }
0x3657   :  { %v3288_v42 = vpop.eup %3287 }
0x3658   :  { %v2660_v52 = vsel %vm239_vm7, %v3288_v42, 0.0 }
0x3659   :  { %2661 = vadd.xlane.f32.xlu2 %v2660_v52 }
0x365b   :  { %v3290_v43 = vpop.eup %3289 }
0x365c   :  { %v1134_v63 = vmul.f32 0.6931472, %v3290_v43  ;;  %v1898_v29 = vpop.xlane.xlu2 %1897 }
0x365d   :  { %3291 = vlog2.f32 %v1898_v29 }
0x365e   :  { %v1135_v2 = vadd.f32 %v1134_v63, %v1126_v7  ;;  %v2400_v7 = vpop.xlane.xlu1 %2399 }
0x365f   :  { %v2401_v50 = vsub.f32 %v4445_v18, %v2400_v7 }
0x3660   :  { %v1136_v31 = vsub.f32 %v4421_v27, %v1135_v2 }
0x3662   :  { %1137 = vst.msk [vmem:[#allocation3] sm:$0x3] %vm239_vm7, %v1136_v31 }
0x3663   :  { %v3292_v57 = vpop.eup %3291 }
0x3664   :  { %v1900_v38 = vmul.f32 0.6931472, %v3292_v57  ;;  %v2150_v3 = vpop.xlane.xlu0 %2149 }
0x3665   :  { %3293 = vlog2.f32 %v2150_v3 }
0x3666   :  { %v1901_v28 = vadd.f32 %v1900_v38, %v1892_v13 }
0x3668   :  { %v1902_v4 = vsub.f32 %v4433_v0, %v1901_v28 }
0x366a   :  { %1904 = vst.msk [vmem:[#allocation3 + $0x6] sm:$0x3] %vm239_vm7, %v1902_v4 }
0x366b   :  { %v3294_v16 = vpop.eup %3293 }
0x366c   :  { %v2152_v5 = vmul.f32 0.6931472, %v3294_v16 }
0x366e   :  { %v2153_v51 = vadd.f32 %v2152_v5, %v2144_v37 }
0x3670   :  { %v2154_v36 = vsub.f32 %v4439_v22, %v2153_v51  ;;  %v2859_v22 = vpop.f32.mrf.mxu1 }
0x3672   :  { %2156 = vst.msk [vmem:[#allocation3 + $0x8] sm:$0x3] %vm239_vm7, %v2154_v36 }
0x36cc   :  { %v2662_v32 = vpop.xlane.xlu2 %2661 }
0x36cd   :  { %3295 = vlog2.f32 %v2662_v32 }
0x36d1   :  { %v2815_v24 = vpop.f32.mrf.mxu3 }
0x36d2   :  { %v2818_v55 = vmul.f32 %v4275_v60, %v2815_v24  ;;  %v1637_v60 = vsub.f32 %v4427_v10, %v4454_v44 }
0x36d3   :  { %v3296_v27 = vpop.eup %3295 }
0x36d4   :  { %v2664_v6 = vmul.f32 0.6931472, %v3296_v27  ;;  %3113 = vmatmul.msk.f32.vlgmr.msrb.gmra.mxu0 %vm89_vm0, %v2818_v55  ;;  %v1638_v8 = vmul.f32 1.442695, %v1637_v60 }
0x36d6   :  { %v2665_v21 = vadd.f32 %v2664_v6, %v2656_v45 }
0x36d8   :  { %v2666_v0 = vsub.f32 %v4452_v47, %v2665_v21 }
0x36da   :  { %2668 = vst.msk [vmem:[#allocation3 + $0xc] sm:$0x3] %vm239_vm7, %v2666_v0 }
0x3751   :  { %v2839_v1 = vpop.f32.mrf.mxu0 }
0x3752   :  { %3115 = vmatmul.msk.f32.vlgmr.msrb.gmra.mxu2 %vm135_vm2, %v2839_v1 }
0x37d5   :  { %v2882_v58 = vpop.f32.mrf.mxu2 }
0x37d6   :  { %v2883_v59 = vadd.f32 %v2882_v58, %v2859_v22 }
0x37d8   :  { %v2885_v23 = vadd.f32 %v4382_v49, %v2883_v59  ;;  %v2402_v49 = vmul.f32 1.442695, %v2401_v50 }
0x37da   :  { %3297 = vtanh.f32 %v2885_v23 }
0x37db   :  { %3299 = vpow2.f32 %v1638_v8 }
0x37dc   :  { %3301 = vpow2.f32 %v2402_v49 }
0x37e0   :  { %v3298_v20 = vpop.eup %3297 }
0x37e1   :  { %3116 = vmatmul.msk.f32.vlgmr.msrb.gmra.mxu3 %vm135_vm2, %v3298_v20  ;;  %v3300_v12 = vpop.eup %3299 }
0x37e2   :  { %v1640_v47 = vsel %vm239_vm7, %v3300_v12, 0.0  ;;  %v3302_v56 = vpop.eup %3301 }
0x37e3   :  { %v2404_v13 = vsel %vm239_vm7, %v3302_v56, 0.0 }
0x3864   :  { %v2907_v9 = vpop.f32.mrf.mxu3 }
0x3865   :  { %v4483_v15 = vadd.f32 %v4407_v62, %v2907_v9 }
0x3867   :  { %v2910_v11 = vsel %vm239_vm7, %v4483_v15, -inf }
0x3868   :  { %2911 = vmax.xlane.f32.xlu1 %v2910_v11 }
0x3870   :  { %1641 = vadd.xlane.f32.xlu1 %v1640_v47 }
0x3878   :  { %2405 = vadd.xlane.f32.xlu1 %v2404_v13 }
0x3891   :  { %2927 = vrot.lane.b32.xlu1 %v4400_v30, %s3413_s7  ;;  %s3415_s7 = smov 32  }
0x3892   :  { %2956 = dma.vmem_to_hbm [thread:$0]  %s2949_s17, 256, %s2951_s6, [#allocation6], %s3415_s7, %s3415_s7, %s3416_s12  }
0x38db   :  { %v2912_v62 = vpop.xlane.xlu1 %2911 }
0x38dc   :  { %v2913_v33 = vsub.f32 %v4483_v15, %v2912_v62 }
0x38de   :  { %v2914_v53 = vmul.f32 1.442695, %v2913_v33 }
0x38e0   :  { %3303 = vpow2.f32 %v2914_v53 }
0x38e3   :  { %v1642_v34 = vpop.xlane.xlu1 %1641 }
0x38e4   :  { %3305 = vlog2.f32 %v1642_v34 }
0x38e6   :  { %v3304_v35 = vpop.eup %3303 }
0x38e7   :  { %v2916_v37 = vsel %vm239_vm7, %v3304_v35, 0.0 }
0x38e8   :  { %2917 = vadd.xlane.f32.xlu0 %v2916_v37 }
0x38ea   :  { %v3306_v39 = vpop.eup %3305 }
0x38eb   :  { %v1644_v30 = vmul.f32 0.6931472, %v3306_v39  ;;  %v2406_v48 = vpop.xlane.xlu1 %2405 }
0x38ec   :  { %3307 = vlog2.f32 %v2406_v48 }
0x38ed   :  { %v1645_v14 = vadd.f32 %v1644_v30, %v4454_v44 }
0x38ef   :  { %v1646_v19 = vsub.f32 %v4427_v10, %v1645_v14 }
0x38f1   :  { %1648 = vst.msk [vmem:[#allocation3 + $0x4] sm:$0x3] %vm239_vm7, %v1646_v19 }
0x38f2   :  { %v3308_v54 = vpop.eup %3307 }
0x38f3   :  { %v2408_v25 = vmul.f32 0.6931472, %v3308_v54 }
0x38f5   :  { %v2409_v46 = vadd.f32 %v2408_v25, %v2400_v7 }
0x38f7   :  { %v2410_v26 = vsub.f32 %v4445_v18, %v2409_v46 }
0x38f9   :  { %2412 = vst.msk [vmem:[#allocation3 + $0xa] sm:$0x3] %vm239_vm7, %v2410_v26 }
0x3903   :  { %v2928_v44 = vpop.permute.xlu1 %2927 }
0x3904   :  { %2930 = vst.msk [vmem:[#allocation7 - $0x6] sm:$0xc0] %vm458_vm4, %v2928_v44 }
0x3905   :  { %2967 = dma.vmem_to_hbm [thread:$0]  %s2963_s2, 32, %s2965_s25, [#allocation6]  }
0x395b   :  { %v2918_v10 = vpop.xlane.xlu0 %2917 }
0x395c   :  { %3309 = vlog2.f32 %v2918_v10 }
0x3962   :  { %v3310_v17 = vpop.eup %3309 }
0x3963   :  { %v2920_v45 = vmul.f32 0.6931472, %v3310_v17 }
0x3965   :  { %v2921_v18 = vadd.f32 %v2920_v45, %v2912_v62 }
0x3967   :  { %v2922_v61 = vsub.f32 %v4483_v15, %v2921_v18 }
0x3969   :  { %2924 = vst.msk [vmem:[#allocation3 + $0xe] sm:$0x3] %vm239_vm7, %v2922_v61 }
0x396a   :  { %2943 = dma.vmem_to_hbm [thread:$0]  %s2936_s9, 256, %s2938_s3, [#allocation4], %s3415_s7, %s3415_s7, %s3416_s12  }
0x396b   :  { %3406 = dma.done.wait [#allocation4], 256  }
0x396c   :  { %3407 = vsyncadd [#allocation4], 4294967040 }
0x396d   :  { %3408 = dma.done.wait [#allocation6], 288  }
0x396e   :  { %3409 = vsyncadd [#allocation6], 4294967008 }
0x396f   :  { %2980 = vsyncpa [#allocation4], 1 }
0x3970   :  { %2981 = vsyncpa [#allocation6], 1 }

</bundles_post_ra>
